<compile_context>
chip_gen: v6e
topology: v6e:2x2x1
jax: 0.10.0
libtpu: 0.0.40
codegen_flags: <defaults>
</compile_context>

<pallas_src>
import functools

import jax
import jax.numpy as jnp
from jax.experimental import pallas as pl
from jax.experimental.pallas import tpu as pltpu


# -----------------------------------------------------------------------------
# Fused kernel: conv7x7/s2/p3 + frozen BN + ReLU + maxpool3x3/s2/p1 for one
# (batch, pooled-row tile) grid cell.
# -----------------------------------------------------------------------------
def _stem_fused_kernel(p_ee_ref, p_eo_ref, p_oe_ref, p_oo_ref,
                       w_ref, scale_ref, shift_ref, o_ref, cbuf_ref,
                       *, tp, oh, ow, ph, pw):
    """Grid = (batch n, pooled-row tile t).

    Computes conv rows r = 2*t*tp - 1 .. 2*(t+1)*tp - 1 (the +-1 halo needed by the
    3x3/stride-2 pool), applies folded BN + ReLU into a width-padded VMEM scratch,
    then max-pools directly at stride 2 and writes the (tp, pw, Cp) pooled tile.

    Parity planes (prepared host-side, no data expansion):
      p_ee[n,i,a,:] = x[n, 2i-4, 2a-2, :]   p_eo[n,i,a,:] = x[n, 2i-4, 2a-3, :]
      p_oe[n,i,a,:] = x[n, 2i-5, 2a-2, :]   p_oo[n,i,a,:] = x[n, 2i-5, 2a-3, :]
    (zero outside the image), which makes every in-kernel patch read unit-stride.
    """
    jr = 2 * tp + 1                       # conv rows needed by this tile (with halo)
    cp = o_ref.shape[-1]                  # lane-padded channel count
    t = pl.program_id(1)
    p0 = t * tp                           # first pooled row of this tile

    # ---- gather the 7x7 patch operand from the parity planes (unit-stride) ----
    pieces = []
    for kh in range(7):
        if kh % 2 == 1:                   # taps hitting even original rows
            rstart = 2 * p0 + (kh - 1) // 2
            even_col_ref, odd_col_ref = p_ee_ref, p_eo_ref
        else:                             # taps hitting odd original rows
            rstart = 2 * p0 + kh // 2
            even_col_ref, odd_col_ref = p_oe_ref, p_oo_ref
        for kw in range(7):
            if kw % 2 == 1:               # even original cols
                src, cstart = even_col_ref, (kw - 1) // 2
            else:                         # odd original cols
                src, cstart = odd_col_ref, kw // 2
            pieces.append(src[0, pl.ds(rstart, jr), pl.ds(cstart, ow), :])
    # K ordered as (kh, kw, ci), matching the host-side weight reshape.
    patches = jnp.concatenate(pieces, axis=-1)          # (jr, ow, 147) bf16

    w = w_ref[...]                                      # (147, cp) bf16
    # hoist the (1, cp) -> (ow, cp) broadcasts out of the row loop
    scale = jnp.broadcast_to(scale_ref[...], (ow, cp))
    shift = jnp.broadcast_to(shift_ref[...], (ow, cp))

    # ---- conv + folded BN + ReLU, row by row, into a width-padded scratch ----
    # (Pool padding is zero, which is equivalent to -inf padding post-ReLU.)
    cbuf_ref[...] = jnp.zeros_like(cbuf_ref)
    for j in range(jr):
        acc = jnp.dot(patches[j], w, preferred_element_type=jnp.float32)  # (ow, cp)
        y = jnp.maximum(acc * scale + shift, 0.0)
        if j == 0:
            # conv row -1 exists only as pool padding (first tile): zero it
            y = jnp.where(t > 0, y, 0.0)
        if j == jr - 1 and 2 * ph > oh:
            # with odd OH the last halo row falls one past the conv output
            y = jnp.where(2 * p0 + 2 * tp - 1 < oh, y, 0.0)
        cbuf_ref[j, 1:ow + 1, :] = y      # col 0 / trailing cols stay 0 (pool pad)

    # ---- 3x3 / stride-2 max pool, separable, computed directly at stride 2 ----
    c0 = cbuf_ref[:, pl.ds(0, pw, stride=2), :]
    c1 = cbuf_ref[:, pl.ds(1, pw, stride=2), :]
    c2 = cbuf_ref[:, pl.ds(2, pw, stride=2), :]
    colmax = jnp.maximum(jnp.maximum(c0, c1), c2)       # (jr, pw, cp)
    out_rows = [
        jnp.maximum(jnp.maximum(colmax[2 * i], colmax[2 * i + 1]), colmax[2 * i + 2])
        for i in range(tp)
    ]
    o_ref[0] = jnp.stack(out_rows, axis=0).astype(o_ref.dtype)


# -----------------------------------------------------------------------------
# Wrapper: StemLayer forward (NCHW in / NCHW out, PyTorch convention)
# -----------------------------------------------------------------------------
def stem_layer_forward(x_nchw, weight, gamma, beta, run_mean, run_var,
                       eps=1e-5, pool_row_tile=8):
    n, cin, h, w = x_nchw.shape
    cout, cin_w, kh_, kw_ = weight.shape
    assert cin == cin_w == 3 and kh_ == 7 and kw_ == 7

    oh = (h + 2 * 3 - 7) // 2 + 1         # conv1 output (stride 2, pad 3)
    ow = (w + 2 * 3 - 7) // 2 + 1
    ph = (oh + 2 * 1 - 3) // 2 + 1        # maxpool output (k3, s2, p1)
    pw = (ow + 2 * 1 - 3) // 2 + 1

    # pooled-row tile size: largest divisor of ph not exceeding pool_row_tile
    tp = max(1, min(pool_row_tile, ph))
    while ph % tp:
        tp -= 1
    jr = 2 * tp + 1

    cp = ((cout + 127) // 128) * 128      # lane-dense channel padding

    # ---- host glue: NHWC, bf16, parity-plane relayout (no data expansion) ----
    x = jnp.transpose(x_nchw, (0, 2, 3, 1)).astype(jnp.bfloat16)
    pad_b = max(0, 4 * ph + 2 - h)
    pad_r = max(0, 2 * ow + 2 - w)
    xq = jnp.pad(x, ((0, 0), (5, pad_b), (3, pad_r), (0, 0)))
    p_ee = xq[:, 1::2, 1::2, :][:, :2 * ph + 3, :ow + 2, :]
    p_eo = xq[:, 1::2, 0::2, :][:, :2 * ph + 3, :ow + 3, :]
    p_oe = xq[:, 0::2, 1::2, :][:, :2 * ph + 4, :ow + 2, :]
    p_oo = xq[:, 0::2, 0::2, :][:, :2 * ph + 4, :ow + 3, :]

    # conv weight as an im2col matrix (K = 7*7*3, Cout) in (kh, kw, ci) order
    w_mat = jnp.transpose(weight, (2, 3, 1, 0)).reshape(7 * 7 * 3, cout)
    w_mat = jnp.pad(w_mat, ((0, 0), (0, cp - cout))).astype(jnp.bfloat16)

    # frozen batch norm folded into per-channel scale / shift (f32)
    inv_std = jax.lax.rsqrt(run_var.astype(jnp.float32) + eps)
    scale = (gamma * inv_std).astype(jnp.float32)
    shift = (beta - run_mean * gamma * inv_std).astype(jnp.float32)
    scale = jnp.pad(scale, (0, cp - cout)).reshape(1, cp)
    shift = jnp.pad(shift, (0, cp - cout)).reshape(1, cp)

    def plane_spec(arr):
        # whole (zero-expansion) plane per image; re-DMA'd only when n changes
        return pl.BlockSpec((1,) + arr.shape[1:], lambda i, t: (i, 0, 0, 0))

    def resident_spec(arr):
        return pl.BlockSpec(arr.shape, lambda i, t: (0, 0))

    kernel = functools.partial(_stem_fused_kernel,
                               tp=tp, oh=oh, ow=ow, ph=ph, pw=pw)

    pooled = pl.pallas_call(
        kernel,
        out_shape=jax.ShapeDtypeStruct((n, ph, pw, cp), jnp.float32),
        grid_spec=pltpu.PrefetchScalarGridSpec(
            num_scalar_prefetch=0,
            grid=(n, ph // tp),
            in_specs=[plane_spec(p_ee), plane_spec(p_eo),
                      plane_spec(p_oe), plane_spec(p_oo),
                      resident_spec(w_mat), resident_spec(scale),
                      resident_spec(shift)],
            out_specs=pl.BlockSpec((1, tp, pw, cp), lambda i, t: (i, t, 0, 0)),
            scratch_shapes=[pltpu.VMEM((jr, 2 * pw + 1, cp), jnp.float32)],
        ),
        compiler_params=pltpu.CompilerParams(
            dimension_semantics=("parallel", "parallel"),
            vmem_limit_bytes=32 * 1024 * 1024),
    )(p_ee, p_eo, p_oe, p_oo, w_mat, scale, shift)

    out = pooled[:, :, :, :cout]          # drop lane padding (glue)
    return jnp.transpose(out, (0, 3, 1, 2)).astype(x_nchw.dtype)


# -----------------------------------------------------------------------------
# Pure-JAX reference (verification only)
# -----------------------------------------------------------------------------
def stem_layer_reference(x_nchw, weight, gamma, beta, run_mean, run_var,
                         eps=1e-5):
    y = jax.lax.conv_general_dilated(
        x_nchw.astype(jnp.float32), weight.astype(jnp.float32),
        window_strides=(2, 2), padding=((3, 3), (3, 3)),
        dimension_numbers=("NCHW", "OIHW", "NCHW"))
    s = gamma / jnp.sqrt(run_var + eps)
    b = beta - run_mean * s
    y = y * s[None, :, None, None] + b[None, :, None, None]
    y = jnp.maximum(y, 0.0)
    y = jax.lax.reduce_window(
        y, -jnp.inf, jax.lax.max,
        window_dimensions=(1, 1, 3, 3), window_strides=(1, 1, 2, 2),
        padding=((0, 0), (0, 0), (1, 1), (1, 1)))
    return y


# -----------------------------------------------------------------------------
if __name__ == "__main__":
    out_channels = 64                     # res50 stem width
    N, Cin, H, W = 2, 3, 16, 16

    key = jax.random.PRNGKey(0)
    k_x, k_w, k_g, k_b, k_m, k_v = jax.random.split(key, 6)

    x = jax.random.normal(k_x, (N, Cin, H, W), dtype=jnp.float32)

    # conv weight: kaiming_uniform_(a=1) -> U(-sqrt(3/fan_in), sqrt(3/fan_in))
    fan_in = Cin * 7 * 7
    bound = (3.0 / fan_in) ** 0.5
    weight = jax.random.uniform(k_w, (out_channels, Cin, 7, 7),
                                minval=-bound, maxval=bound, dtype=jnp.float32)

    # frozen / eval-mode batch-norm parameters
    gamma = jax.random.uniform(k_g, (out_channels,), minval=0.5, maxval=1.5,
                               dtype=jnp.float32)
    beta = 0.1 * jax.random.normal(k_b, (out_channels,), dtype=jnp.float32)
    run_mean = 0.1 * jax.random.normal(k_m, (out_channels,), dtype=jnp.float32)
    run_var = jax.random.uniform(k_v, (out_channels,), minval=0.5, maxval=1.5,
                                 dtype=jnp.float32)

    out = stem_layer_forward(x, weight, gamma, beta, run_mean, run_var,
                             pool_row_tile=2)   # grid = (2 images, 2 row tiles)
    out = jax.block_until_ready(out)

    ref = stem_layer_reference(x, weight, gamma, beta, run_mean, run_var)
    assert out.shape == ref.shape == (N, out_channels, 4, 4), out.shape
    max_err = float(jnp.max(jnp.abs(out - ref)))
    # bf16 inputs / f32 MXU accumulation vs. the pure-f32 reference
    assert max_err < 5e-2, max_err

    print("KERNEL_OK")
</pallas_src>

<mosaic_0001>
module attributes {stable_mosaic.version = 11 : i64} {
  func.func @_stem_fused_kernel(%arg0: i32, %arg1: i32, %arg2: memref<1x11x10x3xbf16, #tpu.memory_space<vmem>>, %arg3: memref<1x11x11x3xbf16, #tpu.memory_space<vmem>>, %arg4: memref<1x12x10x3xbf16, #tpu.memory_space<vmem>>, %arg5: memref<1x12x11x3xbf16, #tpu.memory_space<vmem>>, %arg6: memref<147x128xbf16, #tpu.memory_space<vmem>>, %arg7: memref<1x128xf32, #tpu.memory_space<vmem>>, %arg8: memref<1x128xf32, #tpu.memory_space<vmem>>, %arg9: memref<1x2x4x128xf32, #tpu.memory_space<vmem>>, %arg10: memref<5x9x128xf32, #tpu.memory_space<vmem>>) attributes {dimension_semantics = [#tpu.dimension_semantics<parallel>, #tpu.dimension_semantics<parallel>], iteration_bounds = array<i64: 2, 2>, scalar_prefetch = 0 : i64, scratch_operands = 1 : i64, tpu.core_type = #tpu.core_type<tc>, window_params = [{transform_indices = @transform_0, window_bounds = array<i64: 1, 11, 10, 3>}, {transform_indices = @transform_1, window_bounds = array<i64: 1, 11, 11, 3>}, {transform_indices = @transform_2, window_bounds = array<i64: 1, 12, 10, 3>}, {transform_indices = @transform_3, window_bounds = array<i64: 1, 12, 11, 3>}, {pipeline_mode = #tpu.pipeline_mode<synchronous>, transform_indices = @transform_4, window_bounds = array<i64: 147, 128>}, {pipeline_mode = #tpu.pipeline_mode<synchronous>, transform_indices = @transform_5, window_bounds = array<i64: 1, 128>}, {pipeline_mode = #tpu.pipeline_mode<synchronous>, transform_indices = @transform_6, window_bounds = array<i64: 1, 128>}, {transform_indices = @transform_7, window_bounds = array<i64: 1, 2, 4, 128>}]} {
    %c2_i32 = arith.constant 2 : i32
    %0 = arith.muli %arg1, %c2_i32 : i32
    %c2_i32_0 = arith.constant 2 : i32
    %1 = arith.muli %c2_i32_0, %0 : i32
    %c0_i32 = arith.constant 0 : i32
    %2 = arith.addi %1, %c0_i32 : i32
    %c0 = arith.constant 0 : index
    %3 = arith.index_cast %2 : i32 to index
    %c0_1 = arith.constant 0 : index
    %c0_2 = arith.constant 0 : index
    %4 = vector.load %arg5[%c0, %3, %c0_1, %c0_2] : memref<1x12x11x3xbf16, #tpu.memory_space<vmem>>, vector<1x5x8x3xbf16>
    %5 = vector.shape_cast %4 : vector<1x5x8x3xbf16> to vector<5x8x3xbf16>
    %c0_3 = arith.constant 0 : index
    %6 = arith.index_cast %2 : i32 to index
    %c0_4 = arith.constant 0 : index
    %c0_5 = arith.constant 0 : index
    %7 = vector.load %arg4[%c0_3, %6, %c0_4, %c0_5] : memref<1x12x10x3xbf16, #tpu.memory_space<vmem>>, vector<1x5x8x3xbf16>
    %8 = vector.shape_cast %7 : vector<1x5x8x3xbf16> to vector<5x8x3xbf16>
    %c0_6 = arith.constant 0 : index
    %9 = arith.index_cast %2 : i32 to index
    %c1 = arith.constant 1 : index
    %c0_7 = arith.constant 0 : index
    %10 = vector.load %arg5[%c0_6, %9, %c1, %c0_7] : memref<1x12x11x3xbf16, #tpu.memory_space<vmem>>, vector<1x5x8x3xbf16>
    %11 = vector.shape_cast %10 : vector<1x5x8x3xbf16> to vector<5x8x3xbf16>
    %c0_8 = arith.constant 0 : index
    %12 = arith.index_cast %2 : i32 to index
    %c1_9 = arith.constant 1 : index
    %c0_10 = arith.constant 0 : index
    %13 = vector.load %arg4[%c0_8, %12, %c1_9, %c0_10] : memref<1x12x10x3xbf16, #tpu.memory_space<vmem>>, vector<1x5x8x3xbf16>
    %14 = vector.shape_cast %13 : vector<1x5x8x3xbf16> to vector<5x8x3xbf16>
    %c0_11 = arith.constant 0 : index
    %15 = arith.index_cast %2 : i32 to index
    %c2 = arith.constant 2 : index
    %c0_12 = arith.constant 0 : index
    %16 = vector.load %arg5[%c0_11, %15, %c2, %c0_12] : memref<1x12x11x3xbf16, #tpu.memory_space<vmem>>, vector<1x5x8x3xbf16>
    %17 = vector.shape_cast %16 : vector<1x5x8x3xbf16> to vector<5x8x3xbf16>
    %c0_13 = arith.constant 0 : index
    %18 = arith.index_cast %2 : i32 to index
    %c2_14 = arith.constant 2 : index
    %c0_15 = arith.constant 0 : index
    %19 = vector.load %arg4[%c0_13, %18, %c2_14, %c0_15] : memref<1x12x10x3xbf16, #tpu.memory_space<vmem>>, vector<1x5x8x3xbf16>
    %20 = vector.shape_cast %19 : vector<1x5x8x3xbf16> to vector<5x8x3xbf16>
    %c0_16 = arith.constant 0 : index
    %21 = arith.index_cast %2 : i32 to index
    %c3 = arith.constant 3 : index
    %c0_17 = arith.constant 0 : index
    %22 = vector.load %arg5[%c0_16, %21, %c3, %c0_17] : memref<1x12x11x3xbf16, #tpu.memory_space<vmem>>, vector<1x5x8x3xbf16>
    %23 = vector.shape_cast %22 : vector<1x5x8x3xbf16> to vector<5x8x3xbf16>
    %c2_i32_18 = arith.constant 2 : i32
    %24 = arith.muli %c2_i32_18, %0 : i32
    %c0_i32_19 = arith.constant 0 : i32
    %25 = arith.addi %24, %c0_i32_19 : i32
    %c0_20 = arith.constant 0 : index
    %26 = arith.index_cast %25 : i32 to index
    %c0_21 = arith.constant 0 : index
    %c0_22 = arith.constant 0 : index
    %27 = vector.load %arg3[%c0_20, %26, %c0_21, %c0_22] : memref<1x11x11x3xbf16, #tpu.memory_space<vmem>>, vector<1x5x8x3xbf16>
    %28 = vector.shape_cast %27 : vector<1x5x8x3xbf16> to vector<5x8x3xbf16>
    %c0_23 = arith.constant 0 : index
    %29 = arith.index_cast %25 : i32 to index
    %c0_24 = arith.constant 0 : index
    %c0_25 = arith.constant 0 : index
    %30 = vector.load %arg2[%c0_23, %29, %c0_24, %c0_25] : memref<1x11x10x3xbf16, #tpu.memory_space<vmem>>, vector<1x5x8x3xbf16>
    %31 = vector.shape_cast %30 : vector<1x5x8x3xbf16> to vector<5x8x3xbf16>
    %c0_26 = arith.constant 0 : index
    %32 = arith.index_cast %25 : i32 to index
    %c1_27 = arith.constant 1 : index
    %c0_28 = arith.constant 0 : index
    %33 = vector.load %arg3[%c0_26, %32, %c1_27, %c0_28] : memref<1x11x11x3xbf16, #tpu.memory_space<vmem>>, vector<1x5x8x3xbf16>
    %34 = vector.shape_cast %33 : vector<1x5x8x3xbf16> to vector<5x8x3xbf16>
    %c0_29 = arith.constant 0 : index
    %35 = arith.index_cast %25 : i32 to index
    %c1_30 = arith.constant 1 : index
    %c0_31 = arith.constant 0 : index
    %36 = vector.load %arg2[%c0_29, %35, %c1_30, %c0_31] : memref<1x11x10x3xbf16, #tpu.memory_space<vmem>>, vector<1x5x8x3xbf16>
    %37 = vector.shape_cast %36 : vector<1x5x8x3xbf16> to vector<5x8x3xbf16>
    %c0_32 = arith.constant 0 : index
    %38 = arith.index_cast %25 : i32 to index
    %c2_33 = arith.constant 2 : index
    %c0_34 = arith.constant 0 : index
    %39 = vector.load %arg3[%c0_32, %38, %c2_33, %c0_34] : memref<1x11x11x3xbf16, #tpu.memory_space<vmem>>, vector<1x5x8x3xbf16>
    %40 = vector.shape_cast %39 : vector<1x5x8x3xbf16> to vector<5x8x3xbf16>
    %c0_35 = arith.constant 0 : index
    %41 = arith.index_cast %25 : i32 to index
    %c2_36 = arith.constant 2 : index
    %c0_37 = arith.constant 0 : index
    %42 = vector.load %arg2[%c0_35, %41, %c2_36, %c0_37] : memref<1x11x10x3xbf16, #tpu.memory_space<vmem>>, vector<1x5x8x3xbf16>
    %43 = vector.shape_cast %42 : vector<1x5x8x3xbf16> to vector<5x8x3xbf16>
    %c0_38 = arith.constant 0 : index
    %44 = arith.index_cast %25 : i32 to index
    %c3_39 = arith.constant 3 : index
    %c0_40 = arith.constant 0 : index
    %45 = vector.load %arg3[%c0_38, %44, %c3_39, %c0_40] : memref<1x11x11x3xbf16, #tpu.memory_space<vmem>>, vector<1x5x8x3xbf16>
    %46 = vector.shape_cast %45 : vector<1x5x8x3xbf16> to vector<5x8x3xbf16>
    %c2_i32_41 = arith.constant 2 : i32
    %47 = arith.muli %c2_i32_41, %0 : i32
    %c1_i32 = arith.constant 1 : i32
    %48 = arith.addi %47, %c1_i32 : i32
    %c0_42 = arith.constant 0 : index
    %49 = arith.index_cast %48 : i32 to index
    %c0_43 = arith.constant 0 : index
    %c0_44 = arith.constant 0 : index
    %50 = vector.load %arg5[%c0_42, %49, %c0_43, %c0_44] : memref<1x12x11x3xbf16, #tpu.memory_space<vmem>>, vector<1x5x8x3xbf16>
    %51 = vector.shape_cast %50 : vector<1x5x8x3xbf16> to vector<5x8x3xbf16>
    %c0_45 = arith.constant 0 : index
    %52 = arith.index_cast %48 : i32 to index
    %c0_46 = arith.constant 0 : index
    %c0_47 = arith.constant 0 : index
    %53 = vector.load %arg4[%c0_45, %52, %c0_46, %c0_47] : memref<1x12x10x3xbf16, #tpu.memory_space<vmem>>, vector<1x5x8x3xbf16>
    %54 = vector.shape_cast %53 : vector<1x5x8x3xbf16> to vector<5x8x3xbf16>
    %c0_48 = arith.constant 0 : index
    %55 = arith.index_cast %48 : i32 to index
    %c1_49 = arith.constant 1 : index
    %c0_50 = arith.constant 0 : index
    %56 = vector.load %arg5[%c0_48, %55, %c1_49, %c0_50] : memref<1x12x11x3xbf16, #tpu.memory_space<vmem>>, vector<1x5x8x3xbf16>
    %57 = vector.shape_cast %56 : vector<1x5x8x3xbf16> to vector<5x8x3xbf16>
    %c0_51 = arith.constant 0 : index
    %58 = arith.index_cast %48 : i32 to index
    %c1_52 = arith.constant 1 : index
    %c0_53 = arith.constant 0 : index
    %59 = vector.load %arg4[%c0_51, %58, %c1_52, %c0_53] : memref<1x12x10x3xbf16, #tpu.memory_space<vmem>>, vector<1x5x8x3xbf16>
    %60 = vector.shape_cast %59 : vector<1x5x8x3xbf16> to vector<5x8x3xbf16>
    %c0_54 = arith.constant 0 : index
    %61 = arith.index_cast %48 : i32 to index
    %c2_55 = arith.constant 2 : index
    %c0_56 = arith.constant 0 : index
    %62 = vector.load %arg5[%c0_54, %61, %c2_55, %c0_56] : memref<1x12x11x3xbf16, #tpu.memory_space<vmem>>, vector<1x5x8x3xbf16>
    %63 = vector.shape_cast %62 : vector<1x5x8x3xbf16> to vector<5x8x3xbf16>
    %c0_57 = arith.constant 0 : index
    %64 = arith.index_cast %48 : i32 to index
    %c2_58 = arith.constant 2 : index
    %c0_59 = arith.constant 0 : index
    %65 = vector.load %arg4[%c0_57, %64, %c2_58, %c0_59] : memref<1x12x10x3xbf16, #tpu.memory_space<vmem>>, vector<1x5x8x3xbf16>
    %66 = vector.shape_cast %65 : vector<1x5x8x3xbf16> to vector<5x8x3xbf16>
    %c0_60 = arith.constant 0 : index
    %67 = arith.index_cast %48 : i32 to index
    %c3_61 = arith.constant 3 : index
    %c0_62 = arith.constant 0 : index
    %68 = vector.load %arg5[%c0_60, %67, %c3_61, %c0_62] : memref<1x12x11x3xbf16, #tpu.memory_space<vmem>>, vector<1x5x8x3xbf16>
    %69 = vector.shape_cast %68 : vector<1x5x8x3xbf16> to vector<5x8x3xbf16>
    %c2_i32_63 = arith.constant 2 : i32
    %70 = arith.muli %c2_i32_63, %0 : i32
    %c1_i32_64 = arith.constant 1 : i32
    %71 = arith.addi %70, %c1_i32_64 : i32
    %c0_65 = arith.constant 0 : index
    %72 = arith.index_cast %71 : i32 to index
    %c0_66 = arith.constant 0 : index
    %c0_67 = arith.constant 0 : index
    %73 = vector.load %arg3[%c0_65, %72, %c0_66, %c0_67] : memref<1x11x11x3xbf16, #tpu.memory_space<vmem>>, vector<1x5x8x3xbf16>
    %74 = vector.shape_cast %73 : vector<1x5x8x3xbf16> to vector<5x8x3xbf16>
    %c0_68 = arith.constant 0 : index
    %75 = arith.index_cast %71 : i32 to index
    %c0_69 = arith.constant 0 : index
    %c0_70 = arith.constant 0 : index
    %76 = vector.load %arg2[%c0_68, %75, %c0_69, %c0_70] : memref<1x11x10x3xbf16, #tpu.memory_space<vmem>>, vector<1x5x8x3xbf16>
    %77 = vector.shape_cast %76 : vector<1x5x8x3xbf16> to vector<5x8x3xbf16>
    %c0_71 = arith.constant 0 : index
    %78 = arith.index_cast %71 : i32 to index
    %c1_72 = arith.constant 1 : index
    %c0_73 = arith.constant 0 : index
    %79 = vector.load %arg3[%c0_71, %78, %c1_72, %c0_73] : memref<1x11x11x3xbf16, #tpu.memory_space<vmem>>, vector<1x5x8x3xbf16>
    %80 = vector.shape_cast %79 : vector<1x5x8x3xbf16> to vector<5x8x3xbf16>
    %c0_74 = arith.constant 0 : index
    %81 = arith.index_cast %71 : i32 to index
    %c1_75 = arith.constant 1 : index
    %c0_76 = arith.constant 0 : index
    %82 = vector.load %arg2[%c0_74, %81, %c1_75, %c0_76] : memref<1x11x10x3xbf16, #tpu.memory_space<vmem>>, vector<1x5x8x3xbf16>
    %83 = vector.shape_cast %82 : vector<1x5x8x3xbf16> to vector<5x8x3xbf16>
    %c0_77 = arith.constant 0 : index
    %84 = arith.index_cast %71 : i32 to index
    %c2_78 = arith.constant 2 : index
    %c0_79 = arith.constant 0 : index
    %85 = vector.load %arg3[%c0_77, %84, %c2_78, %c0_79] : memref<1x11x11x3xbf16, #tpu.memory_space<vmem>>, vector<1x5x8x3xbf16>
    %86 = vector.shape_cast %85 : vector<1x5x8x3xbf16> to vector<5x8x3xbf16>
    %c0_80 = arith.constant 0 : index
    %87 = arith.index_cast %71 : i32 to index
    %c2_81 = arith.constant 2 : index
    %c0_82 = arith.constant 0 : index
    %88 = vector.load %arg2[%c0_80, %87, %c2_81, %c0_82] : memref<1x11x10x3xbf16, #tpu.memory_space<vmem>>, vector<1x5x8x3xbf16>
    %89 = vector.shape_cast %88 : vector<1x5x8x3xbf16> to vector<5x8x3xbf16>
    %c0_83 = arith.constant 0 : index
    %90 = arith.index_cast %71 : i32 to index
    %c3_84 = arith.constant 3 : index
    %c0_85 = arith.constant 0 : index
    %91 = vector.load %arg3[%c0_83, %90, %c3_84, %c0_85] : memref<1x11x11x3xbf16, #tpu.memory_space<vmem>>, vector<1x5x8x3xbf16>
    %92 = vector.shape_cast %91 : vector<1x5x8x3xbf16> to vector<5x8x3xbf16>
    %c2_i32_86 = arith.constant 2 : i32
    %93 = arith.muli %c2_i32_86, %0 : i32
    %c2_i32_87 = arith.constant 2 : i32
    %94 = arith.addi %93, %c2_i32_87 : i32
    %c0_88 = arith.constant 0 : index
    %95 = arith.index_cast %94 : i32 to index
    %c0_89 = arith.constant 0 : index
    %c0_90 = arith.constant 0 : index
    %96 = vector.load %arg5[%c0_88, %95, %c0_89, %c0_90] : memref<1x12x11x3xbf16, #tpu.memory_space<vmem>>, vector<1x5x8x3xbf16>
    %97 = vector.shape_cast %96 : vector<1x5x8x3xbf16> to vector<5x8x3xbf16>
    %c0_91 = arith.constant 0 : index
    %98 = arith.index_cast %94 : i32 to index
    %c0_92 = arith.constant 0 : index
    %c0_93 = arith.constant 0 : index
    %99 = vector.load %arg4[%c0_91, %98, %c0_92, %c0_93] : memref<1x12x10x3xbf16, #tpu.memory_space<vmem>>, vector<1x5x8x3xbf16>
    %100 = vector.shape_cast %99 : vector<1x5x8x3xbf16> to vector<5x8x3xbf16>
    %c0_94 = arith.constant 0 : index
    %101 = arith.index_cast %94 : i32 to index
    %c1_95 = arith.constant 1 : index
    %c0_96 = arith.constant 0 : index
    %102 = vector.load %arg5[%c0_94, %101, %c1_95, %c0_96] : memref<1x12x11x3xbf16, #tpu.memory_space<vmem>>, vector<1x5x8x3xbf16>
    %103 = vector.shape_cast %102 : vector<1x5x8x3xbf16> to vector<5x8x3xbf16>
    %c0_97 = arith.constant 0 : index
    %104 = arith.index_cast %94 : i32 to index
    %c1_98 = arith.constant 1 : index
    %c0_99 = arith.constant 0 : index
    %105 = vector.load %arg4[%c0_97, %104, %c1_98, %c0_99] : memref<1x12x10x3xbf16, #tpu.memory_space<vmem>>, vector<1x5x8x3xbf16>
    %106 = vector.shape_cast %105 : vector<1x5x8x3xbf16> to vector<5x8x3xbf16>
    %c0_100 = arith.constant 0 : index
    %107 = arith.index_cast %94 : i32 to index
    %c2_101 = arith.constant 2 : index
    %c0_102 = arith.constant 0 : index
    %108 = vector.load %arg5[%c0_100, %107, %c2_101, %c0_102] : memref<1x12x11x3xbf16, #tpu.memory_space<vmem>>, vector<1x5x8x3xbf16>
    %109 = vector.shape_cast %108 : vector<1x5x8x3xbf16> to vector<5x8x3xbf16>
    %c0_103 = arith.constant 0 : index
    %110 = arith.index_cast %94 : i32 to index
    %c2_104 = arith.constant 2 : index
    %c0_105 = arith.constant 0 : index
    %111 = vector.load %arg4[%c0_103, %110, %c2_104, %c0_105] : memref<1x12x10x3xbf16, #tpu.memory_space<vmem>>, vector<1x5x8x3xbf16>
    %112 = vector.shape_cast %111 : vector<1x5x8x3xbf16> to vector<5x8x3xbf16>
    %c0_106 = arith.constant 0 : index
    %113 = arith.index_cast %94 : i32 to index
    %c3_107 = arith.constant 3 : index
    %c0_108 = arith.constant 0 : index
    %114 = vector.load %arg5[%c0_106, %113, %c3_107, %c0_108] : memref<1x12x11x3xbf16, #tpu.memory_space<vmem>>, vector<1x5x8x3xbf16>
    %115 = vector.shape_cast %114 : vector<1x5x8x3xbf16> to vector<5x8x3xbf16>
    %c2_i32_109 = arith.constant 2 : i32
    %116 = arith.muli %c2_i32_109, %0 : i32
    %c2_i32_110 = arith.constant 2 : i32
    %117 = arith.addi %116, %c2_i32_110 : i32
    %c0_111 = arith.constant 0 : index
    %118 = arith.index_cast %117 : i32 to index
    %c0_112 = arith.constant 0 : index
    %c0_113 = arith.constant 0 : index
    %119 = vector.load %arg3[%c0_111, %118, %c0_112, %c0_113] : memref<1x11x11x3xbf16, #tpu.memory_space<vmem>>, vector<1x5x8x3xbf16>
    %120 = vector.shape_cast %119 : vector<1x5x8x3xbf16> to vector<5x8x3xbf16>
    %c0_114 = arith.constant 0 : index
    %121 = arith.index_cast %117 : i32 to index
    %c0_115 = arith.constant 0 : index
    %c0_116 = arith.constant 0 : index
    %122 = vector.load %arg2[%c0_114, %121, %c0_115, %c0_116] : memref<1x11x10x3xbf16, #tpu.memory_space<vmem>>, vector<1x5x8x3xbf16>
    %123 = vector.shape_cast %122 : vector<1x5x8x3xbf16> to vector<5x8x3xbf16>
    %c0_117 = arith.constant 0 : index
    %124 = arith.index_cast %117 : i32 to index
    %c1_118 = arith.constant 1 : index
    %c0_119 = arith.constant 0 : index
    %125 = vector.load %arg3[%c0_117, %124, %c1_118, %c0_119] : memref<1x11x11x3xbf16, #tpu.memory_space<vmem>>, vector<1x5x8x3xbf16>
    %126 = vector.shape_cast %125 : vector<1x5x8x3xbf16> to vector<5x8x3xbf16>
    %c0_120 = arith.constant 0 : index
    %127 = arith.index_cast %117 : i32 to index
    %c1_121 = arith.constant 1 : index
    %c0_122 = arith.constant 0 : index
    %128 = vector.load %arg2[%c0_120, %127, %c1_121, %c0_122] : memref<1x11x10x3xbf16, #tpu.memory_space<vmem>>, vector<1x5x8x3xbf16>
    %129 = vector.shape_cast %128 : vector<1x5x8x3xbf16> to vector<5x8x3xbf16>
    %c0_123 = arith.constant 0 : index
    %130 = arith.index_cast %117 : i32 to index
    %c2_124 = arith.constant 2 : index
    %c0_125 = arith.constant 0 : index
    %131 = vector.load %arg3[%c0_123, %130, %c2_124, %c0_125] : memref<1x11x11x3xbf16, #tpu.memory_space<vmem>>, vector<1x5x8x3xbf16>
    %132 = vector.shape_cast %131 : vector<1x5x8x3xbf16> to vector<5x8x3xbf16>
    %c0_126 = arith.constant 0 : index
    %133 = arith.index_cast %117 : i32 to index
    %c2_127 = arith.constant 2 : index
    %c0_128 = arith.constant 0 : index
    %134 = vector.load %arg2[%c0_126, %133, %c2_127, %c0_128] : memref<1x11x10x3xbf16, #tpu.memory_space<vmem>>, vector<1x5x8x3xbf16>
    %135 = vector.shape_cast %134 : vector<1x5x8x3xbf16> to vector<5x8x3xbf16>
    %c0_129 = arith.constant 0 : index
    %136 = arith.index_cast %117 : i32 to index
    %c3_130 = arith.constant 3 : index
    %c0_131 = arith.constant 0 : index
    %137 = vector.load %arg3[%c0_129, %136, %c3_130, %c0_131] : memref<1x11x11x3xbf16, #tpu.memory_space<vmem>>, vector<1x5x8x3xbf16>
    %138 = vector.shape_cast %137 : vector<1x5x8x3xbf16> to vector<5x8x3xbf16>
    %c2_i32_132 = arith.constant 2 : i32
    %139 = arith.muli %c2_i32_132, %0 : i32
    %c3_i32 = arith.constant 3 : i32
    %140 = arith.addi %139, %c3_i32 : i32
    %c0_133 = arith.constant 0 : index
    %141 = arith.index_cast %140 : i32 to index
    %c0_134 = arith.constant 0 : index
    %c0_135 = arith.constant 0 : index
    %142 = vector.load %arg5[%c0_133, %141, %c0_134, %c0_135] : memref<1x12x11x3xbf16, #tpu.memory_space<vmem>>, vector<1x5x8x3xbf16>
    %143 = vector.shape_cast %142 : vector<1x5x8x3xbf16> to vector<5x8x3xbf16>
    %c0_136 = arith.constant 0 : index
    %144 = arith.index_cast %140 : i32 to index
    %c0_137 = arith.constant 0 : index
    %c0_138 = arith.constant 0 : index
    %145 = vector.load %arg4[%c0_136, %144, %c0_137, %c0_138] : memref<1x12x10x3xbf16, #tpu.memory_space<vmem>>, vector<1x5x8x3xbf16>
    %146 = vector.shape_cast %145 : vector<1x5x8x3xbf16> to vector<5x8x3xbf16>
    %c0_139 = arith.constant 0 : index
    %147 = arith.index_cast %140 : i32 to index
    %c1_140 = arith.constant 1 : index
    %c0_141 = arith.constant 0 : index
    %148 = vector.load %arg5[%c0_139, %147, %c1_140, %c0_141] : memref<1x12x11x3xbf16, #tpu.memory_space<vmem>>, vector<1x5x8x3xbf16>
    %149 = vector.shape_cast %148 : vector<1x5x8x3xbf16> to vector<5x8x3xbf16>
    %c0_142 = arith.constant 0 : index
    %150 = arith.index_cast %140 : i32 to index
    %c1_143 = arith.constant 1 : index
    %c0_144 = arith.constant 0 : index
    %151 = vector.load %arg4[%c0_142, %150, %c1_143, %c0_144] : memref<1x12x10x3xbf16, #tpu.memory_space<vmem>>, vector<1x5x8x3xbf16>
    %152 = vector.shape_cast %151 : vector<1x5x8x3xbf16> to vector<5x8x3xbf16>
    %c0_145 = arith.constant 0 : index
    %153 = arith.index_cast %140 : i32 to index
    %c2_146 = arith.constant 2 : index
    %c0_147 = arith.constant 0 : index
    %154 = vector.load %arg5[%c0_145, %153, %c2_146, %c0_147] : memref<1x12x11x3xbf16, #tpu.memory_space<vmem>>, vector<1x5x8x3xbf16>
    %155 = vector.shape_cast %154 : vector<1x5x8x3xbf16> to vector<5x8x3xbf16>
    %c0_148 = arith.constant 0 : index
    %156 = arith.index_cast %140 : i32 to index
    %c2_149 = arith.constant 2 : index
    %c0_150 = arith.constant 0 : index
    %157 = vector.load %arg4[%c0_148, %156, %c2_149, %c0_150] : memref<1x12x10x3xbf16, #tpu.memory_space<vmem>>, vector<1x5x8x3xbf16>
    %158 = vector.shape_cast %157 : vector<1x5x8x3xbf16> to vector<5x8x3xbf16>
    %c0_151 = arith.constant 0 : index
    %159 = arith.index_cast %140 : i32 to index
    %c3_152 = arith.constant 3 : index
    %c0_153 = arith.constant 0 : index
    %160 = vector.load %arg5[%c0_151, %159, %c3_152, %c0_153] : memref<1x12x11x3xbf16, #tpu.memory_space<vmem>>, vector<1x5x8x3xbf16>
    %161 = vector.shape_cast %160 : vector<1x5x8x3xbf16> to vector<5x8x3xbf16>
    %162 = tpu.concatenate %5, %8, %11, %14, %17, %20, %23, %28, %31, %34, %37, %40, %43, %46, %51, %54 in 2 : vector<5x8x3xbf16>, vector<5x8x3xbf16>, vector<5x8x3xbf16>, vector<5x8x3xbf16>, vector<5x8x3xbf16>, vector<5x8x3xbf16>, vector<5x8x3xbf16>, vector<5x8x3xbf16>, vector<5x8x3xbf16>, vector<5x8x3xbf16>, vector<5x8x3xbf16>, vector<5x8x3xbf16>, vector<5x8x3xbf16>, vector<5x8x3xbf16>, vector<5x8x3xbf16>, vector<5x8x3xbf16> -> vector<5x8x48xbf16>
    %163 = tpu.concatenate %57, %60, %63, %66, %69, %74, %77, %80, %83, %86, %89, %92, %97, %100, %103, %106 in 2 : vector<5x8x3xbf16>, vector<5x8x3xbf16>, vector<5x8x3xbf16>, vector<5x8x3xbf16>, vector<5x8x3xbf16>, vector<5x8x3xbf16>, vector<5x8x3xbf16>, vector<5x8x3xbf16>, vector<5x8x3xbf16>, vector<5x8x3xbf16>, vector<5x8x3xbf16>, vector<5x8x3xbf16>, vector<5x8x3xbf16>, vector<5x8x3xbf16>, vector<5x8x3xbf16>, vector<5x8x3xbf16> -> vector<5x8x48xbf16>
    %164 = tpu.concatenate %109, %112, %115, %120, %123, %126, %129, %132, %135, %138, %143, %146, %149, %152, %155, %158 in 2 : vector<5x8x3xbf16>, vector<5x8x3xbf16>, vector<5x8x3xbf16>, vector<5x8x3xbf16>, vector<5x8x3xbf16>, vector<5x8x3xbf16>, vector<5x8x3xbf16>, vector<5x8x3xbf16>, vector<5x8x3xbf16>, vector<5x8x3xbf16>, vector<5x8x3xbf16>, vector<5x8x3xbf16>, vector<5x8x3xbf16>, vector<5x8x3xbf16>, vector<5x8x3xbf16>, vector<5x8x3xbf16> -> vector<5x8x48xbf16>
    %165 = tpu.concatenate %162, %163, %164, %161 in 2 : vector<5x8x48xbf16>, vector<5x8x48xbf16>, vector<5x8x48xbf16>, vector<5x8x3xbf16> -> vector<5x8x147xbf16>
    %c0_154 = arith.constant 0 : index
    %c0_155 = arith.constant 0 : index
    %166 = vector.load %arg6[%c0_154, %c0_155] : memref<147x128xbf16, #tpu.memory_space<vmem>>, vector<147x128xbf16>
    %c0_156 = arith.constant 0 : index
    %c0_157 = arith.constant 0 : index
    %167 = vector.load %arg7[%c0_156, %c0_157] : memref<1x128xf32, #tpu.memory_space<vmem>>, vector<1x128xf32>
    %168 = vector.shape_cast %167 : vector<1x128xf32> to vector<1x128xf32>
    %169 = vector.broadcast %168 : vector<1x128xf32> to vector<8x128xf32>
    %c0_158 = arith.constant 0 : index
    %c0_159 = arith.constant 0 : index
    %170 = vector.load %arg8[%c0_158, %c0_159] : memref<1x128xf32, #tpu.memory_space<vmem>>, vector<1x128xf32>
    %171 = vector.shape_cast %170 : vector<1x128xf32> to vector<1x128xf32>
    %172 = vector.broadcast %171 : vector<1x128xf32> to vector<8x128xf32>
    %cst = arith.constant 0.000000e+00 : f32
    %173 = vector.broadcast %cst : f32 to vector<5x9x128xf32>
    %c0_160 = arith.constant 0 : index
    %c0_161 = arith.constant 0 : index
    %c0_162 = arith.constant 0 : index
    %174 = vector.load %arg10[%c0_160, %c0_161, %c0_162] : memref<5x9x128xf32, #tpu.memory_space<vmem>>, vector<5x9x128xf32>
    tpu.vector_store %arg10[%c0_160, %c0_161, %c0_162], %173 {strides = array<i32>} : memref<5x9x128xf32, #tpu.memory_space<vmem>>, vector<5x9x128xf32>,
    %175 = vector.extract_strided_slice %165 {offsets = [0, 0, 0], sizes = [1, 8, 147], strides = [1, 1, 1]} : vector<5x8x147xbf16> to vector<1x8x147xbf16>
    %176 = vector.shape_cast %175 : vector<1x8x147xbf16> to vector<8x147xbf16>
    %cst_163 = arith.constant dense<0.000000e+00> : vector<8x128xf32>
    %177 = tpu.matmul %176, %166, %cst_163 {dimension_numbers = #tpu.dot_dimension_numbers<[1], [0], [0], [1], [0, 0, 1, 1], [], []>} : vector<8x147xbf16>, vector<147x128xbf16>, vector<8x128xf32> -> vector<8x128xf32>
    %178 = arith.mulf %177, %169 : vector<8x128xf32>
    %179 = arith.addf %178, %172 : vector<8x128xf32>
    %cst_164 = arith.constant 0.000000e+00 : f32
    %180 = vector.broadcast %cst_164 : f32 to vector<8x128xf32>
    %181 = arith.maximumf %179, %180 : vector<8x128xf32>
    %c0_i32_165 = arith.constant 0 : i32
    %182 = arith.cmpi sgt, %arg1, %c0_i32_165 : i32
    %cst_166 = arith.constant 0.000000e+00 : f32
    %183 = vector.broadcast %cst_166 : f32 to vector<8x128xf32>
    %184 = arith.select %182, %181, %183 : vector<8x128xf32>
    %c0_167 = arith.constant 0 : index
    %c1_168 = arith.constant 1 : index
    %c0_169 = arith.constant 0 : index
    %185 = vector.load %arg10[%c0_167, %c1_168, %c0_169] : memref<5x9x128xf32, #tpu.memory_space<vmem>>, vector<1x8x128xf32>
    %186 = vector.shape_cast %185 : vector<1x8x128xf32> to vector<8x128xf32>
    %187 = vector.shape_cast %184 : vector<8x128xf32> to vector<1x8x128xf32>
    tpu.vector_store %arg10[%c0_167, %c1_168, %c0_169], %187 {strides = array<i32>} : memref<5x9x128xf32, #tpu.memory_space<vmem>>, vector<1x8x128xf32>,
    %188 = vector.extract_strided_slice %165 {offsets = [1, 0, 0], sizes = [1, 8, 147], strides = [1, 1, 1]} : vector<5x8x147xbf16> to vector<1x8x147xbf16>
    %189 = vector.shape_cast %188 : vector<1x8x147xbf16> to vector<8x147xbf16>
    %cst_170 = arith.constant dense<0.000000e+00> : vector<8x128xf32>
    %190 = tpu.matmul %189, %166, %cst_170 {dimension_numbers = #tpu.dot_dimension_numbers<[1], [0], [0], [1], [0, 0, 1, 1], [], []>} : vector<8x147xbf16>, vector<147x128xbf16>, vector<8x128xf32> -> vector<8x128xf32>
    %191 = arith.mulf %190, %169 : vector<8x128xf32>
    %192 = arith.addf %191, %172 : vector<8x128xf32>
    %cst_171 = arith.constant 0.000000e+00 : f32
    %193 = vector.broadcast %cst_171 : f32 to vector<8x128xf32>
    %194 = arith.maximumf %192, %193 : vector<8x128xf32>
    %c1_172 = arith.constant 1 : index
    %c1_173 = arith.constant 1 : index
    %c0_174 = arith.constant 0 : index
    %195 = vector.load %arg10[%c1_172, %c1_173, %c0_174] : memref<5x9x128xf32, #tpu.memory_space<vmem>>, vector<1x8x128xf32>
    %196 = vector.shape_cast %195 : vector<1x8x128xf32> to vector<8x128xf32>
    %197 = vector.shape_cast %194 : vector<8x128xf32> to vector<1x8x128xf32>
    tpu.vector_store %arg10[%c1_172, %c1_173, %c0_174], %197 {strides = array<i32>} : memref<5x9x128xf32, #tpu.memory_space<vmem>>, vector<1x8x128xf32>,
    %198 = vector.extract_strided_slice %165 {offsets = [2, 0, 0], sizes = [1, 8, 147], strides = [1, 1, 1]} : vector<5x8x147xbf16> to vector<1x8x147xbf16>
    %199 = vector.shape_cast %198 : vector<1x8x147xbf16> to vector<8x147xbf16>
    %cst_175 = arith.constant dense<0.000000e+00> : vector<8x128xf32>
    %200 = tpu.matmul %199, %166, %cst_175 {dimension_numbers = #tpu.dot_dimension_numbers<[1], [0], [0], [1], [0, 0, 1, 1], [], []>} : vector<8x147xbf16>, vector<147x128xbf16>, vector<8x128xf32> -> vector<8x128xf32>
    %201 = arith.mulf %200, %169 : vector<8x128xf32>
    %202 = arith.addf %201, %172 : vector<8x128xf32>
    %cst_176 = arith.constant 0.000000e+00 : f32
    %203 = vector.broadcast %cst_176 : f32 to vector<8x128xf32>
    %204 = arith.maximumf %202, %203 : vector<8x128xf32>
    %c2_177 = arith.constant 2 : index
    %c1_178 = arith.constant 1 : index
    %c0_179 = arith.constant 0 : index
    %205 = vector.load %arg10[%c2_177, %c1_178, %c0_179] : memref<5x9x128xf32, #tpu.memory_space<vmem>>, vector<1x8x128xf32>
    %206 = vector.shape_cast %205 : vector<1x8x128xf32> to vector<8x128xf32>
    %207 = vector.shape_cast %204 : vector<8x128xf32> to vector<1x8x128xf32>
    tpu.vector_store %arg10[%c2_177, %c1_178, %c0_179], %207 {strides = array<i32>} : memref<5x9x128xf32, #tpu.memory_space<vmem>>, vector<1x8x128xf32>,
    %208 = vector.extract_strided_slice %165 {offsets = [3, 0, 0], sizes = [1, 8, 147], strides = [1, 1, 1]} : vector<5x8x147xbf16> to vector<1x8x147xbf16>
    %209 = vector.shape_cast %208 : vector<1x8x147xbf16> to vector<8x147xbf16>
    %cst_180 = arith.constant dense<0.000000e+00> : vector<8x128xf32>
    %210 = tpu.matmul %209, %166, %cst_180 {dimension_numbers = #tpu.dot_dimension_numbers<[1], [0], [0], [1], [0, 0, 1, 1], [], []>} : vector<8x147xbf16>, vector<147x128xbf16>, vector<8x128xf32> -> vector<8x128xf32>
    %211 = arith.mulf %210, %169 : vector<8x128xf32>
    %212 = arith.addf %211, %172 : vector<8x128xf32>
    %cst_181 = arith.constant 0.000000e+00 : f32
    %213 = vector.broadcast %cst_181 : f32 to vector<8x128xf32>
    %214 = arith.maximumf %212, %213 : vector<8x128xf32>
    %c3_182 = arith.constant 3 : index
    %c1_183 = arith.constant 1 : index
    %c0_184 = arith.constant 0 : index
    %215 = vector.load %arg10[%c3_182, %c1_183, %c0_184] : memref<5x9x128xf32, #tpu.memory_space<vmem>>, vector<1x8x128xf32>
    %216 = vector.shape_cast %215 : vector<1x8x128xf32> to vector<8x128xf32>
    %217 = vector.shape_cast %214 : vector<8x128xf32> to vector<1x8x128xf32>
    tpu.vector_store %arg10[%c3_182, %c1_183, %c0_184], %217 {strides = array<i32>} : memref<5x9x128xf32, #tpu.memory_space<vmem>>, vector<1x8x128xf32>,
    %218 = vector.extract_strided_slice %165 {offsets = [4, 0, 0], sizes = [1, 8, 147], strides = [1, 1, 1]} : vector<5x8x147xbf16> to vector<1x8x147xbf16>
    %219 = vector.shape_cast %218 : vector<1x8x147xbf16> to vector<8x147xbf16>
    %cst_185 = arith.constant dense<0.000000e+00> : vector<8x128xf32>
    %220 = tpu.matmul %219, %166, %cst_185 {dimension_numbers = #tpu.dot_dimension_numbers<[1], [0], [0], [1], [0, 0, 1, 1], [], []>} : vector<8x147xbf16>, vector<147x128xbf16>, vector<8x128xf32> -> vector<8x128xf32>
    %221 = arith.mulf %220, %169 : vector<8x128xf32>
    %222 = arith.addf %221, %172 : vector<8x128xf32>
    %cst_186 = arith.constant 0.000000e+00 : f32
    %223 = vector.broadcast %cst_186 : f32 to vector<8x128xf32>
    %224 = arith.maximumf %222, %223 : vector<8x128xf32>
    %c4 = arith.constant 4 : index
    %c1_187 = arith.constant 1 : index
    %c0_188 = arith.constant 0 : index
    %225 = vector.load %arg10[%c4, %c1_187, %c0_188] : memref<5x9x128xf32, #tpu.memory_space<vmem>>, vector<1x8x128xf32>
    %226 = vector.shape_cast %225 : vector<1x8x128xf32> to vector<8x128xf32>
    %227 = vector.shape_cast %224 : vector<8x128xf32> to vector<1x8x128xf32>
    tpu.vector_store %arg10[%c4, %c1_187, %c0_188], %227 {strides = array<i32>} : memref<5x9x128xf32, #tpu.memory_space<vmem>>, vector<1x8x128xf32>,
    %c0_189 = arith.constant 0 : index
    %c0_190 = arith.constant 0 : index
    %c0_191 = arith.constant 0 : index
    %228 = tpu.strided_load %arg10[%c0_189, %c0_190, %c0_191] {strides = array<i32: 1, 2, 1>} : memref<5x9x128xf32, #tpu.memory_space<vmem>>, vector<5x4x128xf32>
    %c0_192 = arith.constant 0 : index
    %c1_193 = arith.constant 1 : index
    %c0_194 = arith.constant 0 : index
    %229 = tpu.strided_load %arg10[%c0_192, %c1_193, %c0_194] {strides = array<i32: 1, 2, 1>} : memref<5x9x128xf32, #tpu.memory_space<vmem>>, vector<5x4x128xf32>
    %c0_195 = arith.constant 0 : index
    %c2_196 = arith.constant 2 : index
    %c0_197 = arith.constant 0 : index
    %230 = tpu.strided_load %arg10[%c0_195, %c2_196, %c0_197] {strides = array<i32: 1, 2, 1>} : memref<5x9x128xf32, #tpu.memory_space<vmem>>, vector<5x4x128xf32>
    %231 = arith.maximumf %228, %229 : vector<5x4x128xf32>
    %232 = arith.maximumf %231, %230 : vector<5x4x128xf32>
    %233 = vector.extract_strided_slice %232 {offsets = [0, 0, 0], sizes = [1, 4, 128], strides = [1, 1, 1]} : vector<5x4x128xf32> to vector<1x4x128xf32>
    %234 = vector.shape_cast %233 : vector<1x4x128xf32> to vector<4x128xf32>
    %235 = vector.extract_strided_slice %232 {offsets = [1, 0, 0], sizes = [1, 4, 128], strides = [1, 1, 1]} : vector<5x4x128xf32> to vector<1x4x128xf32>
    %236 = vector.shape_cast %235 : vector<1x4x128xf32> to vector<4x128xf32>
    %237 = arith.maximumf %234, %236 : vector<4x128xf32>
    %238 = vector.extract_strided_slice %232 {offsets = [2, 0, 0], sizes = [1, 4, 128], strides = [1, 1, 1]} : vector<5x4x128xf32> to vector<1x4x128xf32>
    %239 = vector.shape_cast %238 : vector<1x4x128xf32> to vector<4x128xf32>
    %240 = arith.maximumf %237, %239 : vector<4x128xf32>
    %241 = vector.extract_strided_slice %232 {offsets = [2, 0, 0], sizes = [1, 4, 128], strides = [1, 1, 1]} : vector<5x4x128xf32> to vector<1x4x128xf32>
    %242 = vector.shape_cast %241 : vector<1x4x128xf32> to vector<4x128xf32>
    %243 = vector.extract_strided_slice %232 {offsets = [3, 0, 0], sizes = [1, 4, 128], strides = [1, 1, 1]} : vector<5x4x128xf32> to vector<1x4x128xf32>
    %244 = vector.shape_cast %243 : vector<1x4x128xf32> to vector<4x128xf32>
    %245 = arith.maximumf %242, %244 : vector<4x128xf32>
    %246 = vector.extract_strided_slice %232 {offsets = [4, 0, 0], sizes = [1, 4, 128], strides = [1, 1, 1]} : vector<5x4x128xf32> to vector<1x4x128xf32>
    %247 = vector.shape_cast %246 : vector<1x4x128xf32> to vector<4x128xf32>
    %248 = arith.maximumf %245, %247 : vector<4x128xf32>
    %249 = vector.shape_cast %240 : vector<4x128xf32> to vector<1x4x128xf32>
    %250 = vector.shape_cast %248 : vector<4x128xf32> to vector<1x4x128xf32>
    %251 = tpu.concatenate %249, %250 in 0 : vector<1x4x128xf32>, vector<1x4x128xf32> -> vector<2x4x128xf32>
    %c0_198 = arith.constant 0 : index
    %c0_199 = arith.constant 0 : index
    %c0_200 = arith.constant 0 : index
    %c0_201 = arith.constant 0 : index
    %252 = vector.load %arg9[%c0_198, %c0_199, %c0_200, %c0_201] : memref<1x2x4x128xf32, #tpu.memory_space<vmem>>, vector<1x2x4x128xf32>
    %253 = vector.shape_cast %252 : vector<1x2x4x128xf32> to vector<2x4x128xf32>
    %254 = vector.shape_cast %251 : vector<2x4x128xf32> to vector<1x2x4x128xf32>
    tpu.vector_store %arg9[%c0_198, %c0_199, %c0_200, %c0_201], %254 {strides = array<i32>} : memref<1x2x4x128xf32, #tpu.memory_space<vmem>>, vector<1x2x4x128xf32>,
    return
  }
  func.func @transform_0(%arg0: i32, %arg1: i32) -> (i32, i32, i32, i32) {
    %c0_i32 = arith.constant 0 : i32
    %c0_i32_0 = arith.constant 0 : i32
    %c0_i32_1 = arith.constant 0 : i32
    %c0_i32_2 = arith.constant 0 : i32
    return %arg0, %c0_i32, %c0_i32_0, %c0_i32_1 : i32, i32, i32, i32
  }
  func.func @transform_1(%arg0: i32, %arg1: i32) -> (i32, i32, i32, i32) {
    %c0_i32 = arith.constant 0 : i32
    %c0_i32_0 = arith.constant 0 : i32
    %c0_i32_1 = arith.constant 0 : i32
    %c0_i32_2 = arith.constant 0 : i32
    return %arg0, %c0_i32, %c0_i32_0, %c0_i32_1 : i32, i32, i32, i32
  }
  func.func @transform_2(%arg0: i32, %arg1: i32) -> (i32, i32, i32, i32) {
    %c0_i32 = arith.constant 0 : i32
    %c0_i32_0 = arith.constant 0 : i32
    %c0_i32_1 = arith.constant 0 : i32
    %c0_i32_2 = arith.constant 0 : i32
    return %arg0, %c0_i32, %c0_i32_0, %c0_i32_1 : i32, i32, i32, i32
  }
  func.func @transform_3(%arg0: i32, %arg1: i32) -> (i32, i32, i32, i32) {
    %c0_i32 = arith.constant 0 : i32
    %c0_i32_0 = arith.constant 0 : i32
    %c0_i32_1 = arith.constant 0 : i32
    %c0_i32_2 = arith.constant 0 : i32
    return %arg0, %c0_i32, %c0_i32_0, %c0_i32_1 : i32, i32, i32, i32
  }
  func.func @transform_4(%arg0: i32, %arg1: i32) -> (i32, i32) {
    %c0_i32 = arith.constant 0 : i32
    %c0_i32_0 = arith.constant 0 : i32
    %c0_i32_1 = arith.constant 0 : i32
    return %c0_i32, %c0_i32_0 : i32, i32
  }
  func.func @transform_5(%arg0: i32, %arg1: i32) -> (i32, i32) {
    %c0_i32 = arith.constant 0 : i32
    %c0_i32_0 = arith.constant 0 : i32
    %c0_i32_1 = arith.constant 0 : i32
    return %c0_i32, %c0_i32_0 : i32, i32
  }
  func.func @transform_6(%arg0: i32, %arg1: i32) -> (i32, i32) {
    %c0_i32 = arith.constant 0 : i32
    %c0_i32_0 = arith.constant 0 : i32
    %c0_i32_1 = arith.constant 0 : i32
    return %c0_i32, %c0_i32_0 : i32, i32
  }
  func.func @transform_7(%arg0: i32, %arg1: i32) -> (i32, i32, i32, i32) {
    %c0_i32 = arith.constant 0 : i32
    %c0_i32_0 = arith.constant 0 : i32
    %c0_i32_1 = arith.constant 0 : i32
    return %arg0, %arg1, %c0_i32, %c0_i32_0 : i32, i32, i32, i32
  }
}

</mosaic_0001>

<bundles_post_ra>
// kernel: tpu_custom_call.1
= control target key start
LH: loop header
LB: loop body
LE: loop exit
PB: predicated region body
PF: predicated region fallthrough
CT: control target
= control target key end

     0   :  { %s6826_s0 = inlined_call_operand.vmem [shape: bf16[2,11,10,3], index: 0, kind: input, shape index: {}]   ;;  %s6827_s1 = inlined_call_operand.vmem [shape: bf16[2,11,11,3], index: 1, kind: input, shape index: {}]   ;;  %s6828_s2 = inlined_call_operand.vmem [shape: bf16[2,12,10,3], index: 2, kind: input, shape index: {}]   ;;  %s6829_s3 = inlined_call_operand.vmem [shape: bf16[2,12,11,3], index: 3, kind: input, shape index: {}]   ;;  %s6830_s4 = inlined_call_operand.vmem [shape: bf16[147,128], index: 4, kind: input, shape index: {}]   ;;  %s6831_s5 = inlined_call_operand.vmem [shape: f32[1,128], index: 5, kind: input, shape index: {}]   ;;  %s6832_s6 = inlined_call_operand.vmem [shape: f32[1,128], index: 6, kind: input, shape index: {}]   ;;  %s6833_s7 = inlined_call_operand.hbm [shape: f32[2,4,4,128], index: 7, kind: output, shape index: {}]  }
   0x1   :  { %6891 = sst [smem:[#allocation78_spill]] %s6826_s0 }
   0x2   :  { %6892 = sst [smem:[#allocation79_spill]] %s6827_s1 }
   0x3   :  { %6893 = sst [smem:[#allocation80_spill]] %s6828_s2 }
   0x4   :  { %6894 = sst [smem:[#allocation81_spill]] %s6829_s3 }
   0x5   :  { %12 = vsyncpa [#allocation4], 0 }
   0x6   :  { %14 = vsyncpa [#allocation4 + $0x1], 0  ;;  %s4796_s24 = smov 0   ;;  %s4798_s25 = smov 0  }
   0x7   :  { %s4800_s26 = smov 0   ;;  %s4802_s27 = smov 0  }
   0x8   :  { %s4804_s28 = smov 0   ;;  %s4806_s29 = smov 0  }
   0x9   :  { %s4808_s30 = smov 0   ;;  %s4810_s8 = smov 0  }
   0xa LB: > { %6895 = sst [smem:[#allocation6_spill]] %s4710_s26  ;;  %s3770_s9 = sadd.s32 4294967295, %s4730_s8   ;;  %s4730_s8 = sphi %s4810_s8, %s20_s8   ;;  %s4726_s30 = sphi %s4808_s30, %s7110_s30   ;;  %s4722_s29 = sphi %s4806_s29, %s7109_s29   ;;  %s4718_s28 = sphi %s4804_s28, %s7108_s28   ;;  %s4714_s27 = sphi %s4802_s27, %s7107_s27   ;;  %s4710_s26 = sphi %s4800_s26, %s7106_s26   ;;  %s4706_s25 = sphi %s4798_s25, %s7112_s25   ;;  %s4702_s24 = sphi %s4796_s24, %s7111_s24  }
   0xb   : > { %6896 = sst [smem:[#allocation7_spill]] %s4722_s29  ;;  %s3771_s10 = sadd.s32 4294967294, %s4730_s8  }
   0xc   : > { %6897 = sst [smem:[#allocation8_spill]] %s4726_s30  ;;  %s29_s11 = sadd.s32 1, %s4722_s29 }
   0xd   : > { %p30_p0 = scmp.ge.s32.totalorder %s29_s11, 2  ;;  %s32_s12 = sadd.s32 1, %s4726_s30 }
   0xe   : > { %p218_p1 = scmp.ne.s32.totalorder %s4710_s26, %s4706_s25  ;;  %p219_p2 = scmp.eq.s32.totalorder %s3770_s9, 3 }
   0xf   : > { %s7114_s11 = smov (%p30_p0, %s29_s11), 0  ;;  %s7116_s12 = smov (!%p30_p0, %s32_s12), %s4726_s30 }
  0x10   : > { %6898 = sst [smem:[#allocation9_spill]] %s7114_s11  ;;  %s204_s13 = ssub.s32 %s4722_s29, %s7114_s11 }
  0x11   : > { %p4847_p3 = por %p219_p2, %p218_p1  ;;  %p34_p4 = scmp.ge.s32.totalorder %s7116_s12, 2 }
  0x12   : > { %p224_p5 = scmp.ne.s32.totalorder %s4706_s25, %s4702_s24  ;;  %p225_p6 = scmp.eq.s32.totalorder %s3771_s10, 3 }
  0x13   : > { %p3774_p7 = scmp.ge.s32.totalorder %s4730_s8, 1  ;;  %s7118_s12 = smov (%p34_p4, %s7116_s12), 0 }
  0x14   : > { %6900 = sst [smem:[#allocation10_spill]] %s7118_s12  ;;  %p4856_p8 = por %p225_p6, %p224_p5 }
  0x15   : > { %p284_p9 = scmp.lt.s32.totalorder %s4730_s8, 5  ;;  %s203_s16 = ssub.s32 %s4726_s30, %s7118_s12 }
  0x16   : > { %s6901_s15 = scalar_select %p4856_p8, 1, 0 }
  0x17   : > { %s208_s17 = sadd.s32 1, %s4710_s26  ;;  %s205_s18 = sor.u32 %s204_s13, %s203_s16 }
  0x18   : > { %6902 = sst [smem:[#allocation11_spill]] %s6901_s15  ;;  %p285_p10 = pnand %p3774_p7, %p284_p9 }
  0x19   : > { %p206_p11 = scmp.eq.s32.totalorder %s205_s18, 0 }
  0x1a   : > { %288 = sbr.rel (%p285_p10) target bundleno = 881 (0x371), region = 48 }
  0x1b   : > { %s4865_s19 = scalar_select %p206_p11, %s4710_s26, %s208_s17  }
  0x1d   : > { %6903 = sst [smem:[#allocation12_spill]] %s4865_s19 }
  0x1f   : > { %p331_p12 = scmp.lt.s32.totalorder %s4718_s28, 1  ;;  %s4873_s22 = sshll.u32 %s4714_s27, 5  ;;  %vm1259_vm0 = vcmask 23552   ;;  %vm1275_vm1 = vcmask 48128   ;;  %vm1286_vm2 = vcmask 72704   ;;  %vm1297_vm3 = vcmask 97280  }
  0x20   : > { %s6904_s2 = sld [smem:[#allocation80_spill]]  ;;  %s6837_s23 = smov 6   ;;  %vm6874_vm4 = vcmask 121856   ;;  %vm1319_vm5 = vcmask 146432   ;;  %vm6889_vm6 = vcmask 171008   ;;  %vm1341_vm7 = vcmask 195584  }
  0x21   : > { %s4869_s20 = scalar_select %p331_p12, %s4718_s28, 1  ;;  %vm6890_vm8 = vcmask 220160   ;;  %vm1363_vm9 = vcmask 244736   ;;  %vm1374_vm10 = vcmask 269312   ;;  %vm6880_vm11 = vcmask 293888  }
  0x22   : > { %s6905_s3 = sld [smem:[#allocation81_spill]]  ;;  %s6835_s9 = smov 9   ;;  %vm1396_vm12 = vcmask 318464   ;;  %vm6881_vm13 = vcmask 343040   ;;  %vm1418_vm14 = vcmask 367616   ;;  %vm3305_vm15 = vcmask 1040384  }
  0x23   : > { %s4260_s21 = smul.u32 96, %s4869_s20  ;;  %s6843_s13 = smov 12  }
  0x24   : > { %s6906_s1 = sld [smem:[#allocation79_spill]]  ;;  %s6841_s16 = smov 21  }
  0x25   : > { %s6907_s0 = sld [smem:[#allocation78_spill]]  ;;  %s6927_s11 = smov 18  }
  0x26   : > { %s345_s10 = scalar_lea.vmem %s6904_s2, %s4260_s21  ;;  %s6918_s2 = smov 12  }
  0x27   : > { %s4885_s12 = scalar_lea.vmem %s345_s10, %s4873_s22  ;;  %s4259_s10 = smul.u32 88, %s4869_s20 }
  0x28   : > { %s350_s17 = scalar_lea.vmem %s6905_s3, %s4260_s21  ;;  %v366_v0 = vld [vmem:[%s4885_s12 + $0x10] sm:$0xf]  ;;  %v364_v1 = vld [vmem:[%s4885_s12] sm:$0xf]  ;;  %v367_v4 = vld [vmem:[%s4885_s12 + $0x18] sm:$0xf] }
  0x29   : > { %s4882_s18 = scalar_lea.vmem %s350_s17, %s4873_s22  ;;  %v3983_v2 = vcombine.low %v366_v0, %v366_v0  ;;  %v3981_v3 = vcombine.low %v364_v1, %v364_v1  ;;  %v365_v5 = vld [vmem:[%s4885_s12 + $0x8] sm:$0xf]  ;;  %s6839_s21 = smov 3   ;;  %v4894_v7 = vld [vmem:[%s4885_s12 + $0x4] sm:$0x1]  ;;  %v3984_v8 = vcombine.low %v367_v4, %v367_v4 }
  0x2a   : > { %v357_v6 = vld [vmem:[%s4882_s18] sm:$0xf]  ;;  %v3982_v9 = vcombine.low %v365_v5, %v365_v5  ;;  %v4898_v10 = vld [vmem:[%s4882_s18 + $0x4] sm:$0x1]  ;;  %v4901_v11 = vld [vmem:[%s4885_s12 + $0xc] sm:$0x1]  ;;  %v3991_v26 = vcombine.low %v364_v1, %v4894_v7  ;;  %s340_s17 = scalar_lea.vmem %s6906_s1, %s4259_s10 }
  0x2b   : > { %653 = vrot.lane.b32.xlu1 %v3983_v2, %s6839_s21  ;;  %649 = vrot.lane.b32.xlu0 %v3981_v3, %s6839_s21  ;;  %v3986_v12 = vcombine.low %v357_v6, %v4898_v10  ;;  %v368_v13 = vld [vmem:[%s4885_s12 + $0x20] sm:$0xf]  ;;  %v359_v14 = vld [vmem:[%s4882_s18 + $0x10] sm:$0xf]  ;;  %v3992_v31 = vcombine.low %v365_v5, %v4901_v11  ;;  %s6849_s20 = smov 18   ;;  %s6916_s1 = smov 3  }
  0x2c   : > { %v4907_v15 = vld [vmem:[%s4885_s12 + $0x14] sm:$0x1]  ;;  %v4910_v16 = vld [vmem:[%s4885_s12 + $0x1c] sm:$0x1]  ;;  %v358_v18 = vld [vmem:[%s4882_s18 + $0x8] sm:$0xf]  ;;  %v3985_v27 = vcombine.low %v368_v13, %v368_v13 }
  0x2d   : > { %v4913_v17 = vld [vmem:[%s4882_s18 + $0x14] sm:$0x1]  ;;  %v4917_v19 = vld [vmem:[%s4882_s18 + $0xc] sm:$0x1]  ;;  %v685_v20 = vshrl.u32 %v3986_v12, 16  ;;  %v687_v21 = vshll.u32 %v3986_v12, 16  ;;  %v3993_v39 = vcombine.low %v366_v0, %v4907_v15  ;;  %v3994_v40 = vcombine.low %v367_v4, %v4910_v16 }
  0x2e   : > { %v3988_v22 = vcombine.low %v359_v14, %v4913_v17  ;;  %v3987_v23 = vcombine.low %v358_v18, %v4917_v19  ;;  %v361_v24 = vld [vmem:[%s4882_s18 + $0x20] sm:$0xf]  ;;  %v4923_v25 = vld [vmem:[%s4882_s18 + $0x24] sm:$0x1]  ;;  %v360_v29 = vld [vmem:[%s4882_s18 + $0x18] sm:$0xf] }
  0x2f   : > { %655 = vrot.lane.b32.xlu1 %v3984_v8, %s6839_s21  ;;  %651 = vrot.lane.b32.xlu0 %v3982_v9, %s6839_s21  ;;  %v3990_v28 = vcombine.low %v361_v24, %v4923_v25  ;;  %v4931_v30 = vld [vmem:[%s4882_s18 + $0x1c] sm:$0x1]  ;;  %v689_v32 = vrot.slane %v687_v21, 1  ;;  %v747_v43 = vshll.u32 %v3991_v26, 16  ;;  %v378_v47 = vld [vmem:[%s4885_s12 + $0x24] sm:$0x1] }
  0x30   : > { %v699_v33 = vshrl.u32 %v3988_v22, 16  ;;  %v701_v34 = vshll.u32 %v3988_v22, 16  ;;  %v692_v35 = vshrl.u32 %v3987_v23, 16  ;;  %v694_v36 = vshll.u32 %v3987_v23, 16  ;;  %v379_v6 = vld [vmem:[%s4882_s18] sm:$0xe] }
  0x31   : > { %v715_v37 = vshll.u32 %v3990_v28, 16  ;;  %v3989_v38 = vcombine.low %v360_v29, %v4931_v30  ;;  %v690_v41 = vor.u32 %v689_v32, %v685_v20  ;;  %v713_v49 = vshrl.u32 %v3990_v28, 16  ;;  %v380_v18 = vld [vmem:[%s4882_s18 + $0x8] sm:$0xe]  ;;  %v381_v20 = vld [vmem:[%s4882_s18 + $0x10] sm:$0xe] }
  0x32   : > { %v703_v42 = vrot.slane %v701_v34, 1  ;;  %v696_v44 = vrot.slane %v694_v36, 1  ;;  %v754_v51 = vshll.u32 %v3992_v31, 16  ;;  %v761_v54 = vshll.u32 %v3993_v39, 16  ;;  %v3800_v32 = vld [vmem:[%s4882_s18 + $0xc] sm:$0x1] }
  0x33   : > { %657 = vrot.lane.b32.xlu0 %v3985_v27, %s6839_s21  ;;  %v706_v45 = vshrl.u32 %v3989_v38, 16  ;;  %v708_v46 = vshll.u32 %v3989_v38, 16  ;;  %719 = vrot.lane.b32.xlu1 %v690_v41, %s6837_s23  ;;  %v717_v50 = vrot.slane %v715_v37, 1  ;;  %v745_v55 = vshrl.u32 %v3991_v26, 16  ;;  %v382_v26 = vld [vmem:[%s4882_s18 + $0x18] sm:$0xe] }
  0x34   : > { %v704_v48 = vor.u32 %v703_v42, %v699_v33  ;;  %v697_v52 = vor.u32 %v696_v44, %v692_v35  ;;  %v3995_v56 = vcombine.low %v368_v13, %v378_v47  ;;  %v749_v58 = vrot.slane %v747_v43, 1  ;;  %v383_v27 = vld [vmem:[%s4882_s18 + $0x20] sm:$0xe]  ;;  %v3810_v33 = vld [vmem:[%s4882_s18 + $0x8] sm:$0xe]  ;;  %s6922_s3 = smov 15  }
  0x35   : > { %v710_v53 = vrot.slane %v708_v46, 1  ;;  %v718_v59 = vor.u32 %v717_v50, %v713_v49  ;;  %v752_v60 = vshrl.u32 %v3992_v31, 16  ;;  %v756_v61 = vrot.slane %v754_v51, 1  ;;  %v384_v31 = vld [vmem:[%s4885_s12] sm:$0xe]  ;;  %s6933_s30 = smov 24  }
  0x36   : > { %v768_v62 = vshll.u32 %v3994_v40, 16  ;;  %v759_v63 = vshrl.u32 %v3993_v39, 16  ;;  %v750_v0 = vor.u32 %v749_v58, %v745_v55  ;;  %v763_v1 = vrot.slane %v761_v54, 1  ;;  %v386_v35 = vld [vmem:[%s4885_s12 + $0x10] sm:$0xe]  ;;  %s6937_s29 = smov 27  }
  0x37   : > { %721 = vrot.lane.b32.xlu0 %v697_v52, %s6837_s23  ;;  %v711_v57 = vor.u32 %v710_v53, %v706_v45  ;;  %723 = vrot.lane.b32.xlu1 %v704_v48, %s6837_s23  ;;  %v775_v2 = vshll.u32 %v3995_v56, 16  ;;  %v757_v3 = vor.u32 %v756_v61, %v752_v60  ;;  %v766_v4 = vshrl.u32 %v3994_v40, 16  ;;  %v3805_v38 = vld [vmem:[%s4885_s12 + $0xc] sm:$0x1]  ;;  %v3815_v39 = vld [vmem:[%s4885_s12 + $0x8] sm:$0xe] }
  0x38   : > { %v770_v5 = vrot.slane %v768_v62, 1  ;;  %v764_v8 = vor.u32 %v763_v1, %v759_v63  ;;  %v773_v9 = vshrl.u32 %v3995_v56, 16  ;;  %v3996_v14 = vcombine.low %v379_v6, %v4898_v10  ;;  %v387_v40 = vld [vmem:[%s4885_s12 + $0x18] sm:$0xe]  ;;  %v3795_v46 = vld [vmem:[%s4885_s12 + $0x8] sm:$0xf] }
  0x39   : > { %v777_v12 = vrot.slane %v775_v2, 1  ;;  %v3997_v22 = vcombine.low %v380_v18, %v4917_v19  ;;  %v3998_v24 = vcombine.low %v381_v20, %v4913_v17  ;;  %v3999_v28 = vcombine.low %v382_v26, %v4931_v30  ;;  %v385_v17 = vld [vmem:[%s4885_s12 + $0x8] sm:$0xe]  ;;  %v4997_v49 = vld [vmem:[%s4882_s18 + $0x10] sm:$0xe]  ;;  %s6943_s19 = smov 36  }
  0x3a   : > { %v771_v13 = vor.u32 %v770_v5, %v766_v4  ;;  %v804_v23 = vrot.slane %v3996_v14, 1  ;;  %v4000_v29 = vcombine.low %v383_v27, %v4923_v25  ;;  %v4001_v34 = vcombine.low %v384_v31, %v4894_v7  ;;  %v5004_v53 = vld [vmem:[%s4882_s18 + $0x14] sm:$0x1]  ;;  %v3820_v54 = vld [vmem:[%s4882_s18 + $0xc] sm:$0x3]  ;;  %s6875_s26 = smov 48  }
  0x3b   : > { %725 = vrot.lane.b32.xlu0 %v711_v57, %s6837_s23  ;;  %727 = vrot.lane.b32.xlu1 %v718_v59, %s6837_s23  ;;  %v778_v21 = vor.u32 %v777_v12, %v773_v9  ;;  %v805_v10 = vrot.slane %v3997_v22, 1  ;;  %v806_v19 = vrot.slane %v3998_v24, 1  ;;  %v807_v30 = vrot.slane %v3999_v28, 1  ;;  %s335_s23 = scalar_lea.vmem %s6907_s0, %s4259_s10  ;;  %s6845_s10 = smov 15   ;;  %v3898_v55 = vld [vmem:[%s4882_s18 + $0x14] sm:$0x3] }
  0x3c   : > { %v808_v36 = vrot.slane %v4000_v29, 1  ;;  %v4002_v25 = vcombine.low %v385_v17, %v4901_v11  ;;  %v4066_v37 = vcombine.low %v3810_v33, %v3800_v32  ;;  %v834_v7 = vrot.slane %v4001_v34, 1  ;;  %v3893_v9 = vld [vmem:[%s4885_s12 + $0x10] sm:$0xe]  ;;  %s6914_s0 = smov 42   ;;  %s4750_s15 = smov 96  }
  0x3d   : > { %v4003_v41 = vcombine.low %v386_v35, %v4907_v15  ;;  %v4071_v11 = vcombine.low %v3815_v39, %v3805_v38  ;;  %v4004_v43 = vcombine.low %v387_v40, %v4910_v16  ;;  %v4061_v57 = vcombine.low %v3795_v46, %v3805_v38  ;;  %p3355_p13 = scmp.gt.s32.totalorder %s4714_s27, 0 }
  0x3e   : > { %v835_v42 = vrot.slane %v4002_v25, 1  ;;  %v1487_v44 = vshll.u32 %v4066_v37, 16  ;;  %v1485_v51 = vshrl.u32 %v4066_v37, 16  ;;  %v4076_v63 = vcombine.low %v3810_v33, %v3820_v54 }
  0x3f   : > { %779 = vrot.lane.b32.xlu0 %v750_v0, %s6835_s9  ;;  %781 = vrot.lane.b32.xlu1 %v757_v3, %s6835_s9  ;;  %v836_v15 = vrot.slane %v4003_v41, 1  ;;  %v1547_v47 = vshll.u32 %v4071_v11, 16  ;;  %v837_v50 = vrot.slane %v4004_v43, 1  ;;  %v1545_v58 = vshrl.u32 %v4071_v11, 16 }
  0x40   : > { %v1489_v52 = vrot.slane %v1487_v44, 1  ;;  %v4146_v0 = vcombine.low %v4997_v49, %v3898_v55  ;;  %v1604_v5 = vrot.slane %v4076_v63, 1 }
  0x41   : > { %v1549_v59 = vrot.slane %v1547_v47, 1 }
  0x42   : > { %v1490_v62 = vor.u32 %v1489_v52, %v1485_v51  ;;  %v2322_v6 = vshll.u32 %v4146_v0, 16  ;;  %v2320_v20 = vshrl.u32 %v4146_v0, 16 }
  0x43   : > { %783 = vrot.lane.b32.xlu0 %v764_v8, %s6835_s9  ;;  %785 = vrot.lane.b32.xlu1 %v771_v13, %s6835_s9  ;;  %v1550_v1 = vor.u32 %v1549_v59, %v1545_v58  ;;  %v5018_v8 = vld [vmem:[%s4885_s12 + $0x14] sm:$0x1] }
  0x44   : > { %v4141_v18 = vcombine.low %v3893_v9, %v5018_v8 }
  0x47   : > { %787 = vrot.lane.b32.xlu0 %v778_v21, %s6835_s9  ;;  %809 = vrot.lane.b32.xlu1 %v804_v23, %s6843_s13  ;;  %s4977_s9 = scalar_lea.vmem %s340_s17, %s4873_s22  ;;  %s4990_s17 = scalar_lea.vmem %s335_s23, %s4873_s22  ;;  %v2324_v21 = vrot.slane %v2322_v6, 1 }
  0x48   : > { %v4987_v45 = vld [vmem:[%s4977_s9 + $0x8] sm:$0xf]  ;;  %s6908_s22 = smov 6   ;;  %s6909_s23 = smov 9   ;;  %v3905_v23 = vld [vmem:[%s4977_s9 + $0x10] sm:$0xf] }
  0x49   : > { %v4081_v48 = vcombine.low %v4987_v45, %v4987_v45  ;;  %v5000_v16 = vld [vmem:[%s4990_s17 + $0x8] sm:$0xf]  ;;  %v5027_v24 = vld [vmem:[%s4977_s9 + $0x14] sm:$0x1]  ;;  %v3839_v26 = vld [vmem:[%s4977_s9 + $0xc] sm:$0x1]  ;;  %v2325_v28 = vor.u32 %v2324_v21, %v2320_v20 }
  0x4a   : > { %v4086_v61 = vcombine.low %v5000_v16, %v5000_v16  ;;  %v3849_v22 = vld [vmem:[%s4977_s9 + $0x8] sm:$0xe]  ;;  %v4161_v29 = vcombine.low %v3905_v23, %v5027_v24  ;;  %v3912_v17 = vld [vmem:[%s4990_s17 + $0x10] sm:$0xf]  ;;  %v5036_v32 = vld [vmem:[%s4990_s17 + $0x14] sm:$0x1] }
  0x4b   : > { %811 = vrot.lane.b32.xlu0 %v805_v10, %s6843_s13  ;;  %813 = vrot.lane.b32.xlu1 %v806_v19, %s6843_s13  ;;  %v1635_v60 = vshrl.u32 %v4081_v48, 16  ;;  %v1638_v3 = vshll.u32 %v4081_v48, 16  ;;  %v4101_v10 = vcombine.low %v3849_v22, %v3839_v26  ;;  %v4151_v19 = vcombine.low %v3905_v23, %v3905_v23  ;;  %v3854_v31 = vld [vmem:[%s4990_s17 + $0x8] sm:$0xe]  ;;  %v3844_v33 = vld [vmem:[%s4990_s17 + $0xc] sm:$0x1] }
  0x4c   : > { %v1695_v4 = vshrl.u32 %v4086_v61, 16  ;;  %v1698_v14 = vshll.u32 %v4086_v61, 16  ;;  %v4106_v34 = vcombine.low %v3854_v31, %v3844_v33  ;;  %v4156_v25 = vcombine.low %v3912_v17, %v3912_v17  ;;  %v3859_v48 = vld [vmem:[%s4977_s9 + $0xc] sm:$0x3]  ;;  %v3937_v55 = vld [vmem:[%s4977_s9 + $0x14] sm:$0x3] }
  0x4d   : > { %v1637_v2 = vrot.slane %v1635_v60, 7  ;;  %v1807_v35 = vshll.u32 %v4101_v10, 16  ;;  %v4166_v37 = vcombine.low %v3912_v17, %v5036_v32  ;;  %v2440_v38 = vshrl.u32 %v4161_v29, 16  ;;  %v3927_v58 = vld [vmem:[%s4977_s9 + $0x10] sm:$0xe] }
  0x4e   : > { %v1697_v13 = vrot.slane %v1695_v4, 7  ;;  %v4096_v39 = vcombine.low %v5000_v16, %v3844_v33  ;;  %v1805_v40 = vshrl.u32 %v4101_v10, 16  ;;  %v1867_v41 = vshll.u32 %v4106_v34, 16  ;;  %v3932_v6 = vld [vmem:[%s4990_s17 + $0x10] sm:$0xe] }
  0x4f   : > { %815 = vrot.lane.b32.xlu0 %v807_v30, %s6843_s13  ;;  %817 = vrot.lane.b32.xlu1 %v808_v36, %s6843_s13  ;;  %v1640_v12 = vor.u32 %v1638_v3, %v1637_v2  ;;  %v4091_v30 = vcombine.low %v4987_v45, %v3839_v26  ;;  %v2379_v36 = vrot.slane %v4151_v19, 7  ;;  %v2409_v11 = vrot.slane %v4156_v25, 7  ;;  %v5047_v45 = vld [vmem:[%s4882_s18 + $0x10] sm:$0xf]  ;;  %v3956_v21 = vld [vmem:[%s4882_s18 + $0x1c] sm:$0x1] }
  0x50   : > { %v1700_v27 = vor.u32 %v1698_v14, %v1697_v13  ;;  %v2443_v43 = vshll.u32 %v4161_v29, 16  ;;  %v2500_v44 = vshrl.u32 %v4166_v37, 16  ;;  %v1869_v47 = vrot.slane %v1867_v41, 1  ;;  %v3951_v23 = vld [vmem:[%s4885_s12 + $0x18] sm:$0xf] }
  0x51   : > { %v4116_v16 = vcombine.low %v5047_v45, %v5047_v45  ;;  %v2503_v54 = vshll.u32 %v4166_v37, 16  ;;  %v4111_v59 = vcombine.low %v3849_v22, %v3859_v48  ;;  %v4181_v63 = vcombine.low %v3927_v58, %v3937_v55  ;;  %v3944_v22 = vld [vmem:[%s4882_s18 + $0x18] sm:$0xf]  ;;  %v5090_v25 = vld [vmem:[%s4882_s18 + $0x10] sm:$0xe] }
  0x52   : > { %v2502_v52 = vrot.slane %v2500_v44, 7  ;;  %v4171_v4 = vcombine.low %v3927_v58, %v5027_v24  ;;  %v4176_v14 = vcombine.low %v3932_v6, %v5036_v32  ;;  %v3961_v24 = vld [vmem:[%s4885_s12 + $0x1c] sm:$0x1]  ;;  %v5075_v26 = vld [vmem:[%s4882_s18 + $0x18] sm:$0xe]  ;;  %v4186_v31 = vcombine.low %v3944_v22, %v3944_v22 }
  0x53   : > { %839 = vrot.lane.b32.xlu0 %v834_v7, %s6845_s10  ;;  %841 = vrot.lane.b32.xlu1 %v835_v42, %s6845_s10  ;;  %v1809_v7 = vrot.slane %v1807_v35, 1  ;;  %v2442_v42 = vrot.slane %v2440_v38, 7  ;;  %v1955_v60 = vshrl.u32 %v4116_v16, 16  ;;  %v1924_v0 = vrot.slane %v4111_v59, 1  ;;  %v5104_v48 = vld [vmem:[%s4882_s18 + $0x18] sm:$0xe] }
  0x54   : > { %v1958_v2 = vshll.u32 %v4116_v16, 16  ;;  %v4201_v17 = vcombine.low %v3951_v23, %v3961_v24  ;;  %v4126_v32 = vcombine.low %v5047_v45, %v5004_v53  ;;  %v3971_v16 = vld [vmem:[%s4885_s12 + $0x18] sm:$0xe]  ;;  %v3821_v6 = vld [vmem:[%s4882_s18 + $0x14] sm:$0x3] }
  0x55   : > { %v1810_v46 = vor.u32 %v1809_v7, %v1805_v40  ;;  %v2445_v51 = vor.u32 %v2443_v43, %v2442_v42  ;;  %v3806_v42 = vld [vmem:[%s4885_s12 + $0x14] sm:$0x1]  ;;  %v3816_v43 = vld [vmem:[%s4885_s12 + $0x10] sm:$0xe]  ;;  %v3817_v59 = vld [vmem:[%s4885_s12 + $0x18] sm:$0xe] }
  0x56   : > { %v2790_v35 = vshrl.u32 %v4201_v17, 16  ;;  %v2793_v41 = vshll.u32 %v4201_v17, 16  ;;  %v3933_v19 = vld [vmem:[%s4990_s17 + $0x18] sm:$0xe] }
  0x57   : > { %843 = vrot.lane.b32.xlu0 %v836_v15, %s6845_s10  ;;  %845 = vrot.lane.b32.xlu1 %v837_v50, %s6845_s10  ;;  %v1865_v15 = vshrl.u32 %v4106_v34, 16  ;;  %v5054_v50 = vld [vmem:[%s4885_s12 + $0x10] sm:$0xf]  ;;  %v4191_v34 = vcombine.low %v3951_v23, %v3951_v23  ;;  %v3899_v23 = vld [vmem:[%s4882_s18 + $0x1c] sm:$0x3] }
  0x58   : > { %v4121_v61 = vcombine.low %v5054_v50, %v5054_v50  ;;  %v4131_v37 = vcombine.low %v5054_v50, %v5018_v8  ;;  %v2792_v7 = vrot.slane %v2790_v35, 7  ;;  %v3966_v8 = vld [vmem:[%s4882_s18 + $0x18] sm:$0xe] }
  0x59   : > { %v2699_v40 = vrot.slane %v4191_v34, 7  ;;  %v4206_v50 = vcombine.low %v3966_v8, %v3956_v21 }
  0x5a   : > { %v2015_v3 = vshrl.u32 %v4121_v61, 16  ;;  %v2018_v13 = vshll.u32 %v4121_v61, 16  ;;  %v2795_v45 = vor.u32 %v2793_v41, %v2792_v7  ;;  %v3807_v61 = vld [vmem:[%s4885_s12 + $0x1c] sm:$0x1]  ;;  %v3894_v41 = vld [vmem:[%s4885_s12 + $0x18] sm:$0xe] }
  0x5b   : > { %1459 = vrot.lane.b32.xlu0 %v4061_v57, %s6839_s21  ;;  %1519 = vrot.lane.b32.xlu1 %v1490_v62, %s6908_s22  ;;  %v1870_v57 = vor.u32 %v1869_v47, %v1865_v15  ;;  %v2505_v62 = vor.u32 %v2503_v54, %v2502_v52  ;;  %v4072_v15 = vcombine.low %v3816_v43, %v3806_v42  ;;  %v3802_v47 = vld [vmem:[%s4882_s18 + $0x1c] sm:$0x1] }
  0x5c   : > { %v4068_v52 = vcombine.low %v5104_v48, %v3802_v47  ;;  %v4211_v54 = vcombine.low %v3971_v16, %v3961_v24  ;;  %v5148_v7 = vld [vmem:[%s4885_s12 + $0x1c] sm:$0x1]  ;;  %v5161_v47 = vld [vmem:[%s4882_s18 + $0x20] sm:$0xe] }
  0x5d   : > { %v1554_v58 = vshll.u32 %v4072_v15, 16  ;;  %v4142_v8 = vcombine.low %v3894_v41, %v5148_v7  ;;  %6921 = vst [vmem:[#allocation16_spill] sm:$0xff] %v5161_v47 }
  0x5f   : > { %1579 = vrot.lane.b32.xlu0 %v1550_v1, %s6909_s23  ;;  %1609 = vrot.lane.b32.xlu1 %v1604_v5, %s6843_s13  ;;  %v1957_v1 = vrot.slane %v1955_v60, 7  ;;  %v2612_v5 = vshll.u32 %v4181_v63, 16  ;;  %v5113_v60 = vld [vmem:[%s4977_s9 + $0x10] sm:$0xf] }
  0x61   : > { %v1960_v9 = vor.u32 %v1958_v2, %v1957_v1  ;;  %v2614_v20 = vrot.slane %v2612_v5, 1  ;;  %v1552_v2 = vshrl.u32 %v4072_v15, 16  ;;  %v4082_v5 = vcombine.low %v5113_v60, %v5113_v60 }
  0x63   : > { %1669 = vrot.lane.b32.xlu0 %v1640_v12, %s6845_s10  ;;  %2294 = vrot.lane.b32.xlu1 %v4141_v18, %s6839_s21  ;;  %s6853_s21 = smov 24   ;;  %v2017_v12 = vrot.slane %v2015_v3, 7  ;;  %v2610_v18 = vshrl.u32 %v4181_v63, 16  ;;  %v4073_v63 = vcombine.low %v3817_v59, %v3807_v61  ;;  %v1556_v3 = vrot.slane %v1554_v58, 1 }
  0x65   : > { %v2020_v10 = vor.u32 %v2018_v13, %v2017_v12  ;;  %v2615_v29 = vor.u32 %v2614_v20, %v2610_v18  ;;  %v1499_v12 = vshrl.u32 %v4068_v52, 16  ;;  %v1557_v18 = vor.u32 %v1556_v3, %v1552_v2  ;;  %v3906_v2 = vld [vmem:[%s4977_s9 + $0x18] sm:$0xf] }
  0x66   : > { %v4077_v20 = vcombine.low %v5090_v25, %v3821_v6 }
  0x67   : > { %1729 = vrot.lane.b32.xlu0 %v1700_v27, %s6849_s20  ;;  %2354 = vrot.lane.b32.xlu1 %v2325_v28, %s6908_s22  ;;  %v5078_v27 = vld [vmem:[%s4882_s18 + $0x1c] sm:$0x1]  ;;  %v4196_v28 = vcombine.low %v3944_v22, %v3956_v21  ;;  %v1642_v21 = vshrl.u32 %v4082_v5, 16  ;;  %v5126_v22 = vld [vmem:[%s4990_s17 + $0x10] sm:$0xf] }
  0x69   : > { %v2730_v33 = vshrl.u32 %v4196_v28, 16  ;;  %v1644_v17 = vrot.slane %v1642_v21, 7 }
  0x6b   : > { %1754 = vrot.lane.b32.xlu0 %v4091_v30, %s6841_s16  ;;  %2384 = vrot.lane.b32.xlu1 %v2379_v36, %s6909_s23  ;;  %s6857_s16 = smov 27   ;;  %v2669_v30 = vrot.slane %v4186_v31, 7  ;;  %v3801_v36 = vld [vmem:[%s4882_s18 + $0x14] sm:$0x1]  ;;  %v2732_v38 = vrot.slane %v2730_v33, 7  ;;  %v1605_v31 = vrot.slane %v4077_v20, 1  ;;  %v4147_v33 = vcombine.low %v5075_v26, %v3899_v23 }
  0x6c   : > { %v5195_v20 = vld [vmem:[%s4977_s9 + $0x10] sm:$0xe] }
  0x6d   : > { %v2327_v16 = vshrl.u32 %v4147_v33, 16 }
  0x6f   : > { %1779 = vrot.lane.b32.xlu0 %v4096_v39, %s6853_s21  ;;  %2414 = vrot.lane.b32.xlu1 %v2409_v11, %s6843_s13  ;;  %s6847_s13 = smov 30   ;;  %v2733_v39 = vshll.u32 %v4196_v28, 16  ;;  %v4067_v11 = vcombine.low %v5090_v25, %v3801_v36  ;;  %v3822_v36 = vld [vmem:[%s4882_s18 + $0x1c] sm:$0x3] }
  0x71   : > { %v2735_v44 = vor.u32 %v2733_v39, %v2732_v38  ;;  %v1492_v55 = vshrl.u32 %v4067_v11, 16 }
  0x73   : > { %1839 = vrot.lane.b32.xlu0 %v1810_v46, %s6857_s16  ;;  %2474 = vrot.lane.b32.xlu1 %v2445_v51, %s6845_s10  ;;  %s6851_s10 = smov 33   ;;  %v1494_v46 = vshll.u32 %v4067_v11, 16  ;;  %v3796_v51 = vld [vmem:[%s4885_s12 + $0x10] sm:$0xf]  ;;  %v2329_v11 = vshll.u32 %v4147_v33, 16 }
  0x74   : > { %v3913_v33 = vld [vmem:[%s4990_s17 + $0x18] sm:$0xf] }
  0x77   : > { %1899 = vrot.lane.b32.xlu0 %v1870_v57, %s6847_s13  ;;  %2534 = vrot.lane.b32.xlu1 %v2505_v62, %s6849_s20  ;;  %s6910_s13 = smov 21   ;;  %s6863_s20 = smov 36   ;;  %v1496_v57 = vrot.slane %v1494_v46, 1  ;;  %v4062_v62 = vcombine.low %v3796_v51, %v3806_v42  ;;  %v5165_v51 = vld [vmem:[%s4882_s18 + $0x24] sm:$0x1] }
  0x78   : > { %6923 = vst [vmem:[#allocation17_spill] sm:$0xff] %v5165_v51 }
  0x79   : > { %v1497_v1 = vor.u32 %v1496_v57, %v1492_v55 }
  0x7b   : > { %1929 = vrot.lane.b32.xlu0 %v1924_v0, %s6851_s10  ;;  %2559 = vrot.lane.b32.xlu1 %v4171_v4, %s6910_s13  ;;  %s6855_s10 = smov 39   ;;  %v1501_v0 = vshll.u32 %v4068_v52, 16  ;;  %v3797_v4 = vld [vmem:[%s4885_s12 + $0x18] sm:$0xf] }
  0x7d   : > { %v1503_v13 = vrot.slane %v1501_v0, 1 }
  0x7f   : > { %1989 = vrot.lane.b32.xlu0 %v1960_v9, %s6863_s20  ;;  %2584 = vrot.lane.b32.xlu1 %v4176_v14, %s6853_s21  ;;  %s6859_s21 = smov 42   ;;  %v4063_v9 = vcombine.low %v3797_v4, %v3807_v61  ;;  %v1561_v14 = vshll.u32 %v4073_v63, 16  ;;  %v1504_v24 = vor.u32 %v1503_v13, %v1499_v12  ;;  %v4152_v12 = vcombine.low %v3906_v2, %v3906_v2  ;;  %v5189_v13 = vld [vmem:[%s4885_s12 + $0x24] sm:$0x1] }
  0x81   : > { %v1563_v28 = vrot.slane %v1561_v14, 1  ;;  %v3895_v14 = vld [vmem:[%s4885_s12 + $0x20] sm:$0xe] }
  0x82   : > { %v4143_v23 = vcombine.low %v3895_v14, %v5189_v13 }
  0x83   : > { %2049 = vrot.lane.b32.xlu0 %v2020_v10, %s6855_s10  ;;  %2644 = vrot.lane.b32.xlu1 %v2615_v29, %s6857_s16  ;;  %s6911_s10 = smov 30   ;;  %s6861_s16 = smov 45   ;;  %v1559_v10 = vshrl.u32 %v4073_v63, 16  ;;  %v4087_v29 = vcombine.low %v5126_v22, %v5126_v22  ;;  %v3900_v63 = vld [vmem:[%s4882_s18 + $0x24] sm:$0x3] }
  0x84   : > { %v4148_v6 = vcombine.low %v5161_v47, %v3900_v63 }
  0x85   : > { %v1564_v25 = vor.u32 %v1563_v28, %v1559_v10  ;;  %v1705_v46 = vshll.u32 %v4087_v29, 16 }
  0x87   : > { %2074 = vrot.lane.b32.xlu0 %v4126_v32, %s6859_s21  ;;  %2674 = vrot.lane.b32.xlu1 %v2669_v30, %s6911_s10  ;;  %s6912_s21 = smov 33   ;;  %v1645_v32 = vshll.u32 %v4082_v5, 16  ;;  %v5135_v30 = vld [vmem:[%s4977_s9 + $0x18] sm:$0xf] }
  0x88   : > { %v4083_v38 = vcombine.low %v5135_v30, %v5135_v30 }
  0x89   : > { %v1647_v39 = vor.u32 %v1645_v32, %v1644_v17  ;;  %v5206_v17 = vld [vmem:[%s4977_s9 + $0x1c] sm:$0x1]  ;;  %v3845_v32 = vld [vmem:[%s4990_s17 + $0x14] sm:$0x1] }
  0x8a   : > { %v1649_v15 = vshrl.u32 %v4083_v38, 16  ;;  %v1652_v59 = vshll.u32 %v4083_v38, 16  ;;  %v4097_v41 = vcombine.low %v5126_v22, %v3845_v32 }
  0x8b   : > { %2099 = vrot.lane.b32.xlu0 %v4131_v37, %s6861_s16  ;;  %2704 = vrot.lane.b32.xlu1 %v2699_v40, %s6912_s21  ;;  %s6913_s16 = smov 39   ;;  %v1702_v37 = vshrl.u32 %v4087_v29, 16  ;;  %v4078_v40 = vcombine.low %v5104_v48, %v3822_v36  ;;  %v2380_v29 = vrot.slane %v4152_v12, 7 }
  0x8c   : > { %v1651_v58 = vrot.slane %v1649_v15, 7 }
  0x8d   : > { %v1606_v48 = vrot.slane %v4078_v40, 1  ;;  %v3855_v40 = vld [vmem:[%s4990_s17 + $0x10] sm:$0xe] }
  0x8e   : > { %v1654_v4 = vor.u32 %v1652_v59, %v1651_v58  ;;  %v4107_v15 = vcombine.low %v3855_v40, %v3845_v32 }
  0x8f   : > { %2764 = vrot.lane.b32.xlu0 %v2735_v44, %s6863_s20  ;;  %2824 = vrot.lane.b32.xlu1 %v2795_v45, %s6913_s16  ;;  %s6915_s20 = smov 45   ;;  %v5156_v44 = vld [vmem:[%s4990_s17 + $0x18] sm:$0xf]  ;;  %v1704_v45 = vrot.slane %v1702_v37, 7  ;;  %v2334_v37 = vshrl.u32 %v4148_v6, 16 }
  0x90   : > { %v4088_v61 = vcombine.low %v5156_v44, %v5156_v44  ;;  %v1874_v14 = vshll.u32 %v4107_v15, 16  ;;  %v1872_v32 = vshrl.u32 %v4107_v15, 16 }
  0x91   : > { %v1707_v57 = vor.u32 %v1705_v46, %v1704_v45 }
  0x92   : > { %v1709_v5 = vshrl.u32 %v4088_v61, 16  ;;  %v1712_v10 = vshll.u32 %v4088_v61, 16  ;;  %v3907_v61 = vld [vmem:[%s4977_s9 + $0x20] sm:$0xf] }
  0x93   : > { %2849 = vrot.lane.b32.xlu0 %v4206_v50, %s6914_s0  ;;  %2874 = vrot.lane.b32.xlu1 %v4211_v54, %s6915_s20  ;;  %v2331_v50 = vrot.slane %v2329_v11, 1  ;;  %v4157_v11 = vcombine.low %v3913_v33, %v3913_v33 }
  0x97   : > { %1461 = vrot.lane.b32.xlu0 %v4062_v62, %s6916_s1  ;;  %1521 = vrot.lane.b32.xlu1 %v1497_v1, %s6908_s22  ;;  %v2332_v62 = vor.u32 %v2331_v50, %v2327_v16  ;;  %v3840_v1 = vld [vmem:[%s4977_s9 + $0x14] sm:$0x1]  ;;  %v3841_v50 = vld [vmem:[%s4977_s9 + $0x1c] sm:$0x1] }
  0x98   : > { %v4102_v28 = vcombine.low %v5195_v20, %v3840_v1 }
  0x9a   : > { %v1812_v58 = vshrl.u32 %v4102_v28, 16 }
  0x9b   : > { %1463 = vrot.lane.b32.xlu0 %v4063_v9, %s6916_s1  ;;  %1581 = vrot.lane.b32.xlu1 %v1557_v18, %s6909_s23  ;;  %v4092_v9 = vcombine.low %v5113_v60, %v3840_v1  ;;  %v2336_v60 = vshll.u32 %v4148_v6, 16  ;;  %v5237_v6 = vld [vmem:[%s4977_s9 + $0x18] sm:$0xe] }
  0x9d   : > { %v5137_v34 = vpop.permute.xlu1 %653  ;;  %v5139_v35 = vpop.permute.xlu0 %649  ;;  %v2338_v38 = vrot.slane %v2336_v60, 1 }
  0x9e   : > { %6917 = vst [vmem:[#allocation13_spill] sm:$0xff] %v5137_v34  ;;  %v5451_v34 = vld [vmem:[%s4990_s17] sm:$0xf] }
  0x9f   : > { %1523 = vrot.lane.b32.xlu0 %v1504_v24, %s6908_s22  ;;  %1611 = vrot.lane.b32.xlu1 %v1605_v31, %s6918_s2  ;;  %v1711_v24 = vrot.slane %v1709_v5, 7  ;;  %v2339_v16 = vor.u32 %v2338_v38, %v2334_v37  ;;  %v3914_v37 = vld [vmem:[%s4990_s17 + $0x20] sm:$0xf] }
  0xa1   : > { %v5151_v42 = vpop.permute.xlu1 %655  ;;  %v5153_v43 = vpop.permute.xlu0 %651 }
  0xa2   : > { %6919 = vst [vmem:[#allocation14_spill] sm:$0xff] %v5151_v42  ;;  %6920 = vst [vmem:[#allocation15_spill] sm:$0xff] %v5153_v43  ;;  %v4606_v43 = vld [vmem:[%s4882_s18 + $0xc] sm:$0x1] }
  0xa3   : > { %1583 = vrot.lane.b32.xlu0 %v1564_v25, %s6909_s23  ;;  %1671 = vrot.lane.b32.xlu1 %v1647_v39, %s6922_s3  ;;  %v1714_v25 = vor.u32 %v1712_v10, %v1711_v24  ;;  %v4162_v39 = vcombine.low %v3906_v2, %v5206_v17  ;;  %v4093_v2 = vcombine.low %v5135_v30, %v3841_v50  ;;  %v5246_v30 = vld [vmem:[%s4977_s9 + $0x24] sm:$0x1] }
  0xa4   : > { %v4103_v10 = vcombine.low %v5237_v6, %v3841_v50  ;;  %v4163_v40 = vcombine.low %v3907_v61, %v5246_v30 }
  0xa5   : > { %v5167_v52 = vpop.permute.xlu0 %657  ;;  %v5171_v55 = vpop.permute.xlu1 %719  ;;  %v2447_v22 = vshrl.u32 %v4162_v39, 16  ;;  %v2450_v12 = vshll.u32 %v4162_v39, 16 }
  0xa6   : > { %6924 = vst [vmem:[#allocation18_spill] sm:$0xff] %v5167_v52 }
  0xa7   : > { %2296 = vrot.lane.b32.xlu0 %v4142_v8, %s6916_s1  ;;  %1613 = vrot.lane.b32.xlu1 %v1606_v48, %s6918_s2  ;;  %v1814_v8 = vshll.u32 %v4102_v28, 16  ;;  %v5223_v48 = vld [vmem:[%s4990_s17 + $0x1c] sm:$0x1] }
  0xa8   : > { %v4167_v1 = vcombine.low %v3913_v33, %v5223_v48  ;;  %v3846_v28 = vld [vmem:[%s4990_s17 + $0x1c] sm:$0x1]  ;;  %v1876_v33 = vrot.slane %v1874_v14, 1 }
  0xa9   : > { %v5178_v0 = vpop.permute.xlu0 %721  ;;  %v5182_v3 = vpop.permute.xlu1 %723  ;;  %v1816_v59 = vrot.slane %v1814_v8, 1  ;;  %v4158_v8 = vcombine.low %v3914_v37, %v3914_v37 }
  0xaa   : > { %6925 = vst [vmem:[#allocation19_spill] sm:$0xff] %v5178_v0  ;;  %6926 = vst [vmem:[#allocation20_spill] sm:$0xff] %v5182_v3  ;;  %v1877_v15 = vor.u32 %v1876_v33, %v1872_v32  ;;  %v4542_v3 = vld [vmem:[%s6830_s4 + $0x30] sm:$0xff]   ;;  %v6944_v0 = vmov 0  }
  0xab   : > { %1731 = vrot.lane.b32.xlu0 %v1707_v57, %s6927_s11  ;;  %2356 = vrot.lane.b32.xlu1 %v2332_v62, %s6908_s22  ;;  %v2410_v57 = vrot.slane %v4157_v11, 7  ;;  %v1817_v5 = vor.u32 %v1816_v59, %v1812_v58  ;;  %v4098_v11 = vcombine.low %v5156_v44, %v3846_v28  ;;  %v3860_v59 = vld [vmem:[%s4977_s9 + $0x14] sm:$0x3]  ;;  %v2411_v44 = vrot.slane %v4158_v8, 7 }
  0xac   : > { %v4112_v14 = vcombine.low %v5195_v20, %v3860_v59  ;;  %v5284_v20 = vld [vmem:[%s4885_s12 + $0x18] sm:$0xf] }
  0xad   : > { %v5192_v18 = vpop.permute.xlu0 %725  ;;  %v5197_v21 = vpop.permute.xlu1 %727 }
  0xae   : > { %6928 = vst [vmem:[#allocation21_spill] sm:$0xff] %v5192_v18  ;;  %6929 = vst [vmem:[#allocation22_spill] sm:$0xff] %v5197_v21 }
  0xaf   : > { %1673 = vrot.lane.b32.xlu0 %v1654_v4, %s6922_s3  ;;  %1756 = vrot.lane.b32.xlu1 %v4092_v9, %s6910_s13  ;;  %v4153_v4 = vcombine.low %v3907_v61, %v3907_v61  ;;  %v2449_v9 = vrot.slane %v2447_v22, 7  ;;  %v5264_v22 = vld [vmem:[%s4882_s18 + $0x18] sm:$0xf] }
  0xb1   : > { %v5203_v31 = vpop.permute.xlu0 %779  ;;  %v5210_v36 = vpop.permute.xlu1 %781  ;;  %v2381_v60 = vrot.slane %v4153_v4, 7  ;;  %v5270_v4 = vld [vmem:[%s4990_s17 + $0x24] sm:$0x1] }
  0xb2   : > { %6930 = vst [vmem:[#allocation23_spill] sm:$0xff] %v5210_v36  ;;  %v4168_v32 = vcombine.low %v3914_v37, %v5270_v4  ;;  %v428_v36 = vld [vmem:[%s4977_s9 + $0x4] sm:$0x3] }
  0xb3   : > { %2298 = vrot.lane.b32.xlu0 %v4143_v23, %s6916_s1  ;;  %2386 = vrot.lane.b32.xlu1 %v2380_v29, %s6909_s23  ;;  %v2452_v29 = vor.u32 %v2450_v12, %v2449_v9  ;;  %v2454_v12 = vshrl.u32 %v4163_v40, 16 }
  0xb5   : > { %v5217_v45 = vpop.permute.xlu0 %783  ;;  %v5219_v46 = vpop.permute.xlu1 %785  ;;  %v2456_v33 = vrot.slane %v2454_v12, 7  ;;  %v4122_v12 = vcombine.low %v5284_v20, %v5284_v20 }
  0xb6   : > { %6931 = vst [vmem:[#allocation24_spill] sm:$0xff] %v5217_v45  ;;  %6932 = vst [vmem:[#allocation25_spill] sm:$0xff] %v5219_v46  ;;  %v389_v45 = vld [vmem:[%s4882_s18 + $0x4] sm:$0x3] }
  0xb7   : > { %1733 = vrot.lane.b32.xlu0 %v1714_v25, %s6927_s11  ;;  %1781 = vrot.lane.b32.xlu1 %v4097_v41, %s6933_s30  ;;  %v2507_v25 = vshrl.u32 %v4167_v1, 16  ;;  %v3856_v41 = vld [vmem:[%s4990_s17 + $0x18] sm:$0xe] }
  0xb8   : > { %v4108_v61 = vcombine.low %v3856_v41, %v3846_v28 }
  0xb9   : > { %v5228_v62 = vpop.permute.xlu0 %787  ;;  %v5230_v63 = vpop.permute.xlu1 %809  ;;  %v2509_v50 = vrot.slane %v2507_v25, 7  ;;  %v2457_v25 = vshll.u32 %v4163_v40, 16 }
  0xba   : > { %6934 = vst [vmem:[#allocation26_spill] sm:$0xff] %v5228_v62  ;;  %v1881_v41 = vshll.u32 %v4108_v61, 16 }
  0xbb   : > { %2358 = vrot.lane.b32.xlu0 %v2339_v16, %s6908_s22  ;;  %2416 = vrot.lane.b32.xlu1 %v2410_v57, %s6918_s2  ;;  %v1821_v16 = vshll.u32 %v4103_v10, 16  ;;  %v2510_v57 = vshll.u32 %v4167_v1, 16  ;;  %v2459_v37 = vor.u32 %v2457_v25, %v2456_v33  ;;  %v2517_v25 = vshll.u32 %v4168_v32, 16 }
  0xbc   : > { %v1883_v59 = vrot.slane %v1881_v41, 1 }
  0xbd   : > { %v5239_v23 = vpop.permute.xlu0 %811  ;;  %v5241_v24 = vpop.permute.xlu1 %813  ;;  %v1823_v9 = vrot.slane %v1821_v16, 1  ;;  %v2512_v1 = vor.u32 %v2510_v57, %v2509_v50  ;;  %v1879_v57 = vshrl.u32 %v4108_v61, 16 }
  0xbe   : > { %6935 = vst [vmem:[#allocation27_spill] sm:$0xff] %v5239_v23  ;;  %6936 = vst [vmem:[#allocation28_spill] sm:$0xff] %v5241_v24 }
  0xbf   : > { %1758 = vrot.lane.b32.xlu0 %v4093_v2, %s6910_s13  ;;  %1841 = vrot.lane.b32.xlu1 %v1817_v5, %s6937_s29  ;;  %v1819_v5 = vshrl.u32 %v4103_v10, 16  ;;  %v1884_v61 = vor.u32 %v1883_v59, %v1879_v57 }
  0xc1   : > { %v5251_v38 = vpop.permute.xlu0 %815  ;;  %v5253_v39 = vpop.permute.xlu1 %817  ;;  %v1824_v10 = vor.u32 %v1823_v9, %v1819_v5 }
  0xc2   : > { %6938 = vst [vmem:[#allocation29_spill] sm:$0xff] %v5251_v38  ;;  %6939 = vst [vmem:[#allocation30_spill] sm:$0xff] %v5253_v39 }
  0xc3   : > { %2388 = vrot.lane.b32.xlu0 %v2381_v60, %s6909_s23  ;;  %2476 = vrot.lane.b32.xlu1 %v2452_v29, %s6922_s3  ;;  %v4117_v60 = vcombine.low %v5264_v22, %v5264_v22 }
  0xc5   : > { %v5260_v58 = vpop.permute.xlu0 %839  ;;  %v5266_v2 = vpop.permute.xlu1 %841  ;;  %v1962_v8 = vshrl.u32 %v4117_v60, 16  ;;  %v1965_v9 = vshll.u32 %v4117_v60, 16  ;;  %v3861_v60 = vld [vmem:[%s4977_s9 + $0x1c] sm:$0x3] }
  0xc6   : > { %6940 = vst [vmem:[#allocation31_spill] sm:$0xff] %v5266_v2  ;;  %v4113_v57 = vcombine.low %v5237_v6, %v3861_v60  ;;  %v5324_v6 = vld [vmem:[%s4885_s12 + $0x20] sm:$0xf] }
  0xc7   : > { %1783 = vrot.lane.b32.xlu0 %v4098_v11, %s6933_s30  ;;  %1901 = vrot.lane.b32.xlu1 %v1877_v15, %s6911_s10  ;;  %v1925_v11 = vrot.slane %v4112_v14, 1  ;;  %v3928_v15 = vld [vmem:[%s4977_s9 + $0x18] sm:$0xe]  ;;  %v1964_v5 = vrot.slane %v1962_v8, 7  ;;  %v3938_v14 = vld [vmem:[%s4977_s9 + $0x1c] sm:$0x3] }
  0xc8   : > { %v4172_v40 = vcombine.low %v3928_v15, %v5206_v17  ;;  %v4182_v41 = vcombine.low %v3928_v15, %v3938_v14  ;;  %v5305_v8 = vld [vmem:[%s4882_s18 + $0x20] sm:$0xf]  ;;  %v4177_v15 = vcombine.low %v3933_v19, %v5223_v48  ;;  %v1926_v14 = vrot.slane %v4113_v57, 1 }
  0xc9   : > { %v5276_v29 = vpop.permute.xlu0 %843  ;;  %v5278_v28 = vpop.permute.xlu1 %845  ;;  %v1967_v17 = vor.u32 %v1965_v9, %v1964_v5  ;;  %v3929_v48 = vld [vmem:[%s4977_s9 + $0x20] sm:$0xe] }
  0xca   : > { %6941 = vst [vmem:[#allocation32_spill] sm:$0xff] %v5276_v29  ;;  %6942 = vst [vmem:[#allocation33_spill] sm:$0xff] %v5278_v28  ;;  %v4173_v60 = vcombine.low %v3929_v48, %v5246_v30  ;;  %v4127_v30 = vcombine.low %v5264_v22, %v5078_v27 }
  0xcb   : > { %2418 = vrot.lane.b32.xlu0 %v2411_v44, %s6918_s2  ;;  %2536 = vrot.lane.b32.xlu1 %v2512_v1, %s6927_s11  ;;  %v2514_v44 = vshrl.u32 %v4168_v32, 16  ;;  %v4118_v32 = vcombine.low %v5305_v8, %v5305_v8 }
  0xcd   : > { %v5286_v16 = vpop.permute.xlu0 %1459  ;;  %v5289_v50 = vpop.permute.xlu1 %1519  ;;  %v2516_v33 = vrot.slane %v2514_v44, 7  ;;  %v2025_v44 = vshll.u32 %v4122_v12, 16  ;;  %v1972_v57 = vshll.u32 %v4118_v32, 16 }
  0xcf   : > { %1843 = vrot.lane.b32.xlu0 %v1824_v10, %s6937_s29  ;;  %1931 = vrot.lane.b32.xlu1 %v1925_v11, %s6912_s21  ;;  %v2022_v11 = vshrl.u32 %v4122_v12, 16 }
  0xd1   : > { %v5296_v1 = vpop.permute.xlu0 %1579  ;;  %v5299_v10 = vpop.permute.xlu1 %1609  ;;  %v2024_v59 = vrot.slane %v2022_v11, 7  ;;  %v4123_v11 = vcombine.low %v5324_v6, %v5324_v6 }
  0xd3   : > { %2478 = vrot.lane.b32.xlu0 %v2459_v37, %s6922_s3  ;;  %2561 = vrot.lane.b32.xlu1 %v4172_v40, %s6910_s13  ;;  %v2519_v37 = vor.u32 %v2517_v25, %v2516_v33  ;;  %v2619_v40 = vshll.u32 %v4182_v41, 16  ;;  %v2027_v33 = vor.u32 %v2025_v44, %v2024_v59  ;;  %v2617_v25 = vshrl.u32 %v4182_v41, 16  ;;  %v3939_v41 = vld [vmem:[%s4977_s9 + $0x24] sm:$0x3]  ;;  %v3945_v44 = vld [vmem:[%s4882_s18 + $0x20] sm:$0xf] }
  0xd4   : > { %v4183_v39 = vcombine.low %v3929_v48, %v3939_v41  ;;  %v3952_v41 = vld [vmem:[%s4885_s12 + $0x20] sm:$0xf] }
  0xd5   : > { %v5307_v54 = vpop.permute.xlu0 %1669  ;;  %v5310_v56 = vpop.permute.xlu1 %2294  ;;  %v2621_v19 = vrot.slane %v2619_v40, 1 }
  0xd6   : > { %v2624_v52 = vshrl.u32 %v4183_v39, 16 }
  0xd7   : > { %1903 = vrot.lane.b32.xlu0 %v1884_v61, %s6911_s10  ;;  %1991 = vrot.lane.b32.xlu1 %v1967_v17, %s6943_s19  ;;  %v1969_v61 = vshrl.u32 %v4118_v32, 16  ;;  %v4187_v32 = vcombine.low %v3945_v44, %v3945_v44 }
  0xd9   : > { %v5318_v5 = vpop.permute.xlu0 %1729  ;;  %v5320_v9 = vpop.permute.xlu1 %2354  ;;  %v2670_v22 = vrot.slane %v4187_v32, 7  ;;  %v5371_v32 = vld [vmem:[%s4885_s12 + $0x24] sm:$0x1] }
  0xdb   : > { %2538 = vrot.lane.b32.xlu0 %v2519_v37, %s6927_s11  ;;  %2586 = vrot.lane.b32.xlu1 %v4177_v15, %s6933_s30  ;;  %v1971_v37 = vrot.slane %v1969_v61, 7  ;;  %v2622_v15 = vor.u32 %v2621_v19, %v2617_v25  ;;  %v3934_v61 = vld [vmem:[%s4990_s17 + $0x20] sm:$0xe]  ;;  %v2626_v19 = vshll.u32 %v4183_v39, 16 }
  0xdc   : > { %v4178_v48 = vcombine.low %v3934_v61, %v5270_v4  ;;  %v3946_v61 = vld [vmem:[%s4882_s18 + $0x28] sm:$0xf] }
  0xdd   : > { %v5328_v12 = vpop.permute.xlu0 %1754  ;;  %v5330_v17 = vpop.permute.xlu1 %2384  ;;  %v1974_v62 = vor.u32 %v1972_v57, %v1971_v37  ;;  %v2032_v37 = vshll.u32 %v4123_v11, 16  ;;  %v5356_v57 = vld [vmem:[%s4882_s18 + $0x24] sm:$0x1]  ;;  %v2628_v28 = vrot.slane %v2626_v19, 1 }
  0xdf   : > { %1933 = vrot.lane.b32.xlu0 %v1926_v14, %s6912_s21  ;;  %2051 = vrot.lane.b32.xlu1 %v2027_v33, %s6913_s16  ;;  %v2029_v14 = vshrl.u32 %v4123_v11, 16  ;;  %v4132_v11 = vcombine.low %v5284_v20, %v5148_v7  ;;  %v4202_v7 = vcombine.low %v3952_v41, %v5371_v32  ;;  %v5380_v20 = vld [vmem:[%s4882_s18 + $0x2c] sm:$0x1] }
  0xe1   : > { %v5338_v59 = vpop.permute.xlu0 %1779  ;;  %v5341_v40 = vpop.permute.xlu1 %2414 }
  0xe3   : > { %2563 = vrot.lane.b32.xlu0 %v4173_v60, %s6910_s13  ;;  %2646 = vrot.lane.b32.xlu1 %v2622_v15, %s6937_s29  ;;  %v2031_v60 = vrot.slane %v2029_v14, 7  ;;  %v4192_v14 = vcombine.low %v3952_v41, %v3952_v41  ;;  %v2797_v41 = vshrl.u32 %v4202_v7, 16 }
  0xe5   : > { %v5348_v33 = vpop.permute.xlu0 %1839  ;;  %v5350_v25 = vpop.permute.xlu1 %2474  ;;  %v2034_v4 = vor.u32 %v2032_v37, %v2031_v60  ;;  %v2700_v19 = vrot.slane %v4192_v14, 7  ;;  %v5393_v14 = vld [vmem:[%s4885_s12 + $0x2c] sm:$0x1] }
  0xe7   : > { %1993 = vrot.lane.b32.xlu0 %v1974_v62, %s6943_s19  ;;  %2076 = vrot.lane.b32.xlu1 %v4127_v30, %s6914_s0  ;;  %v4197_v62 = vcombine.low %v3945_v44, %v5356_v57  ;;  %v2629_v44 = vor.u32 %v2628_v28, %v2624_v52  ;;  %v4198_v52 = vcombine.low %v3946_v61, %v5380_v20 }
  0xe8   : > { %v4128_v28 = vcombine.low %v5305_v8, %v5165_v51  ;;  %v4133_v8 = vcombine.low %v5324_v6, %v5189_v13  ;;  %v4538_v6 = vld [vmem:[%s6830_s4 + $0x38] sm:$0xff]  }
  0xe9   : > { %v5358_v15 = vpop.permute.xlu0 %1899  ;;  %v5361_v21 = vpop.permute.xlu1 %2534  ;;  %v2737_v39 = vshrl.u32 %v4197_v62, 16  ;;  %v2740_v46 = vshll.u32 %v4197_v62, 16 }
  0xeb   : > { %2588 = vrot.lane.b32.xlu0 %v4178_v48, %s6933_s30  ;;  %2676 = vrot.lane.b32.xlu1 %v2670_v22, %s6911_s10  ;;  %v4188_v48 = vcombine.low %v3946_v61, %v3946_v61  ;;  %v2739_v22 = vrot.slane %v2737_v39, 7 }
  0xed   : > { %v5368_v30 = vpop.permute.xlu0 %1929  ;;  %v5374_v38 = vpop.permute.xlu1 %2559  ;;  %v2742_v62 = vor.u32 %v2740_v46, %v2739_v22  ;;  %v2747_v22 = vshll.u32 %v4198_v52, 16 }
  0xef   : > { %2053 = vrot.lane.b32.xlu0 %v2034_v4, %s6913_s16  ;;  %2101 = vrot.lane.b32.xlu1 %v4132_v11, %s6915_s20  ;;  %v2671_v4 = vrot.slane %v4188_v48, 7  ;;  %v3953_v11 = vld [vmem:[%s4885_s12 + $0x28] sm:$0xf]  ;;  %v2800_v48 = vshll.u32 %v4202_v7, 16 }
  0xf0   : > { %v4193_v39 = vcombine.low %v3953_v11, %v3953_v11  ;;  %v4203_v61 = vcombine.low %v3953_v11, %v5393_v14 }
  0xf1   : > { %v5382_v60 = vpop.permute.xlu0 %1989  ;;  %v5384_v37 = vpop.permute.xlu1 %2584 }
  0xf2   : > { %v2804_v11 = vshrl.u32 %v4203_v61, 16 }
  0xf3   : > { %2648 = vrot.lane.b32.xlu0 %v2629_v44, %s6937_s29  ;;  %2706 = vrot.lane.b32.xlu1 %v2700_v19, %s6912_s21  ;;  %v2744_v44 = vshrl.u32 %v4198_v52, 16  ;;  %v2799_v19 = vrot.slane %v2797_v41, 7  ;;  %v6870_v41 = vmov 0   ;;  %v4605_v52 = vld [vmem:[%s4882_s18] sm:$0xe] }
  0xf4   : > { %3312 = vmatprep.subr.bf16.mxu0 %v6870_v41  ;;  %3363 = vmatprep.subr.bf16.mxu1 %v6870_v41 }
  0xf5   : > { %v5395_v18 = vpop.permute.xlu0 %2049  ;;  %v5397_v42 = vpop.permute.xlu1 %2644  ;;  %v2746_v46 = vrot.slane %v2744_v44, 7  ;;  %v2802_v13 = vor.u32 %v2800_v48, %v2799_v19  ;;  %3313 = vmatpush1.bf16.msra.mxu0 %v4538_v6  ;;  %3364 = vmatpush1.bf16.msra.mxu1 %v4538_v6  ;;  %v2807_v19 = vshll.u32 %v4203_v61, 16  ;;  %v5437_v61 = vld [vmem:[%s4977_s9 + $0x4] sm:$0x1] }
  0xf6   : > { %3314 = vmatprep.subr.bf16.mxu0 %v6870_v41  ;;  %3365 = vmatprep.subr.bf16.mxu1 %v6870_v41 }
  0xf7   : > { %2078 = vrot.lane.b32.xlu0 %v4128_v28, %s6914_s0  ;;  %2678 = vrot.lane.b32.xlu1 %v2671_v4, %s6911_s10  ;;  %v2701_v28 = vrot.slane %v4193_v39, 7  ;;  %v3967_v4 = vld [vmem:[%s4882_s18 + $0x20] sm:$0xe]  ;;  %v4006_v39 = vcombine.low %v4605_v52, %v389_v45  ;;  %v2749_v44 = vor.u32 %v2747_v22, %v2746_v46 }
  0xf8   : > { %v4207_v48 = vcombine.low %v3967_v4, %v5356_v57  ;;  %v3972_v45 = vld [vmem:[%s4885_s12 + $0x20] sm:$0xe] }
  0xf9   : > { %v5404_v29 = vpop.permute.xlu0 %2074  ;;  %v5406_v24 = vpop.permute.xlu1 %2674  ;;  %3315 = vmatpush1.bf16.msra.mxu0 %v4542_v3  ;;  %3366 = vmatpush1.bf16.msra.mxu1 %v4542_v3  ;;  %v865_v57 = vshrl.u32 %v4006_v39, 16  ;;  %v868_v22 = vshll.u32 %v4006_v39, 16  ;;  %v4212_v4 = vcombine.low %v3972_v45, %v5371_v32  ;;  %v5454_v3 = vld [vmem:[%s4990_s17 + $0x4] sm:$0x1]  ;;  %v4544_v39 = vld [vmem:[%s6830_s4 + $0x28] sm:$0xff]  }
  0xfa   : > { %3316 = vmatprep.subr.bf16.mxu0 %v6870_v41  ;;  %3367 = vmatprep.subr.bf16.mxu1 %v6870_v41  ;;  %v5472_v23 = vcombine.low %v5451_v34, %v5454_v3  ;;  %v5475_v41 = vld [vmem:[%s4977_s9] sm:$0xe] }
  0xfb   : > { %2766 = vrot.lane.b32.xlu0 %v2742_v62, %s6943_s19  ;;  %2103 = vrot.lane.b32.xlu1 %v4133_v8, %s6915_s20  ;;  %v2806_v8 = vrot.slane %v2804_v11, 7  ;;  %v870_v45 = vrot.slane %v868_v22, 2 }
  0xfd   : > { %v5414_v7 = vpop.permute.xlu0 %2099  ;;  %v5419_v62 = vpop.permute.xlu1 %2704  ;;  %v2809_v11 = vor.u32 %v2807_v19, %v2806_v8  ;;  %v3973_v8 = vld [vmem:[%s4885_s12 + $0x28] sm:$0xe]  ;;  %3317 = vmatpush1.bf16.msra.mxu0 %v4544_v39  ;;  %3368 = vmatpush1.bf16.msra.mxu1 %v4544_v39  ;;  %v4041_v39 = vcombine.low %v5475_v41, %v428_v36 }
  0xfe   : > { %3318 = vmatprep.subr.bf16.mxu0 %v6944_v0  ;;  %3369 = vmatprep.subr.bf16.mxu1 %v6944_v0 }
  0xff   : > { %2708 = vrot.lane.b32.xlu0 %v2701_v28, %s6912_s21  ;;  %2826 = vrot.lane.b32.xlu1 %v2802_v13, %s6913_s16  ;;  %v5434_v28 = vld [vmem:[%s4977_s9] sm:$0xf]  ;;  %v3968_v13 = vld [vmem:[%s4882_s18 + $0x28] sm:$0xe] }
 0x100   : > { %v5448_v52 = vcombine.low %v5434_v28, %v5437_v61  ;;  %v4208_v2 = vcombine.low %v3968_v13, %v5380_v20  ;;  %v4548_v20 = vld [vmem:[%s6830_s4 + $0x20] sm:$0xff]  }
 0x101   : > { %v5430_v6 = vpop.permute.xlu0 %2764  ;;  %v5439_v46 = vpop.permute.xlu1 %2824  ;;  %3319 = vmatpush1.bf16.msra.mxu0 %v4548_v20  ;;  %3370 = vmatpush1.bf16.msra.mxu1 %v4548_v20  ;;  %v423_v20 = vld [vmem:[%s4990_s17] sm:$0xe] }
 0x102   : > { %v982_v22 = vshll.u32 %v5448_v52, 16  ;;  %3320 = vmatprep.subr.bf16.mxu0 %v6944_v0  ;;  %v980_v36 = vshrl.u32 %v5448_v52, 16  ;;  %3371 = vmatprep.subr.bf16.mxu1 %v6944_v0 }
 0x103   : > { %2768 = vrot.lane.b32.xlu0 %v2749_v44, %s6943_s19  ;;  %2851 = vrot.lane.b32.xlu1 %v4207_v48, %s6914_s0  ;;  %v5461_v44 = vld [vmem:[%s4882_s18 + $0x8] sm:$0xf]  ;;  %v867_v48 = vrot.slane %v865_v57, 1  ;;  %v4213_v57 = vcombine.low %v3973_v8, %v5393_v14  ;;  %v1042_v14 = vshll.u32 %v5472_v23, 16  ;;  %v4011_v8 = vcombine.low %v5434_v28, %v5434_v28 }
 0x104   : > { %v4056_v51 = vcombine.low %v5461_v44, %v4606_v43  ;;  %v984_v47 = vrot.slane %v982_v22, 1  ;;  %v1163_v28 = vshll.u32 %v4041_v39, 16 }
 0x105   : > { %v5463_v32 = vpop.permute.xlu0 %2849  ;;  %v5466_v19 = vpop.permute.xlu1 %2874  ;;  %v871_v43 = vor.u32 %v870_v45, %v867_v48  ;;  %v4016_v45 = vcombine.low %v5451_v34, %v5451_v34  ;;  %v1044_v22 = vrot.slane %v1042_v14, 1  ;;  %v4555_v34 = vld [vmem:[%s6830_s4 + $0x10] sm:$0xff]  }
 0x106   : > { %v5542_v14 = vrot.slane %v1163_v28, 2 }
 0x107   : > { %2828 = vrot.lane.b32.xlu0 %v2809_v11, %s6913_s16  ;;  %2876 = vrot.lane.b32.xlu1 %v4212_v4, %s6915_s20  ;;  %v2111_v4 = vsel %vm1259_vm0, %v4056_v51, %v5286_v16  ;;  %v1160_v16 = vshrl.u32 %v4041_v39, 16 }
 0x108   : > { %v2125_v52 = vsel %vm1275_vm1, %v2111_v4, %v5289_v50  ;;  %v4031_v50 = vcombine.low %v5475_v41, %v5437_v61  ;;  %v5525_v4 = vld [vmem:[%s4882_s18 + $0x20] sm:$0xe] }
 0x109   : > { %v5488_v11 = vpop.permute.xlu0 %1461  ;;  %v5490_v13 = vpop.permute.xlu1 %1521  ;;  %v2135_v39 = vsel %vm1286_vm2, %v2125_v52, %v5296_v1  ;;  %v5540_v61 = vrot.slane %v1160_v16, 1  ;;  %v4557_v52 = vld [vmem:[%s6830_s4 + $0x8] sm:$0xff]  }
 0x10a   : > { %v1099_v28 = vrot.slane %v4031_v50, 1 }
 0x10b   : > { %2853 = vrot.lane.b32.xlu0 %v4208_v2, %s6914_s0  ;;  %2878 = vrot.lane.b32.xlu1 %v4213_v57, %s6915_s20  ;;  %v4551_v2 = vld [vmem:[%s6830_s4 + $0x18] sm:$0xff]   ;;  %v1040_v57 = vshrl.u32 %v5472_v23, 16  ;;  %v6945_v23 = vcombine.low %v4997_v49, %v5004_v53  ;;  %v2145_v49 = vsel %vm1297_vm3, %v2135_v39, %v5299_v10 }
 0x10c   : > { %3321 = vmatpush1.bf16.msra.mxu0 %v4551_v2  ;;  %3372 = vmatpush1.bf16.msra.mxu1 %v4551_v2  ;;  %v985_v2 = vor.u32 %v984_v47, %v980_v36  ;;  %v5552_v36 = vld [vmem:[%s4885_s12 + $0x24] sm:$0x1] }
 0x10d   : > { %v5506_v48 = vpop.permute.xlu0 %1463  ;;  %v5508_v51 = vpop.permute.xlu1 %1581  ;;  %3322 = vmatprep.subr.bf16.mxu0 %v6944_v0  ;;  %3373 = vmatprep.subr.bf16.mxu1 %v6944_v0  ;;  %v2886_v1 = vsel %vm1259_vm0, %v6945_v23, %v5310_v56  ;;  %v1045_v53 = vor.u32 %v1044_v22, %v1040_v57  ;;  %v5549_v56 = vld [vmem:[%s4885_s12 + $0x20] sm:$0xf] }
 0x10e   : > { %v2900_v10 = vsel %vm1275_vm1, %v2886_v1, %v5320_v9  ;;  %v3818_v57 = vld [vmem:[%s4885_s12 + $0x20] sm:$0xe] }
 0x10f   : > { %904 = vrot.lane.b32.xlu0 %v871_v43, %s6927_s11  ;;  %929 = vrot.lane.b32.xlu1 %v4011_v8, %s6910_s13  ;;  %v3803_v43 = vld [vmem:[%s4882_s18 + $0x24] sm:$0x1]  ;;  %v4036_v8 = vcombine.low %v423_v20, %v5454_v3  ;;  %v2155_v3 = vsel %vm6874_vm4, %v2145_v49, %v5307_v54  ;;  %v1166_v20 = vor.u32 %v5542_v14, %v5540_v61 }
 0x110   : > { %3323 = vmatpush1.bf16.msra.mxu0 %v4555_v34  ;;  %3374 = vmatpush1.bf16.msra.mxu1 %v4555_v34  ;;  %v5555_v16 = vcombine.low %v5525_v4, %v3803_v43 }
 0x111   : > { %v5536_v47 = vpop.permute.xlu0 %1523  ;;  %v5538_v41 = vpop.permute.xlu1 %1611  ;;  %3324 = vmatprep.subr.bf16.mxu0 %v6944_v0  ;;  %3375 = vmatprep.subr.bf16.mxu1 %v6944_v0  ;;  %v1129_v39 = vrot.slane %v4036_v8, 1 }
 0x112   : > { %v1508_v43 = vshll.u32 %v5555_v16, 16  ;;  %v1506_v8 = vshrl.u32 %v5555_v16, 16 }
 0x113   : > { %954 = vrot.lane.b32.xlu0 %v4016_v45, %s6933_s30  ;;  %1014 = vrot.lane.b32.xlu1 %v985_v2, %s6937_s29  ;;  %v2165_v45 = vsel %vm1319_vm5, %v2155_v3, %v5318_v5  ;;  %v4064_v2 = vcombine.low %v5549_v56, %v5552_v36  ;;  %v2910_v5 = vsel %vm1286_vm2, %v2900_v10, %v5330_v17 }
 0x114   : > { %v2175_v9 = vsel %vm6889_vm6, %v2165_v45, %v5328_v12  ;;  %3325 = vmatpush1.bf16.msra.mxu0 %v4557_v52  ;;  %3376 = vmatpush1.bf16.msra.mxu1 %v4557_v52  ;;  %v4046_v12 = vcombine.low %v5461_v44, %v5461_v44  ;;  %v2920_v34 = vsel %vm1297_vm3, %v2910_v5, %v5341_v40  ;;  %v5640_v52 = vld [vmem:[%s4882_s18 + $0x28] sm:$0xe]  ;;  %v4607_v45 = vld [vmem:[%s4882_s18 + $0x18] sm:$0xe] }
 0x115   : > { %v5569_v54 = vpop.permute.xlu0 %1583  ;;  %v5574_v22 = vpop.permute.xlu1 %1671  ;;  %v2185_v50 = vsel %vm1341_vm7, %v2175_v9, %v5338_v59  ;;  %3326 = vmatprep.subr.bf16.mxu0 %v6944_v0  ;;  %v5595_v17 = vcombine.low %v3818_v57, %v5552_v36  ;;  %v4560_v59 = vld [vmem:[%s6830_s4] sm:$0xff]   ;;  %3377 = vmatprep.subr.bf16.mxu1 %v6944_v0  ;;  %v2930_v44 = vsel %vm6874_vm4, %v2920_v34, %v5350_v25  ;;  %v4565_v25 = vld [vmem:[%s6830_s4 + $0x48] ss:$0 sps:$4 sm:$0x33]   ;;  %vm3306_vm4 = vcmask 1041408  }
 0x116   : > { %v2195_v23 = vsel %vm6890_vm8, %v2185_v50, %v5348_v33  ;;  %v2940_v1 = vsel %vm1319_vm5, %v2930_v44, %v5361_v21  ;;  %v3799_v34 = vld [vmem:[%s4885_s12 + $0x28] sm:$0xf] }
 0x117   : > { %1074 = vrot.lane.b32.xlu0 %v1045_v53, %s6911_s10  ;;  %1104 = vrot.lane.b32.xlu1 %v1099_v28, %s6912_s21  ;;  %v2205_v40 = vsel %vm1363_vm9, %v2195_v23, %v5358_v15  ;;  %v3976_v15 = vld [vmem:[%s4882_s18 + $0x1c] sm:$0x3]  ;;  %v2950_v49 = vsel %vm6889_vm6, %v2940_v1, %v5374_v38  ;;  %v4748_v53 = vmov 65535   ;;  %v1566_v50 = vshrl.u32 %v5595_v17, 16  ;;  %v3809_v23 = vld [vmem:[%s4885_s12 + $0x2c] sm:$0x1] }
 0x118   : > { %v2215_v61 = vsel %vm1374_vm10, %v2205_v40, %v5368_v30  ;;  %3327 = vmatpush1.bf16.msra.mxu0 %v4560_v59  ;;  %3378 = vmatpush1.bf16.msra.mxu1 %v4560_v59  ;;  %v1510_v30 = vrot.slane %v1508_v43, 1  ;;  %v3307_v56 = vsel %vm3305_vm15, 4294967295, %v4748_v53  ;;  %v2960_v36 = vsel %vm1341_vm7, %v2950_v49, %v5384_v37  ;;  %v3804_v37 = vld [vmem:[%s4882_s18 + $0x2c] sm:$0x1]  ;;  %v3819_v44 = vld [vmem:[%s4885_s12 + $0x28] sm:$0xe] }
 0x119   : > { %v5605_v33 = vpop.permute.xlu0 %2296  ;;  %v5611_v14 = vpop.permute.xlu1 %1613  ;;  %v2225_v21 = vsel %vm6880_vm11, %v2215_v61, %v5382_v60  ;;  %3340 = vmatprep.subr.bf16.mxu0 %v6944_v0  ;;  %v1568_v60 = vshll.u32 %v5595_v17, 16  ;;  %v3308_v16 = vsel %vm3306_vm4, %v3307_v56, 0  ;;  %3391 = vmatprep.subr.bf16.mxu1 %v6944_v0  ;;  %v2970_v3 = vsel %vm6890_vm8, %v2960_v36, %v5397_v42 }
 0x11a   : > { %v2235_v38 = vsel %vm1396_vm12, %v2225_v21, %v5395_v18  ;;  %v5642_v18 = vand.u32 %v4565_v25, %v3308_v16  ;;  %v4216_v57 = vcombine.low %v4607_v45, %v3976_v15  ;;  %v2980_v9 = vsel %vm1363_vm9, %v2970_v3, %v5406_v24  ;;  %v5681_v21 = vld [vmem:[%s4977_s9 + $0x20] sm:$0xf] }
 0x11b   : > { %1134 = vrot.lane.b32.xlu0 %v1129_v39, %s6943_s19  ;;  %1199 = vrot.lane.b32.xlu1 %v1166_v20, %s6913_s16  ;;  %v2245_v10 = vsel %vm6881_vm13, %v2235_v38, %v5404_v29  ;;  %v4608_v29 = vld [vmem:[%s4885_s12 + $0x8] sm:$0xf]  ;;  %v2990_v5 = vsel %vm1374_vm10, %v2980_v9, %v5419_v62  ;;  %v1570_v43 = vrot.slane %v1568_v60, 1  ;;  %v4070_v59 = vcombine.low %v5640_v52, %v3804_v37  ;;  %v4567_v62 = vld [vmem:[%s6830_s4 + $0x40] sm:$0xff]  }
 0x11c   : > { %6946 = vst [vmem:[#allocation34_spill] sm:$0xff] %v5642_v18  ;;  %v2255_v42 = vsel %vm1418_vm14, %v2245_v10, %v5414_v7  ;;  %v4051_v39 = vcombine.low %v4608_v29, %v4608_v29  ;;  %3341 = vmatpush2.bf16.msra.mxu0 %v5642_v18  ;;  %v3000_v24 = vsel %vm6880_vm11, %v2990_v5, %v5430_v6  ;;  %v3115_v6 = vshrl.u32 %v4216_v57, 16  ;;  %v3823_v37 = vld [vmem:[%s4882_s18 + $0x24] sm:$0x3]  ;;  %v5699_v9 = vld [vmem:[%s4990_s17 + $0x20] sm:$0xf] }
 0x11d   : > { %v5636_v28 = vpop.permute.xlu0 %1731  ;;  %v5649_v20 = vpop.permute.xlu1 %2356  ;;  %v1511_v7 = vor.u32 %v1510_v30, %v1506_v8  ;;  %3342 = vmatprep.subr.bf16.mxu0 %v6944_v0  ;;  %3392 = vmatpush2.bf16.msra.mxu1 %v5642_v18  ;;  %v3118_v40 = vshll.u32 %v4216_v57, 16  ;;  %v3010_v1 = vsel %vm1396_vm12, %v3000_v24, %v5439_v46  ;;  %v4065_v61 = vcombine.low %v3799_v34, %v3809_v23  ;;  %v5709_v34 = vld [vmem:[%s4882_s18 + $0x28] sm:$0xe] }
 0x11e   : > { %3393 = vmatprep.subr.bf16.mxu1 %v6944_v0  ;;  %v3020_v8 = vsel %vm6881_vm13, %v3010_v1, %v5463_v32  ;;  %v1571_v25 = vor.u32 %v1570_v43, %v1566_v50  ;;  %v4075_v15 = vcombine.low %v3819_v44, %v3809_v23  ;;  %v1515_v49 = vshll.u32 %v4070_v59, 16  ;;  %v3901_v23 = vld [vmem:[%s4882_s18 + $0x2c] sm:$0x3] }
 0x11f   : > { %1224 = vrot.lane.b32.xlu0 %v4046_v12, %s6914_s0  ;;  %1465 = vrot.lane.b32.xlu1 %v4064_v2, %s6916_s1  ;;  %v3041_v12 = vshll.u32 %v2255_v42, 16  ;;  %v3117_v46 = vrot.slane %v3115_v6, 1  ;;  %v3120_v32 = vrot.slane %v3118_v40, 2  ;;  %v3039_v36 = vshrl.u32 %v2255_v42, 16 }
 0x120   : > { %3343 = vmatpush2.bf16.msra.mxu0 %v4567_v62  ;;  %v3030_v38 = vsel %vm1418_vm14, %v3020_v8, %v5466_v19  ;;  %v4084_v60 = vcombine.low %v5681_v21, %v5681_v21  ;;  %v1513_v16 = vshrl.u32 %v4070_v59, 16  ;;  %v1517_v3 = vrot.slane %v1515_v49, 1  ;;  %v3824_v8 = vld [vmem:[%s4882_s18 + $0x2c] sm:$0x3] }
 0x121   : > { %v5667_v17 = vpop.permute.xlu0 %1673  ;;  %v5671_v2 = vpop.permute.xlu1 %1756  ;;  %3410 = vmatprep.subr.bf16.mxu0 %v6944_v0  ;;  %v3043_v30 = vrot.slane %v3041_v12, 1  ;;  %3394 = vmatpush2.bf16.msra.mxu1 %v4567_v62  ;;  %v1575_v10 = vshll.u32 %v4075_v15, 16  ;;  %v3084_v42 = vrot.slane %v3030_v38, 1  ;;  %v3121_v29 = vor.u32 %v3120_v32, %v3117_v46  ;;  %v5715_v62 = vld [vmem:[%s4977_s9 + $0x28] sm:$0xf] }
 0x122   : > { %3457 = vmatprep.subr.bf16.mxu1 %v6944_v0  ;;  %v1656_v5 = vshrl.u32 %v4084_v60, 16  ;;  %v1518_v50 = vor.u32 %v1517_v3, %v1513_v16  ;;  %v1573_v24 = vshrl.u32 %v4075_v15, 16  ;;  %v4089_v43 = vcombine.low %v5699_v9, %v5699_v9  ;;  %v5728_v49 = vld [vmem:[%s4885_s12 + $0x2c] sm:$0x1] }
 0x123   : > { %1249 = vrot.lane.b32.xlu0 %v4051_v39, %s6915_s20  ;;  %1525 = vrot.lane.b32.xlu1 %v1511_v7, %s6908_s22  ;;  %v3044_v45 = vor.u32 %v3043_v30, %v3039_v36  ;;  %v4079_v39 = vcombine.low %v5525_v4, %v3823_v37  ;;  %v1577_v7 = vrot.slane %v1575_v10, 1  ;;  %v1659_v6 = vshll.u32 %v4084_v60, 16  ;;  %v3896_v30 = vld [vmem:[%s4885_s12 + $0x28] sm:$0xe] }
 0x124   : > { %v1658_v44 = vrot.slane %v1656_v5, 7  ;;  %v4149_v40 = vcombine.low %v5709_v34, %v3901_v23  ;;  %v4080_v36 = vcombine.low %v5640_v52, %v3824_v8  ;;  %v4144_v60 = vcombine.low %v3896_v30, %v5728_v49  ;;  %v5751_v23 = vld [vmem:[%s4882_s18 + $0x30] sm:$0xe]  ;;  %v3908_v8 = vld [vmem:[%s4977_s9 + $0x28] sm:$0xf] }
 0x125   : > { %v5684_v53 = vpop.permute.xlu0 %2298  ;;  %v5686_v56 = vpop.permute.xlu1 %2386  ;;  %v1607_v12 = vrot.slane %v4079_v39, 1  ;;  %v1578_v1 = vor.u32 %v1577_v7, %v1573_v24  ;;  %v1719_v3 = vshll.u32 %v4089_v43, 16  ;;  %6951 = vst [vmem:[#allocation39_spill] sm:$0xff] %v5751_v23  ;;  %vm6984_vm4 = vcmask 121856  }
 0x126   : > { %v1661_v32 = vor.u32 %v1659_v6, %v1658_v44  ;;  %v2343_v38 = vshll.u32 %v4149_v40, 16  ;;  %v2341_v52 = vshrl.u32 %v4149_v40, 16  ;;  %vm3164_vm15 = vcmask 392192  }
 0x127   : > { %1467 = vrot.lane.b32.xlu0 %v4065_v61, %s6916_s1  ;;  %1585 = vrot.lane.b32.xlu1 %v1571_v25, %s6909_s23  ;;  %v1716_v61 = vshrl.u32 %v4089_v43, 16  ;;  %v4085_v25 = vcombine.low %v5715_v62, %v5715_v62 }
 0x128   : > { %v2345_v39 = vrot.slane %v2343_v38, 1 }
 0x129   : > { %v5696_v57 = vpop.permute.xlu0 %1733  ;;  %v5701_v19 = vpop.permute.xlu1 %1781  ;;  %v1718_v16 = vrot.slane %v1716_v61, 7  ;;  %v1663_v10 = vshrl.u32 %v4085_v25, 16  ;;  %v1666_v24 = vshll.u32 %v4085_v25, 16 }
 0x12a   : > { %v2346_v6 = vor.u32 %v2345_v39, %v2341_v52 }
 0x12b   : > { %3069 = vrot.lane.b32.xlu0 %v3044_v45, %s6875_s26  ;;  %3089 = vrot.lane.b32.xlu1 %v3084_v42, %s4750_s15  ;;  %s4751_s26 = smov 16   ;;  %v5740_v45 = vld [vmem:[%s4990_s17 + $0x28] sm:$0xf]  ;;  %v1721_v5 = vor.u32 %v1719_v3, %v1718_v16  ;;  %v4154_v16 = vcombine.low %v3908_v8, %v3908_v8 }
 0x12c   : > { %v4090_v7 = vcombine.low %v5740_v45, %v5740_v45 }
 0x12d   : > { %v5712_v59 = vpop.permute.xlu0 %2358  ;;  %v5717_v4 = vpop.permute.xlu1 %2416 }
 0x12e   : > { %v1723_v61 = vshrl.u32 %v4090_v7, 16  ;;  %v1726_v52 = vshll.u32 %v4090_v7, 16 }
 0x12f   : > { %3154 = vrot.lane.b32.xlu0 %v3121_v29, %s4751_s26  ;;  %1527 = vrot.lane.b32.xlu1 %v1518_v50, %s6908_s22  ;;  %v1608_v29 = vrot.slane %v4080_v36, 1  ;;  %v1665_v50 = vrot.slane %v1663_v10, 7  ;;  %v3897_v36 = vld [vmem:[%s4885_s12 + $0x30] sm:$0xe]  ;;  %v5774_v10 = vld [vmem:[%s4977_s9 + $0x20] sm:$0xe] }
 0x131   : > { %v5725_v15 = vpop.permute.xlu0 %1758  ;;  %v5731_v46 = vpop.permute.xlu1 %1841  ;;  %v1668_v40 = vor.u32 %v1666_v24, %v1665_v50 }
 0x132   : > { %6947 = vst [vmem:[#allocation35_spill] sm:$0xff] %v5725_v15 }
 0x133   : > { %1615 = vrot.lane.b32.xlu0 %v1607_v12, %s6918_s2  ;;  %1587 = vrot.lane.b32.xlu1 %v1578_v1, %s6909_s23  ;;  %v3902_v12 = vld [vmem:[%s4882_s18 + $0x34] sm:$0x3]  ;;  %v3842_v1 = vld [vmem:[%s4977_s9 + $0x24] sm:$0x1] }
 0x134   : > { %v4150_v25 = vcombine.low %v5751_v23, %v3902_v12  ;;  %v4104_v24 = vcombine.low %v5774_v10, %v3842_v1  ;;  %v2382_v12 = vrot.slane %v4154_v16, 7 }
 0x135   : > { %v5737_v37 = vpop.permute.xlu0 %2388  ;;  %v5742_v42 = vpop.permute.xlu1 %2476 }
 0x136   : > { %6948 = vst [vmem:[#allocation36_spill] sm:$0xff] %v5737_v37  ;;  %6949 = vst [vmem:[#allocation37_spill] sm:$0xff] %v5742_v42  ;;  %v2350_v39 = vshll.u32 %v4150_v25, 16  ;;  %v5824_v42 = vld [vmem:[%s4977_s9 + $0x34] sm:$0x1] }
 0x137   : > { %1675 = vrot.lane.b32.xlu0 %v1661_v32, %s6922_s3  ;;  %2300 = vrot.lane.b32.xlu1 %v4144_v60, %s6916_s1  ;;  %v5764_v32 = vld [vmem:[%s4885_s12 + $0x34] sm:$0x1]  ;;  %v4094_v60 = vcombine.low %v5681_v21, %v3842_v1  ;;  %v5783_v21 = vld [vmem:[%s4977_s9 + $0x2c] sm:$0x1] }
 0x138   : > { %v4145_v3 = vcombine.low %v3897_v36, %v5764_v32  ;;  %v2352_v7 = vrot.slane %v2350_v39, 1  ;;  %v3915_v36 = vld [vmem:[%s4990_s17 + $0x28] sm:$0xf]  ;;  %v4164_v1 = vcombine.low %v3908_v8, %v5783_v21  ;;  %v3843_v39 = vld [vmem:[%s4977_s9 + $0x2c] sm:$0x1] }
 0x139   : > { %v5748_v43 = vpop.permute.xlu0 %1783  ;;  %v5754_v44 = vpop.permute.xlu1 %1901  ;;  %v5805_v8 = vld [vmem:[%s4990_s17 + $0x2c] sm:$0x1] }
 0x13a   : > { %6950 = vst [vmem:[#allocation38_spill] sm:$0xff] %v5748_v43  ;;  %v2461_v43 = vshrl.u32 %v4164_v1, 16 }
 0x13b   : > { %1617 = vrot.lane.b32.xlu0 %v1608_v29, %s6918_s2  ;;  %1735 = vrot.lane.b32.xlu1 %v1721_v5, %s6927_s11  ;;  %v1725_v29 = vrot.slane %v1723_v61, 7  ;;  %v3847_v61 = vld [vmem:[%s4990_s17 + $0x24] sm:$0x1] }
 0x13c   : > { %v4099_v16 = vcombine.low %v5699_v9, %v3847_v61  ;;  %v1826_v9 = vshrl.u32 %v4104_v24, 16 }
 0x13d   : > { %v5761_v30 = vpop.permute.xlu0 %2418  ;;  %v5767_v38 = vpop.permute.xlu1 %2536 }
 0x13e   : > { %6952 = vst [vmem:[#allocation40_spill] sm:$0xff] %v5761_v30  ;;  %6953 = vst [vmem:[#allocation41_spill] sm:$0xff] %v5767_v38 }
 0x13f   : > { %2360 = vrot.lane.b32.xlu0 %v2346_v6, %s6908_s22  ;;  %1677 = vrot.lane.b32.xlu1 %v1668_v40, %s6922_s3  ;;  %v1728_v6 = vor.u32 %v1726_v52, %v1725_v29  ;;  %v2348_v40 = vshrl.u32 %v4150_v25, 16  ;;  %v1828_v29 = vshll.u32 %v4104_v24, 16 }
 0x141   : > { %v5776_v5 = vpop.permute.xlu0 %1843  ;;  %v5778_v50 = vpop.permute.xlu1 %1931  ;;  %v2353_v25 = vor.u32 %v2352_v7, %v2348_v40  ;;  %v1830_v38 = vrot.slane %v1828_v29, 1  ;;  %v3916_v29 = vld [vmem:[%s4990_s17 + $0x30] sm:$0xf] }
 0x142   : > { %6954 = vst [vmem:[#allocation42_spill] sm:$0xff] %v5776_v5  ;;  %6955 = vst [vmem:[#allocation43_spill] sm:$0xff] %v5778_v50  ;;  %v5845_v50 = vld [vmem:[%s4882_s18 + $0x28] sm:$0xf] }
 0x143   : > { %1760 = vrot.lane.b32.xlu0 %v4094_v60, %s6910_s13  ;;  %2302 = vrot.lane.b32.xlu1 %v4145_v3, %s6916_s1  ;;  %v3857_v60 = vld [vmem:[%s4990_s17 + $0x20] sm:$0xe]  ;;  %v4159_v3 = vcombine.low %v3915_v36, %v3915_v36  ;;  %v1831_v24 = vor.u32 %v1830_v38, %v1826_v9  ;;  %s7040_s1 = smov 48  }
 0x145   : > { %v5788_v18 = vpop.permute.xlu0 %2478  ;;  %v5790_v30 = vpop.permute.xlu1 %2561 }
 0x146   : > { %6956 = vst [vmem:[#allocation44_spill] sm:$0xff] %v5788_v18  ;;  %6957 = vst [vmem:[#allocation45_spill] sm:$0xff] %v5790_v30  ;;  %v3909_v18 = vld [vmem:[%s4977_s9 + $0x30] sm:$0xf]  ;;  %v4109_v30 = vcombine.low %v3857_v60, %v3847_v61  ;;  %v4169_v60 = vcombine.low %v3915_v36, %v5805_v8  ;;  %v4160_v36 = vcombine.low %v3916_v29, %v3916_v29 }
 0x147   : > { %2390 = vrot.lane.b32.xlu0 %v2382_v12, %s6909_s23  ;;  %1737 = vrot.lane.b32.xlu1 %v1728_v6, %s6927_s11  ;;  %v2412_v12 = vrot.slane %v4159_v3, 7  ;;  %v4095_v6 = vcombine.low %v5715_v62, %v3843_v39  ;;  %v4155_v40 = vcombine.low %v3909_v18, %v3909_v18  ;;  %v2464_v3 = vshll.u32 %v4164_v1, 16 }
 0x148   : > { %v1886_v38 = vshrl.u32 %v4109_v30, 16  ;;  %v2413_v15 = vrot.slane %v4160_v36, 7 }
 0x149   : > { %v5797_v52 = vpop.permute.xlu0 %1903  ;;  %v5801_v5 = vpop.permute.xlu1 %1991  ;;  %v2383_v37 = vrot.slane %v4155_v40, 7 }
 0x14a   : > { %6958 = vst [vmem:[#allocation46_spill] sm:$0xff] %v5797_v52  ;;  %6959 = vst [vmem:[#allocation47_spill] sm:$0xff] %v5801_v5  ;;  %v5812_v52 = vld [vmem:[%s4977_s9 + $0x28] sm:$0xe]  ;;  %v3862_v5 = vld [vmem:[%s4977_s9 + $0x24] sm:$0x3] }
 0x14b   : > { %1785 = vrot.lane.b32.xlu0 %v4099_v16, %s6933_s30  ;;  %2362 = vrot.lane.b32.xlu1 %v2353_v25, %s6908_s22  ;;  %v2463_v16 = vrot.slane %v2461_v43, 7  ;;  %v1888_v25 = vshll.u32 %v4109_v30, 16  ;;  %v4105_v62 = vcombine.low %v5812_v52, %v3843_v39  ;;  %v4165_v39 = vcombine.low %v3909_v18, %v5824_v42  ;;  %v5840_v30 = vld [vmem:[%s4990_s17 + $0x34] sm:$0x1] }
 0x14c   : > { %v4170_v36 = vcombine.low %v3916_v29, %v5840_v30 }
 0x14d   : > { %v5809_v7 = vpop.permute.xlu0 %2538  ;;  %v5814_v61 = vpop.permute.xlu1 %2586  ;;  %v2466_v43 = vor.u32 %v2464_v3, %v2463_v16  ;;  %v1890_v1 = vrot.slane %v1888_v25, 1  ;;  %v1833_v16 = vshrl.u32 %v4105_v62, 16  ;;  %v2524_v3 = vshll.u32 %v4169_v60, 16 }
 0x14e   : > { %6960 = vst [vmem:[#allocation48_spill] sm:$0xff] %v5809_v7  ;;  %6961 = vst [vmem:[#allocation49_spill] sm:$0xff] %v5814_v61  ;;  %v3848_v61 = vld [vmem:[%s4990_s17 + $0x2c] sm:$0x1]  ;;  %v2468_v25 = vshrl.u32 %v4165_v39, 16 }
 0x14f   : > { %2420 = vrot.lane.b32.xlu0 %v2412_v12, %s6918_s2  ;;  %1762 = vrot.lane.b32.xlu1 %v4095_v6, %s6910_s13  ;;  %v2521_v12 = vshrl.u32 %v4169_v60, 16  ;;  %v4100_v9 = vcombine.low %v5740_v45, %v3848_v61  ;;  %v1835_v6 = vshll.u32 %v4105_v62, 16  ;;  %v4114_v62 = vcombine.low %v5774_v10, %v3862_v5 }
 0x150   : > { %v2470_v60 = vrot.slane %v2468_v25, 7 }
 0x151   : > { %v5821_v7 = vpop.permute.xlu0 %1933  ;;  %v5827_v23 = vpop.permute.xlu1 %2051  ;;  %v2523_v18 = vrot.slane %v2521_v12, 7  ;;  %v1837_v45 = vrot.slane %v1835_v6, 1  ;;  %v1927_v29 = vrot.slane %v4114_v62, 1 }
 0x152   : > { %6962 = vst [vmem:[#allocation50_spill] sm:$0xff] %v5821_v7  ;;  %6963 = vst [vmem:[#allocation51_spill] sm:$0xff] %v5827_v23  ;;  %v3858_v7 = vld [vmem:[%s4990_s17 + $0x28] sm:$0xe] }
 0x153   : > { %1845 = vrot.lane.b32.xlu0 %v1831_v24, %s6937_s29  ;;  %2392 = vrot.lane.b32.xlu1 %v2383_v37, %s6909_s23  ;;  %v1891_v24 = vor.u32 %v1890_v1, %v1886_v38  ;;  %v4110_v37 = vcombine.low %v3858_v7, %v3848_v61  ;;  %v4119_v7 = vcombine.low %v5845_v50, %v5845_v50  ;;  %v2471_v38 = vshll.u32 %v4165_v39, 16  ;;  %v5865_v39 = vld [vmem:[%s4885_s12 + $0x28] sm:$0xf] }
 0x154   : > { %v1838_v61 = vor.u32 %v1837_v45, %v1833_v16  ;;  %v2528_v16 = vshrl.u32 %v4170_v36, 16 }
 0x155   : > { %v5833_v40 = vpop.permute.xlu0 %2563  ;;  %v5836_v23 = vpop.permute.xlu1 %2646  ;;  %v1895_v1 = vshll.u32 %v4110_v37, 16  ;;  %v1893_v6 = vshrl.u32 %v4110_v37, 16  ;;  %v1976_v10 = vshrl.u32 %v4119_v7, 16  ;;  %v2473_v5 = vor.u32 %v2471_v38, %v2470_v60 }
 0x156   : > { %6964 = vst [vmem:[#allocation52_spill] sm:$0xff] %v5833_v40  ;;  %6965 = vst [vmem:[#allocation53_spill] sm:$0xff] %v5836_v23  ;;  %v1979_v25 = vshll.u32 %v4119_v7, 16  ;;  %v2530_v60 = vrot.slane %v2528_v16, 7  ;;  %v2531_v38 = vshll.u32 %v4170_v36, 16 }
 0x157   : > { %2480 = vrot.lane.b32.xlu0 %v2466_v43, %s6922_s3  ;;  %1787 = vrot.lane.b32.xlu1 %v4100_v9, %s6933_s30  ;;  %v2526_v43 = vor.u32 %v2524_v3, %v2523_v18  ;;  %v1978_v45 = vrot.slane %v1976_v10, 7  ;;  %v3935_v36 = vld [vmem:[%s4990_s17 + $0x28] sm:$0xe] }
 0x159   : > { %v5847_v40 = vpop.permute.xlu0 %1993  ;;  %v5849_v23 = vpop.permute.xlu1 %2076  ;;  %v1981_v7 = vor.u32 %v1979_v25, %v1978_v45 }
 0x15a   : > { %6966 = vst [vmem:[#allocation54_spill] sm:$0xff] %v5847_v40 }
 0x15b   : > { %1905 = vrot.lane.b32.xlu0 %v1891_v24, %s6911_s10  ;;  %2422 = vrot.lane.b32.xlu1 %v2413_v15, %s6918_s2  ;;  %v1897_v24 = vrot.slane %v1895_v1, 1  ;;  %v3930_v15 = vld [vmem:[%s4977_s9 + $0x28] sm:$0xe] }
 0x15c   : > { %v4174_v37 = vcombine.low %v3930_v15, %v5783_v21 }
 0x15d   : > { %v5857_v12 = vpop.permute.xlu0 %2588  ;;  %v5859_v9 = vpop.permute.xlu1 %2676  ;;  %v1898_v62 = vor.u32 %v1897_v24, %v1893_v6 }
 0x15e   : > { %6967 = vst [vmem:[#allocation55_spill] sm:$0xff] %v5857_v12  ;;  %6968 = vst [vmem:[#allocation56_spill] sm:$0xff] %v5859_v9  ;;  %v3863_v12 = vld [vmem:[%s4977_s9 + $0x2c] sm:$0x3] }
 0x15f   : > { %2540 = vrot.lane.b32.xlu0 %v2526_v43, %s6927_s11  ;;  %1847 = vrot.lane.b32.xlu1 %v1838_v61, %s6937_s29  ;;  %v4124_v43 = vcombine.low %v5865_v39, %v5865_v39  ;;  %v3940_v61 = vld [vmem:[%s4977_s9 + $0x2c] sm:$0x3]  ;;  %v4115_v6 = vcombine.low %v5812_v52, %v3863_v12 }
 0x160   : > { %v4184_v21 = vcombine.low %v3930_v15, %v3940_v61  ;;  %v4179_v15 = vcombine.low %v3935_v36, %v5805_v8  ;;  %v3931_v61 = vld [vmem:[%s4977_s9 + $0x30] sm:$0xe] }
 0x161   : > { %v5867_v18 = vpop.permute.xlu0 %2053  ;;  %v5869_v3 = vpop.permute.xlu1 %2101  ;;  %v2036_v10 = vshrl.u32 %v4124_v43, 16  ;;  %v2039_v45 = vshll.u32 %v4124_v43, 16  ;;  %v4175_v43 = vcombine.low %v3931_v61, %v5824_v42  ;;  %v5919_v42 = vld [vmem:[%s4882_s18 + $0x2c] sm:$0x1] }
 0x162   : > { %6969 = vst [vmem:[#allocation57_spill] sm:$0xff] %v5867_v18  ;;  %v5881_v18 = vld [vmem:[%s4882_s18 + $0x30] sm:$0xf]  ;;  %v2633_v25 = vshll.u32 %v4184_v21, 16  ;;  %v2631_v8 = vshrl.u32 %v4184_v21, 16 }
 0x163   : > { %1935 = vrot.lane.b32.xlu0 %v1927_v29, %s6912_s21  ;;  %2482 = vrot.lane.b32.xlu1 %v2473_v5, %s6922_s3  ;;  %v2533_v5 = vor.u32 %v2531_v38, %v2530_v60  ;;  %v4120_v24 = vcombine.low %v5881_v18, %v5881_v18  ;;  %v5902_v60 = vld [vmem:[%s4885_s12 + $0x30] sm:$0xf] }
 0x164   : > { %v4125_v36 = vcombine.low %v5902_v60, %v5902_v60 }
 0x165   : > { %v5877_v1 = vpop.permute.xlu0 %2648  ;;  %v5883_v29 = vpop.permute.xlu1 %2706  ;;  %v1983_v52 = vshrl.u32 %v4120_v24, 16 }
 0x166   : > { %6970 = vst [vmem:[#allocation58_spill] sm:$0xff] %v5877_v1  ;;  %6971 = vst [vmem:[#allocation59_spill] sm:$0xff] %v5883_v29  ;;  %v4609_v29 = vld [vmem:[%s4882_s18] sm:$0xf] }
 0x167   : > { %2565 = vrot.lane.b32.xlu0 %v4174_v37, %s6910_s13  ;;  %1907 = vrot.lane.b32.xlu1 %v1898_v62, %s6911_s10  ;;  %v2038_v37 = vrot.slane %v2036_v10, 7  ;;  %v1928_v62 = vrot.slane %v4115_v6, 1  ;;  %v2635_v10 = vrot.slane %v2633_v25, 1  ;;  %v1986_v6 = vshll.u32 %v4120_v24, 16  ;;  %v3947_v24 = vld [vmem:[%s4882_s18 + $0x30] sm:$0xf] }
 0x169   : > { %v5891_v16 = vpop.permute.xlu0 %2078  ;;  %v5893_v1 = vpop.permute.xlu1 %2678  ;;  %v2636_v21 = vor.u32 %v2635_v10, %v2631_v8  ;;  %v4189_v8 = vcombine.low %v3947_v24, %v3947_v24  ;;  %v2046_v10 = vshll.u32 %v4125_v36, 16 }
 0x16a   : > { %6972 = vst [vmem:[#allocation60_spill] sm:$0xff] %v5891_v16  ;;  %6973 = vst [vmem:[#allocation61_spill] sm:$0xff] %v5893_v1 }
 0x16b   : > { %1995 = vrot.lane.b32.xlu0 %v1981_v7, %s6943_s19  ;;  %2542 = vrot.lane.b32.xlu1 %v2533_v5, %s6927_s11  ;;  %v2041_v7 = vor.u32 %v2039_v45, %v2038_v37  ;;  %v1985_v5 = vrot.slane %v1983_v52, 7  ;;  %v2043_v45 = vshrl.u32 %v4125_v36, 16 }
 0x16d   : > { %v5898_v12 = vpop.permute.xlu0 %2766  ;;  %v5904_v38 = vpop.permute.xlu1 %2103  ;;  %v1988_v37 = vor.u32 %v1986_v6, %v1985_v5  ;;  %v5935_v6 = vld [vmem:[%s4882_s18 + $0x34] sm:$0x1] }
 0x16e   : > { %6974 = vst [vmem:[#allocation62_spill] sm:$0xff] %v5898_v12  ;;  %6975 = vst [vmem:[#allocation63_spill] sm:$0xff] %v5904_v38  ;;  %v3941_v38 = vld [vmem:[%s4977_s9 + $0x34] sm:$0x3] }
 0x16f   : > { %2590 = vrot.lane.b32.xlu0 %v4179_v15, %s6933_s30  ;;  %1937 = vrot.lane.b32.xlu1 %v1928_v62, %s6912_s21  ;;  %v4185_v15 = vcombine.low %v3931_v61, %v3941_v38  ;;  %v3936_v62 = vld [vmem:[%s4990_s17 + $0x30] sm:$0xe]  ;;  %v2045_v38 = vrot.slane %v2043_v45, 7 }
 0x170   : > { %v4180_v61 = vcombine.low %v3936_v62, %v5840_v30  ;;  %v4199_v30 = vcombine.low %v3947_v24, %v5935_v6  ;;  %v3954_v45 = vld [vmem:[%s4885_s12 + $0x30] sm:$0xf] }
 0x171   : > { %v5911_v1 = vpop.permute.xlu0 %2708  ;;  %v5914_v16 = vpop.permute.xlu1 %2826  ;;  %v2638_v36 = vshrl.u32 %v4185_v15, 16 }
 0x172   : > { %6976 = vst [vmem:[#allocation64_spill] sm:$0xff] %v5911_v1  ;;  %6977 = vst [vmem:[#allocation65_spill] sm:$0xff] %v5914_v16  ;;  %v2751_v24 = vshrl.u32 %v4199_v30, 16  ;;  %v5969_v16 = vld [vmem:[%s4885_s12 + $0x3c] sm:$0x1] }
 0x173   : > { %2055 = vrot.lane.b32.xlu0 %v2041_v7, %s6913_s16  ;;  %2567 = vrot.lane.b32.xlu1 %v4175_v43, %s6910_s13  ;;  %v4129_v7 = vcombine.low %v5845_v50, %v5919_v42  ;;  %v2640_v43 = vshll.u32 %v4185_v15, 16  ;;  %v2048_v50 = vor.u32 %v2046_v10, %v2045_v38  ;;  %v5952_v38 = vld [vmem:[%s4885_s12 + $0x34] sm:$0x1]  ;;  %v3948_v15 = vld [vmem:[%s4882_s18 + $0x38] sm:$0xf] }
 0x175   : > { %v5922_v25 = vpop.permute.xlu0 %2768  ;;  %v5925_v52 = vpop.permute.xlu1 %2851 }
 0x176   : > { %6978 = vst [vmem:[#allocation66_spill] sm:$0xff] %v5922_v25  ;;  %6979 = vst [vmem:[#allocation67_spill] sm:$0xff] %v5925_v52  ;;  %v3955_v52 = vld [vmem:[%s4885_s12 + $0x38] sm:$0xf] }
 0x177   : > { %2650 = vrot.lane.b32.xlu0 %v2636_v21, %s6937_s29  ;;  %1997 = vrot.lane.b32.xlu1 %v1988_v37, %s6943_s19  ;;  %v2672_v21 = vrot.slane %v4189_v8, 7  ;;  %v2642_v37 = vrot.slane %v2640_v43, 1  ;;  %v4194_v8 = vcombine.low %v3954_v45, %v3954_v45  ;;  %v5956_v43 = vld [vmem:[%s4882_s18 + $0x34] sm:$0x1] }
 0x179   : > { %v5932_v5 = vpop.permute.xlu0 %2828  ;;  %v5937_v25 = vpop.permute.xlu1 %2876 }
 0x17a   : > { %6980 = vst [vmem:[#allocation68_spill] sm:$0xff] %v5932_v5  ;;  %6981 = vst [vmem:[#allocation69_spill] sm:$0xff] %v5937_v25 }
 0x17b   : > { %2080 = vrot.lane.b32.xlu0 %v4129_v7, %s6914_s0  ;;  %2592 = vrot.lane.b32.xlu1 %v4180_v61, %s6933_s30  ;;  %v4134_v7 = vcombine.low %v5865_v39, %v5728_v49  ;;  %v2643_v61 = vor.u32 %v2642_v37, %v2638_v36  ;;  %v2702_v49 = vrot.slane %v4194_v8, 7  ;;  %v4204_v39 = vcombine.low %v3954_v45, %v5952_v38 }
 0x17c   : > { %v4130_v36 = vcombine.low %v5881_v18, %v5956_v43  ;;  %v2753_v37 = vrot.slane %v2751_v24, 7 }
 0x17d   : > { %v5943_v62 = vpop.permute.xlu0 %2853  ;;  %v5945_v5 = vpop.permute.xlu1 %2878  ;;  %v2811_v8 = vshrl.u32 %v4204_v39, 16 }
 0x17e   : > { %6982 = vst [vmem:[#allocation70_spill] sm:$0xff] %v5943_v62  ;;  %6983 = vst [vmem:[#allocation71_spill] sm:$0xff] %v5945_v5  ;;  %v5959_v5 = vld [vmem:[%s4882_s18 + $0x3c] sm:$0x1]  ;;  %v2754_v62 = vshll.u32 %v4199_v30, 16  ;;  %v4205_v30 = vcombine.low %v3955_v52, %v5969_v16 }
 0x17f   : > { %2680 = vrot.lane.b32.xlu0 %v2672_v21, %s6911_s10  ;;  %2057 = vrot.lane.b32.xlu1 %v2048_v50, %s6913_s16  ;;  %v4190_v50 = vcombine.low %v3948_v15, %v3948_v15  ;;  %v4200_v1 = vcombine.low %v3948_v15, %v5959_v5 }
 0x180   : > { %v2756_v18 = vor.u32 %v2754_v62, %v2753_v37  ;;  %v4135_v62 = vcombine.low %v5902_v60, %v5764_v32  ;;  %v390_v37 = vld [vmem:[%s4882_s18 + $0xc] sm:$0x3]  ;;  %v391_v60 = vld [vmem:[%s4882_s18 + $0x14] sm:$0x3] }
 0x181   : > { %v905_v10 = vpop.permute.xlu0 %904  ;;  %v930_v21 = vpop.permute.xlu1 %929  ;;  %v2673_v45 = vrot.slane %v4190_v50, 7  ;;  %v2758_v24 = vshrl.u32 %v4200_v1, 16 }
 0x183   : > { %2105 = vrot.lane.b32.xlu0 %v4134_v7, %s6915_s20  ;;  %2652 = vrot.lane.b32.xlu1 %v2643_v61, %s6937_s29  ;;  %v1262_v7 = vsel %vm1259_vm0, %v4609_v29, %v5139_v35  ;;  %v4195_v61 = vcombine.low %v3955_v52, %v3955_v52  ;;  %v2813_v52 = vrot.slane %v2811_v8, 7  ;;  %v2760_v50 = vrot.slane %v2758_v24, 7  ;;  %v5996_v24 = vld [vmem:[%s4882_s18 + $0x30] sm:$0xe] }
 0x184   : > { %v1277_v15 = vsel %vm1275_vm1, %v1262_v7, %v5171_v55  ;;  %6985 = vst [vmem:[#allocation72_spill] sm:$0xff] %v5996_v24 }
 0x185   : > { %v955_v25 = vpop.permute.xlu0 %954  ;;  %v1015_v12 = vpop.permute.xlu1 %1014  ;;  %v1288_v9 = vsel %vm1286_vm2, %v1277_v15, %v5203_v31  ;;  %v2703_v55 = vrot.slane %v4195_v61, 7  ;;  %v2818_v31 = vshrl.u32 %v4205_v30, 16  ;;  %v2821_v61 = vshll.u32 %v4205_v30, 16 }
 0x186   : > { %v1299_v29 = vsel %vm1297_vm3, %v1288_v9, %v5230_v63 }
 0x187   : > { %2710 = vrot.lane.b32.xlu0 %v2702_v49, %s6912_s21  ;;  %2082 = vrot.lane.b32.xlu1 %v4130_v36, %s6914_s0  ;;  %v2814_v49 = vshll.u32 %v4204_v39, 16  ;;  %v2761_v36 = vshll.u32 %v4200_v1, 16  ;;  %v1310_v63 = vsel %vm6984_vm4, %v1299_v29, %v5260_v58  ;;  %v4610_v39 = vld [vmem:[%s4882_s18 + $0x8] sm:$0xe]  ;;  %vm6886_vm4 = vcmask 785408  }
 0x188   : > { %v1321_v7 = vsel %vm1319_vm5, %v1310_v63, %v905_v10  ;;  %v4007_v8 = vcombine.low %v4610_v39, %v390_v37 }
 0x189   : > { %v1075_v40 = vpop.permute.xlu0 %1074  ;;  %v1105_v35 = vpop.permute.xlu1 %1104  ;;  %v2816_v32 = vor.u32 %v2814_v49, %v2813_v52  ;;  %v2763_v1 = vor.u32 %v2761_v36, %v2760_v50  ;;  %v1332_v58 = vsel %vm6889_vm6, %v1321_v7, %v930_v21  ;;  %v4209_v49 = vcombine.low %v5996_v24, %v5935_v6  ;;  %v3974_v21 = vld [vmem:[%s4885_s12 + $0x30] sm:$0xe] }
 0x18a   : > { %v1343_v15 = vsel %vm1341_vm7, %v1332_v58, %v955_v25  ;;  %v876_v50 = vshll.u32 %v4007_v8, 16 }
 0x18b   : > { %2682 = vrot.lane.b32.xlu0 %v2673_v45, %s6911_s10  ;;  %2770 = vrot.lane.b32.xlu1 %v2756_v18, %s6943_s19  ;;  %v2820_v18 = vrot.slane %v2818_v31, 7  ;;  %v1354_v36 = vsel %vm6890_vm8, %v1343_v15, %v1015_v12  ;;  %v6010_v31 = vld [vmem:[%s4882_s18 + $0x38] sm:$0xe] }
 0x18c   : > { %6986 = vst [vmem:[#allocation73_spill] sm:$0xff] %v6010_v31  ;;  %v1365_v37 = vsel %vm1363_vm9, %v1354_v36, %v1075_v40  ;;  %v878_v39 = vrot.slane %v876_v50, 2  ;;  %v4210_v12 = vcombine.low %v6010_v31, %v5959_v5  ;;  %v6040_v50 = vld [vmem:[%s4977_s9 + $0x14] sm:$0x1]  ;;  %v404_v36 = vld [vmem:[%s4990_s17 + $0x8] sm:$0xf] }
 0x18d   : > { %v1135_v9 = vpop.permute.xlu0 %1134  ;;  %v1200_v45 = vpop.permute.xlu1 %1199  ;;  %v2823_v30 = vor.u32 %v2821_v61, %v2820_v18  ;;  %v1376_v40 = vsel %vm1374_vm10, %v1365_v37, %v1105_v35  ;;  %v419_v31 = vld [vmem:[%s4977_s9 + $0x8] sm:$0xe] }
 0x18e   : > { %v1387_v61 = vsel %vm6880_vm11, %v1376_v40, %v1135_v9  ;;  %vm6888_vm11 = vcmask 130048  }
 0x18f   : > { %2107 = vrot.lane.b32.xlu0 %v4135_v62, %s6915_s20  ;;  %2712 = vrot.lane.b32.xlu1 %v2703_v55, %s6912_s21  ;;  %v4611_v62 = vld [vmem:[%s4882_s18 + $0x10] sm:$0xe]  ;;  %v873_v55 = vshrl.u32 %v4007_v8, 16  ;;  %v3975_v8 = vld [vmem:[%s4885_s12 + $0x38] sm:$0xe]  ;;  %v1398_v9 = vsel %vm1396_vm12, %v1387_v61, %v1200_v45  ;;  %v4017_v61 = vcombine.low %v404_v36, %v404_v36 }
 0x190   : > { %v4008_v52 = vcombine.low %v4611_v62, %v391_v60  ;;  %v4215_v15 = vcombine.low %v3975_v8, %v5969_v16 }
 0x191   : > { %v1225_v10 = vpop.permute.xlu0 %1224  ;;  %v6000_v29 = vpop.permute.xlu1 %1465  ;;  %v875_v60 = vrot.slane %v873_v55, 1 }
 0x192   : > { %v881_v7 = vshrl.u32 %v4008_v52, 16  ;;  %v884_v6 = vshll.u32 %v4008_v52, 16 }
 0x193   : > { %2830 = vrot.lane.b32.xlu0 %v2816_v32, %s6913_s16  ;;  %2772 = vrot.lane.b32.xlu1 %v2763_v1, %s6943_s19  ;;  %v4214_v32 = vcombine.low %v3974_v21, %v5952_v38  ;;  %v6022_v1 = vld [vmem:[%s4977_s9 + $0xc] sm:$0x1]  ;;  %v397_v38 = vld [vmem:[%s4977_s9 + $0x8] sm:$0xf]  ;;  %v879_v35 = vor.u32 %v878_v39, %v875_v60 }
 0x194   : > { %v4022_v5 = vcombine.low %v397_v38, %v6022_v1  ;;  %v883_v62 = vrot.slane %v881_v7, 1  ;;  %v886_v52 = vrot.slane %v884_v6, 2  ;;  %v4012_v21 = vcombine.low %v397_v38, %v397_v38  ;;  %v398_v7 = vld [vmem:[%s4977_s9 + $0x10] sm:$0xf] }
 0x195   : > { %v1250_v25 = vpop.permute.xlu0 %1249  ;;  %v6013_v63 = vpop.permute.xlu1 %1525  ;;  %v4023_v60 = vcombine.low %v398_v7, %v6040_v50  ;;  %v6052_v39 = vld [vmem:[%s4882_s18 + $0x10] sm:$0xf] }
 0x196   : > { %v989_v6 = vshll.u32 %v4022_v5, 16 }
 0x197   : > { %2855 = vrot.lane.b32.xlu0 %v4209_v49, %s6914_s0  ;;  %2832 = vrot.lane.b32.xlu1 %v2823_v30, %s6913_s16  ;;  %v6036_v49 = vld [vmem:[%s4990_s17 + $0xc] sm:$0x1]  ;;  %v1409_v30 = vsel %vm6881_vm13, %v1398_v9, %v1225_v10  ;;  %v887_v10 = vor.u32 %v886_v52, %v883_v62  ;;  %vm6887_vm13 = vcmask 154624   ;;  %v987_v62 = vshrl.u32 %v4022_v5, 16  ;;  %v4612_v9 = vld [vmem:[%s4882_s18 + $0x14] sm:$0x1] }
 0x198   : > { %v1420_v37 = vsel %vm1418_vm14, %v1409_v30, %v1250_v25  ;;  %v4027_v45 = vcombine.low %v404_v36, %v6036_v49  ;;  %v991_v52 = vrot.slane %v989_v6, 1  ;;  %v4013_v30 = vcombine.low %v398_v7, %v398_v7  ;;  %v6077_v5 = vld [vmem:[%s4882_s18 + $0x18] sm:$0xf] }
 0x199   : > { %v6025_v18 = vpop.permute.xlu0 %1467  ;;  %v6028_v58 = vpop.permute.xlu1 %1585 }
 0x19a   : > { %6987 = vst [vmem:[#allocation74_spill] sm:$0xff] %v6025_v18  ;;  %v992_v7 = vor.u32 %v991_v52, %v987_v62  ;;  %v424_v52 = vld [vmem:[%s4990_s17 + $0x8] sm:$0xe] }
 0x19b   : > { %2880 = vrot.lane.b32.xlu0 %v4214_v32, %s6915_s20  ;;  %2857 = vrot.lane.b32.xlu1 %v4210_v12, %s6914_s0  ;;  %v6055_v12 = vld [vmem:[%s4990_s17 + $0x14] sm:$0x1] }
 0x19d   : > { %v3070_v55 = vpop.permute.xlu0 %3069  ;;  %v3090_v16 = vpop.permute.xlu1 %3089 }
 0x19e   : > { %v3166_v32 = vsel %vm3164_vm15, %v1420_v37, %v3070_v55  ;;  %v4057_v55 = vcombine.low %v6052_v39, %v4612_v9  ;;  %v996_v37 = vshll.u32 %v4023_v60, 16 }
 0x19f   : > { %2882 = vrot.lane.b32.xlu0 %v4215_v15, %s6915_s20  ;;  %906 = vrot.lane.b32.xlu1 %v879_v35, %s6927_s11  ;;  %v3177_v38 = vsel %vm6886_vm4, %v3166_v32, %v3090_v16  ;;  %v405_v15 = vld [vmem:[%s4990_s17 + $0x10] sm:$0xf]  ;;  %v1049_v35 = vshll.u32 %v4027_v45, 16  ;;  %v994_v32 = vshrl.u32 %v4023_v60, 16  ;;  %vm6991_vm4 = vcmask 121856  }
 0x1a0   : > { %v4028_v36 = vcombine.low %v405_v15, %v6055_v12  ;;  %v998_v9 = vrot.slane %v996_v37, 1 }
 0x1a1   : > { %v3155_v25 = vpop.permute.xlu0 %3154  ;;  %v6057_v8 = vpop.permute.xlu1 %1527 }
 0x1a2   : > { %6988 = vst [vmem:[#allocation75_spill] sm:$0xff] %v6057_v8  ;;  %v3193_v40 = vsel %vm6888_vm11, %v3090_v16, %v3155_v25  ;;  %v6073_v16 = vld [vmem:[%s6830_s4 + $0x38] sm:$0xff]   ;;  %v1051_v25 = vrot.slane %v1049_v35, 1  ;;  %v429_v8 = vld [vmem:[%s4977_s9 + $0xc] sm:$0x3]  ;;  %vm7054_vm11 = vcmask 121856  }
 0x1a3   : > { %931 = vrot.lane.b32.xlu0 %v4012_v21, %s6910_s13  ;;  %4233 = vmatprep.mubr.msk.bf16.mxu0 %vm6887_vm13, %v3193_v40  ;;  %6989 = vst [vmem:[#allocation76_spill] sm:$0xff] %v6073_v16  ;;  %v2114_v40 = vsel %vm1259_vm0, %v4057_v55, %v5488_v11  ;;  %v4042_v62 = vcombine.low %v419_v31, %v429_v8  ;;  %vm7003_vm13 = vcmask 121856  }
 0x1a4   : > { %908 = vrot.lane.b32.xlu1 %v887_v10, %s6927_s11  ;;  %3345 = vmatmul.mubr.bf16.vlgmr.msra.gmra.mxu0 %v3177_v38  ;;  %v1047_v10 = vshrl.u32 %v4027_v45, 16  ;;  %v4018_v38 = vcombine.low %v405_v15, %v405_v15  ;;  %v6095_v45 = vld [vmem:[%s6830_s4 + $0x30] sm:$0xff]   ;;  %v2127_v60 = vsel %vm1275_vm1, %v2114_v40, %v5490_v13  ;;  %v4032_v15 = vcombine.low %v419_v31, %v6022_v1  ;;  %v6120_v1 = vld [vmem:[%s6830_s4 + $0x28] sm:$0xff]  }
 0x1a5   : > { %v6068_v21 = vpop.permute.xlu0 %1615  ;;  %3411 = vmatpush1.bf16.msra.mxu0 %v6073_v16  ;;  %v6079_v6 = vpop.permute.xlu1 %1587  ;;  %v1056_v16 = vshll.u32 %v4028_v36, 16  ;;  %v2137_v35 = vsel %vm1286_vm2, %v2127_v60, %v5508_v51  ;;  %v999_v55 = vor.u32 %v998_v9, %v994_v32  ;;  %v420_v31 = vld [vmem:[%s4977_s9 + $0x10] sm:$0xe]  ;;  %v1168_v40 = vshrl.u32 %v4042_v62, 16  ;;  %v4618_v60 = vld [vmem:[%s4882_s18 + $0x20] sm:$0xe] }
 0x1a6   : > { %6990 = vst [vmem:[#allocation77_spill] sm:$0xff] %v6079_v6  ;;  %3412 = vmatprep.subr.bf16.mxu0 %v6944_v0  ;;  %v4614_v6 = vld [vmem:[%s4882_s18 + $0x1c] sm:$0x1]  ;;  %v6124_v51 = vld [vmem:[%s4885_s12 + $0x10] sm:$0xf]  ;;  %v1100_v32 = vrot.slane %v4032_v15, 1  ;;  %v6992_v15 = vcombine.low %v5075_v26, %v5078_v27  ;;  %v4139_v27 = vcombine.low %v5709_v34, %v5919_v42 }
 0x1a7   : > { %956 = vrot.lane.b32.xlu0 %v4017_v61, %s6933_s30  ;;  %v4058_v18 = vcombine.low %v6077_v5, %v4614_v6  ;;  %v1052_v61 = vor.u32 %v1051_v25, %v1047_v10  ;;  %v1058_v37 = vrot.slane %v1056_v16, 1  ;;  %v430_v6 = vld [vmem:[%s4977_s9 + $0x14] sm:$0x3]  ;;  %v4052_v8 = vcombine.low %v6124_v51, %v6124_v51  ;;  %v7037_v51 = vld [vmem:[#allocation66_spill] sm:$0xff] }
 0x1a8   : > { %933 = vrot.lane.b32.xlu1 %v4013_v30, %s6910_s13  ;;  %v1054_v30 = vshrl.u32 %v4028_v36, 16  ;;  %v3977_v36 = vld [vmem:[%s4882_s18 + $0x24] sm:$0x3]  ;;  %v4037_v16 = vcombine.low %v424_v52, %v6036_v49  ;;  %v4043_v25 = vcombine.low %v420_v31, %v430_v6  ;;  %v4033_v49 = vcombine.low %v420_v31, %v6040_v50 }
 0x1a9   : > { %v6090_v24 = vpop.permute.xlu0 %1675  ;;  %3413 = vmatpush1.bf16.msra.mxu0 %v6095_v45  ;;  %v6098_v11 = vpop.permute.xlu1 %2300  ;;  %v2117_v13 = vsel %vm1259_vm0, %v4058_v18, %v5506_v48  ;;  %v6145_v52 = vcombine.low %v4618_v60, %v3977_v36  ;;  %v6160_v50 = vld [vmem:[%s6830_s4 + $0x20] sm:$0xff]   ;;  %v7001_v60 = vld [vmem:[#allocation39_spill] sm:$0xff] }
 0x1aa   : > { %3414 = vmatprep.subr.bf16.mxu0 %v6944_v0  ;;  %v2129_v48 = vsel %vm1275_vm1, %v2117_v13, %v5536_v47  ;;  %v1179_v6 = vshll.u32 %v4043_v25, 16  ;;  %v1101_v34 = vrot.slane %v4033_v49, 1  ;;  %v6994_v31 = vld [vmem:[#allocation17_spill] sm:$0xff] }
 0x1ab   : > { %1016 = vrot.lane.b32.xlu0 %v992_v7, %s6937_s29  ;;  %v2147_v7 = vsel %vm1297_vm3, %v2137_v35, %v5538_v41  ;;  %v2139_v9 = vsel %vm1286_vm2, %v2129_v48, %v5569_v54  ;;  %v2889_v54 = vsel %vm1259_vm0, %v6992_v15, %v5605_v33  ;;  %v425_v35 = vld [vmem:[%s4990_s17 + $0x10] sm:$0xe]  ;;  %v7002_v15 = vld [vmem:[#allocation37_spill] sm:$0xff] }
 0x1ac   : > { %958 = vrot.lane.b32.xlu1 %v4018_v38, %s6933_s30  ;;  %v2157_v41 = vsel %vm6991_vm4, %v2147_v7, %v5574_v22  ;;  %v1171_v38 = vshll.u32 %v4042_v62, 16  ;;  %v1059_v22 = vor.u32 %v1058_v37, %v1054_v30  ;;  %v1176_v37 = vshrl.u32 %v4043_v25, 16  ;;  %v6993_v7 = vld [vmem:[#allocation16_spill] sm:$0xff]  ;;  %v6997_v25 = vld [vmem:[#allocation47_spill] sm:$0xff] }
 0x1ad   : > { %v6114_v10 = vpop.permute.xlu0 %1617  ;;  %3415 = vmatpush1.bf16.msra.mxu0 %v6120_v1  ;;  %v6133_v18 = vpop.permute.xlu1 %1735  ;;  %v2167_v47 = vsel %vm1319_vm5, %v2157_v41, %v5636_v28  ;;  %v4038_v42 = vcombine.low %v425_v35, %v6055_v12  ;;  %v6995_v36 = vcombine.low %v6993_v7, %v6994_v31  ;;  %v6195_v12 = vld [vmem:[%s6830_s4 + $0x18] sm:$0xff]   ;;  %v7009_v7 = vld [vmem:[#allocation42_spill] sm:$0xff]  ;;  %v7010_v31 = vld [vmem:[#allocation49_spill] sm:$0xff] }
 0x1ae   : > { %3416 = vmatprep.subr.bf16.mxu0 %v6944_v0  ;;  %v2177_v28 = vsel %vm6889_vm6, %v2167_v47, %v5671_v2  ;;  %v1130_v2 = vrot.slane %v4037_v16, 1  ;;  %v1173_v30 = vrot.slane %v1171_v38, 2  ;;  %v6996_v16 = vld [vmem:[#allocation43_spill] sm:$0xff] }
 0x1af   : > { %1076 = vrot.lane.b32.xlu0 %v1052_v61, %s6911_s10  ;;  %v2149_v61 = vsel %vm1297_vm3, %v2139_v9, %v5611_v14  ;;  %v2902_v14 = vsel %vm1275_vm1, %v2889_v54, %v5649_v20  ;;  %v2187_v26 = vsel %vm1341_vm7, %v2177_v28, %v5701_v19  ;;  %v2892_v48 = vsel %vm1259_vm0, %v6995_v36, %v5684_v53  ;;  %v6999_v47 = vld [vmem:[#allocation35_spill] sm:$0xff]  ;;  %v7004_v28 = vld [vmem:[#allocation36_spill] sm:$0xff] }
 0x1b0   : > { %1018 = vrot.lane.b32.xlu1 %v999_v55, %s6937_s29  ;;  %v1170_v55 = vrot.slane %v1168_v40, 1  ;;  %v2159_v20 = vsel %vm6991_vm4, %v2149_v61, %v5667_v17  ;;  %v2197_v19 = vsel %vm6890_vm8, %v2187_v26, %v5731_v46  ;;  %v2912_v13 = vsel %vm1286_vm2, %v2902_v14, %v5686_v56 }
 0x1b1   : > { %v2361_v62 = vpop.permute.xlu0 %2360  ;;  %3417 = vmatpush1.bf16.msra.mxu0 %v6160_v50  ;;  %v6169_v33 = vpop.permute.xlu1 %1677  ;;  %v2169_v17 = vsel %vm1319_vm5, %v2159_v20, %v5696_v57  ;;  %v2207_v46 = vsel %vm1363_vm9, %v2197_v19, %v5754_v44  ;;  %v2922_v56 = vsel %vm1297_vm3, %v2912_v13, %v5717_v4  ;;  %v2904_v53 = vsel %vm1275_vm1, %v2892_v48, %v5712_v59  ;;  %v7008_v20 = vld [vmem:[#allocation45_spill] sm:$0xff] }
 0x1b2   : > { %3418 = vmatprep.subr.bf16.mxu0 %v6944_v0  ;;  %v2217_v57 = vsel %vm1374_vm10, %v2207_v46, %v6996_v16  ;;  %v2895_v44 = vsel %vm1259_vm0, %v4139_v27, %v6098_v11  ;;  %vm6998_vm4 = vcmask 293888   ;;  %v1174_v38 = vor.u32 %v1173_v30, %v1170_v55  ;;  %v7007_v30 = vld [vmem:[#allocation41_spill] sm:$0xff]  ;;  %v7011_v46 = vld [vmem:[#allocation40_spill] sm:$0xff] }
 0x1b3   : > { %1106 = vrot.lane.b32.xlu0 %v1100_v32, %s6912_s21  ;;  %v2227_v40 = vsel %vm6998_vm4, %v2217_v57, %v6997_v25  ;;  %v1178_v9 = vrot.slane %v1176_v37, 1  ;;  %v1181_v4 = vrot.slane %v1179_v6, 2  ;;  %v2179_v59 = vsel %vm6889_vm6, %v2169_v17, %v6999_v47  ;;  %v7013_v16 = vld [vmem:[#allocation53_spill] sm:$0xff] }
 0x1b4   : > { %1078 = vrot.lane.b32.xlu1 %v1059_v22, %s6911_s10  ;;  %v7000_v22 = vld [vmem:[#allocation51_spill] sm:$0xff]  ;;  %v4140_v11 = vcombine.low %v7001_v60, %v5956_v43  ;;  %v1131_v61 = vrot.slane %v4038_v42, 1  ;;  %v2932_v54 = vsel %vm7003_vm13, %v2922_v56, %v7002_v15  ;;  %v2914_v35 = vsel %vm1286_vm2, %v2904_v53, %v7004_v28  ;;  %v7006_v43 = vld [vmem:[#allocation38_spill] sm:$0xff] }
 0x1b5   : > { %v6190_v41 = vpop.permute.xlu0 %1760  ;;  %3419 = vmatpush1.bf16.msra.mxu0 %v6195_v12  ;;  %v2303_v32 = vpop.permute.xlu1 %2302  ;;  %v2237_v49 = vsel %vm1396_vm12, %v2227_v40, %v7000_v22  ;;  %vm7005_vm4 = vcmask 343040   ;;  %v2906_v26 = vsel %vm1275_vm1, %v2895_v44, %v2361_v62  ;;  %v2189_v55 = vsel %vm1341_vm7, %v2179_v59, %v7006_v43  ;;  %v7012_v53 = vld [vmem:[#allocation46_spill] sm:$0xff] }
 0x1b6   : > { %3420 = vmatprep.subr.bf16.mxu0 %v6944_v0  ;;  %v2247_v14 = vsel %vm7005_vm4, %v2237_v49, %v5849_v23  ;;  %v2942_v37 = vsel %vm1319_vm5, %v2932_v54, %v7007_v30  ;;  %v4047_v42 = vcombine.low %v6052_v39, %v6052_v39  ;;  %v3123_v13 = vshrl.u32 %v6145_v52, 16  ;;  %v7017_v49 = vld [vmem:[#allocation54_spill] sm:$0xff]  ;;  %v392_v30 = vld [vmem:[%s4882_s18 + $0x1c] sm:$0x3] }
 0x1b7   : > { %1136 = vrot.lane.b32.xlu0 %v1130_v2, %s6943_s19  ;;  %v6227_v2 = vld [vmem:[%s6830_s4 + $0x10] sm:$0xff]   ;;  %v6236_v6 = vsel %vm1418_vm14, %v2247_v14, %v5869_v3  ;;  %v2952_v19 = vsel %vm6889_vm6, %v2942_v37, %v7008_v20  ;;  %v2199_v3 = vsel %vm6890_vm8, %v2189_v55, %v7009_v7  ;;  %v2898_v48 = vsel %vm1259_vm0, %v4140_v11, %v2303_v32  ;;  %v6267_v32 = vld [vmem:[%s6830_s4 + $0x8] sm:$0xff]   ;;  %v7024_v37 = vld [vmem:[#allocation52_spill] sm:$0xff] }
 0x1b8   : > { %1108 = vrot.lane.b32.xlu1 %v1101_v34, %s6912_s21  ;;  %v1182_v34 = vor.u32 %v1181_v4, %v1178_v9  ;;  %v2962_v36 = vsel %vm1341_vm7, %v2952_v19, %v7010_v31  ;;  %v3126_v17 = vshll.u32 %v6145_v52, 16  ;;  %v2924_v56 = vsel %vm1297_vm3, %v2914_v35, %v7011_v46  ;;  %v7014_v52 = vld [vmem:[#allocation44_spill] sm:$0xff]  ;;  %v7019_v11 = vld [vmem:[#allocation59_spill] sm:$0xff]  ;;  %v3978_v28 = vld [vmem:[%s4882_s18 + $0x2c] sm:$0x3] }
 0x1b9   : > { %v2391_v27 = vpop.permute.xlu0 %2390  ;;  %3421 = vmatpush1.bf16.msra.mxu0 %v6227_v2  ;;  %v6238_v23 = vpop.permute.xlu1 %1737  ;;  %v2209_v39 = vsel %vm1363_vm9, %v2199_v3, %v7012_v53  ;;  %v2972_v57 = vsel %vm6890_vm8, %v2962_v36, %v7013_v16  ;;  %v3047_v44 = vshll.u32 %v6236_v6, 16  ;;  %v2934_v40 = vsel %vm7003_vm13, %v2924_v56, %v7014_v52  ;;  %v7016_v4 = vld [vmem:[#allocation56_spill] sm:$0xff]  ;;  %v7027_v7 = vld [vmem:[#allocation65_spill] sm:$0xff]  ;;  %v7030_v56 = vld [vmem:[#allocation67_spill] sm:$0xff] }
 0x1ba   : > { %v2916_v62 = vsel %vm1286_vm2, %v2906_v26, %v2391_v27  ;;  %3422 = vmatprep.subr.bf16.mxu0 %v6944_v0  ;;  %v2982_v47 = vsel %vm1363_vm9, %v2972_v57, %v7016_v4  ;;  %v4048_v22 = vcombine.low %v6077_v5, %v6077_v5  ;;  %vm7018_vm4 = vcmask 293888   ;;  %v7020_v35 = vld [vmem:[#allocation48_spill] sm:$0xff]  ;;  %v7021_v26 = vld [vmem:[#allocation57_spill] sm:$0xff]  ;;  %v7022_v27 = vld [vmem:[#allocation62_spill] sm:$0xff] }
 0x1bb   : > { %1201 = vrot.lane.b32.xlu0 %v1174_v38, %s6913_s16  ;;  %v7015_v38 = vld [vmem:[#allocation50_spill] sm:$0xff]  ;;  %v6285_v54 = vrot.slane %v3123_v13, 1  ;;  %v2944_v14 = vsel %vm1319_vm5, %v2934_v40, %v7020_v35  ;;  %vm7023_vm13 = vmmov %vm7018_vm4  ;;  %v3128_v55 = vrot.slane %v3126_v17, 2  ;;  %v3049_v19 = vrot.slane %v3047_v44, 1  ;;  %v6305_v36 = vld [vmem:[%s6830_s4] sm:$0xff]  }
 0x1bc   : > { %1138 = vrot.lane.b32.xlu1 %v1131_v61, %s6943_s19  ;;  %v2219_v9 = vsel %vm1374_vm10, %v2209_v39, %v7015_v38  ;;  %v2992_v61 = vsel %vm1374_vm10, %v2982_v47, %v7019_v11  ;;  %v2954_v20 = vsel %vm6889_vm6, %v2944_v14, %v7024_v37  ;;  %v7029_v17 = vld [vmem:[#allocation63_spill] sm:$0xff]  ;;  %v4624_v57 = vld [vmem:[%s4882_s18 + $0x28] sm:$0xe]  ;;  %v3045_v52 = vshrl.u32 %v6236_v6, 16  ;;  %v7035_v11 = vld [vmem:[#allocation64_spill] sm:$0xff] }
 0x1bd   : > { %v6262_v25 = vpop.permute.xlu0 %1785  ;;  %3423 = vmatpush1.bf16.msra.mxu0 %v6267_v32  ;;  %v2363_v59 = vpop.permute.xlu1 %2362  ;;  %v2229_v60 = vsel %vm7018_vm4, %v2219_v9, %v7017_v49  ;;  %v3002_v43 = vsel %vm7023_vm13, %v2992_v61, %v7022_v27  ;;  %vm7026_vm4 = vcmask 343040   ;;  %v4218_v44 = vcombine.low %v4624_v57, %v3978_v28  ;;  %v7032_v40 = vld [vmem:[#allocation58_spill] sm:$0xff]  ;;  %v7033_v9 = vld [vmem:[#allocation69_spill] sm:$0xff]  ;;  %v7039_v27 = vld [vmem:[#allocation68_spill] sm:$0xff] }
 0x1be   : > { %3424 = vmatprep.subr.bf16.mxu0 %v6944_v0  ;;  %v2908_v15 = vsel %vm1275_vm1, %v2898_v48, %v2363_v59  ;;  %v2239_v5 = vsel %vm1396_vm12, %v2229_v60, %v7021_v26  ;;  %v3012_v3 = vsel %vm1396_vm12, %v3002_v43, %v7027_v7  ;;  %vm7031_vm13 = vmmov %vm7026_vm4  ;;  %v7034_v59 = vld [vmem:[#allocation61_spill] sm:$0xff]  ;;  %v3050_v6 = vor.u32 %v3049_v19, %v3045_v52  ;;  %v7036_v35 = vld [vmem:[#allocation34_spill] sm:$0xff] }
 0x1bf   : > { %1226 = vrot.lane.b32.xlu0 %v4047_v42, %s6914_s0  ;;  %v7025_v42 = vld [vmem:[#allocation60_spill] sm:$0xff]  ;;  %v3022_v53 = vsel %vm7031_vm13, %v3012_v3, %v7030_v56  ;;  %v3131_v37 = vshrl.u32 %v4218_v44, 16  ;;  %v7041_v3 = vld [vmem:[#allocation70_spill] sm:$0xff] }
 0x1c0   : > { %1203 = vrot.lane.b32.xlu1 %v1182_v34, %s6913_s16  ;;  %v2249_v13 = vsel %vm7026_vm4, %v2239_v5, %v7025_v42  ;;  %v7028_v34 = vld [vmem:[#allocation55_spill] sm:$0xff]  ;;  %v3032_v4 = vsel %vm1418_vm14, %v3022_v53, %v7033_v9  ;;  %vm7038_vm4 = vcmask 293888   ;;  %v3129_v5 = vor.u32 %v3128_v55, %v6285_v54  ;;  %v388_v9 = vld [vmem:[%s4885_s12 + $0x20] sm:$0xe] }
 0x1c1   : > { %v2421_v31 = vpop.permute.xlu0 %2420  ;;  %3425 = vmatpush1.bf16.msra.mxu0 %v6305_v36  ;;  %v2964_v48 = vsel %vm1341_vm7, %v2954_v20, %v7028_v34  ;;  %v2259_v46 = vsel %vm1418_vm14, %v2249_v13, %v7029_v17  ;;  %v6314_v39 = vpop.permute.xlu1 %1762  ;;  %v3085_v14 = vrot.slane %v3032_v4, 1  ;;  %v3134_v20 = vshll.u32 %v4218_v44, 16  ;;  %v4626_v13 = vld [vmem:[%s4885_s12 + $0x18] sm:$0xf]  ;;  %v4628_v34 = vld [vmem:[%s4882_s18 + $0x20] sm:$0xe] }
 0x1c2   : > { %v6317_v16 = vsel %vm1297_vm3, %v2916_v62, %v2421_v31  ;;  %3438 = vmatprep.subr.bf16.mxu0 %v6944_v0  ;;  %v2974_v38 = vsel %vm6890_vm8, %v2964_v48, %v7032_v40  ;;  %v4625_v62 = vld [vmem:[%s4882_s18 + $0x18] sm:$0xe]  ;;  %v3053_v60 = vshll.u32 %v2259_v46, 16  ;;  %v4053_v7 = vcombine.low %v4626_v13, %v4626_v13  ;;  %v7042_v53 = vld [vmem:[#allocation71_spill] sm:$0xff] }
 0x1c3   : > { %1251 = vrot.lane.b32.xlu0 %v4052_v8, %s6915_s20  ;;  %v4009_v47 = vcombine.low %v4625_v62, %v392_v30  ;;  %v2984_v49 = vsel %vm1363_vm9, %v2974_v38, %v7034_v59  ;;  %v3051_v56 = vshrl.u32 %v2259_v46, 16  ;;  %v3133_v44 = vrot.slane %v3131_v37, 1 }
 0x1c4   : > { %1228 = vrot.lane.b32.xlu1 %v4048_v22, %s6914_s0  ;;  %v2994_v61 = vsel %vm1374_vm10, %v2984_v49, %v7035_v11  ;;  %v393_v22 = vld [vmem:[%s4882_s18 + $0x24] sm:$0x3]  ;;  %v3055_v55 = vrot.slane %v3053_v60, 1  ;;  %v3136_v52 = vrot.slane %v3134_v20, 2  ;;  %v399_v11 = vld [vmem:[%s4977_s9 + $0x18] sm:$0xf] }
 0x1c5   : > { %v6336_v28 = vpop.permute.xlu0 %1845  ;;  %3439 = vmatpush2.bf16.msra.mxu0 %v7036_v35  ;;  %v3004_v8 = vsel %vm7038_vm4, %v2994_v61, %v7037_v51  ;;  %v2393_v26 = vpop.permute.xlu1 %2392  ;;  %v889_v19 = vshrl.u32 %v4009_v47, 16  ;;  %v892_v42 = vshll.u32 %v4009_v47, 16  ;;  %v4010_v48 = vcombine.low %v4628_v34, %v393_v22  ;;  %v6374_v47 = vld [vmem:[%s4977_s9 + $0x1c] sm:$0x1]  ;;  %v4629_v61 = vld [vmem:[%s4885_s12 + $0x24] sm:$0x1] }
 0x1c6   : > { %3440 = vmatprep.subr.bf16.mxu0 %v6944_v0  ;;  %v3014_v43 = vsel %vm1396_vm12, %v3004_v8, %v7039_v27  ;;  %v6347_v30 = vsel %vm1286_vm2, %v2908_v15, %v2393_v26  ;;  %v6359_v15 = vld [vmem:[%s6830_s4 + $0x40] sm:$0xff]   ;;  %v3056_v4 = vor.u32 %v3055_v55, %v3051_v56  ;;  %v3137_v60 = vor.u32 %v3136_v52, %v3133_v44  ;;  %v406_v20 = vld [vmem:[%s4990_s17 + $0x18] sm:$0xf] }
 0x1c7   : > { %3071 = vrot.lane.b32.xlu0 %v3050_v6, %s7040_s1  ;;  %v3024_v54 = vsel %vm7031_vm13, %v3014_v43, %v7041_v3  ;;  %v891_v40 = vrot.slane %v889_v19, 1  ;;  %v894_v38 = vrot.slane %v892_v42, 2  ;;  %v897_v49 = vshrl.u32 %v4010_v48, 16  ;;  %v400_v55 = vld [vmem:[%s4977_s9 + $0x20] sm:$0xf] }
 0x1c8   : > { %3091 = vrot.lane.b32.xlu1 %v3085_v14, %s4750_s15  ;;  %v3034_v57 = vsel %vm1418_vm14, %v3024_v54, %v7042_v53  ;;  %v900_v6 = vshll.u32 %v4010_v48, 16  ;;  %v4005_v51 = vcombine.low %v388_v9, %v4629_v61  ;;  %v4024_v14 = vcombine.low %v399_v11, %v6374_v47  ;;  %v6406_v52 = vld [vmem:[%s4990_s17 + $0x24] sm:$0x1]  ;;  %v407_v9 = vld [vmem:[%s4990_s17 + $0x20] sm:$0xf] }
 0x1c9   : > { %v6354_v31 = vpop.permute.xlu0 %2480  ;;  %3441 = vmatpush2.bf16.msra.mxu0 %v6359_v15  ;;  %v6363_v17 = vpop.permute.xlu1 %1787  ;;  %v3086_v46 = vrot.slane %v3034_v57, 1  ;;  %v895_v8 = vor.u32 %v894_v38, %v891_v40  ;;  %v899_v27 = vrot.slane %v897_v49, 1  ;;  %v4014_v19 = vcombine.low %v399_v11, %v399_v11  ;;  %v421_v49 = vld [vmem:[%s4977_s9 + $0x18] sm:$0xe] }
 0x1ca   : > { %3504 = vmatprep.subr.bf16.mxu0 %v6944_v0  ;;  %v902_v43 = vrot.slane %v900_v6, 2  ;;  %v838_v37 = vrot.slane %v4005_v51, 1  ;;  %v1003_v13 = vshll.u32 %v4024_v14, 16  ;;  %v4019_v56 = vcombine.low %v406_v20, %v406_v20  ;;  %v6418_v51 = vld [vmem:[%s4882_s18 + $0x20] sm:$0xf] }
 0x1cb   : > { %3156 = vrot.lane.b32.xlu0 %v3129_v5, %s4751_s26  ;;  %v6386_v5 = vld [vmem:[%s4990_s17 + $0x1c] sm:$0x1]  ;;  %v1001_v53 = vshrl.u32 %v4024_v14, 16  ;;  %vm7043_vm4 = vcmask 121856   ;;  %vm7045_vm13 = vcmask 293888  }
 0x1cc   : > { %1253 = vrot.lane.b32.xlu1 %v4053_v7, %s6915_s20  ;;  %v4029_v42 = vcombine.low %v406_v20, %v6386_v5  ;;  %v6395_v7 = vld [vmem:[%s4977_s9 + $0x24] sm:$0x1]  ;;  %v903_v34 = vor.u32 %v902_v43, %v899_v27  ;;  %v1005_v57 = vrot.slane %v1003_v13, 1  ;;  %v431_v14 = vld [vmem:[%s4977_s9 + $0x1c] sm:$0x3]  ;;  %v4034_v43 = vcombine.low %v421_v49, %v6374_v47 }
 0x1cd   : > { %v6371_v62 = vpop.permute.xlu0 %1905  ;;  %v6376_v59 = vpop.permute.xlu1 %2422  ;;  %v4025_v48 = vcombine.low %v400_v55, %v6395_v7 }
 0x1ce   : > { %v1063_v44 = vshll.u32 %v4029_v42, 16  ;;  %v1061_v11 = vshrl.u32 %v4029_v42, 16  ;;  %v1102_v47 = vrot.slane %v4034_v43, 1 }
 0x1cf   : > { %3073 = vrot.lane.b32.xlu0 %v3056_v4, %s7040_s1  ;;  %v4015_v4 = vcombine.low %v400_v55, %v400_v55  ;;  %v1010_v6 = vshll.u32 %v4025_v48, 16  ;;  %v1008_v20 = vshrl.u32 %v4025_v48, 16  ;;  %v4630_v55 = vld [vmem:[%s4882_s18 + $0x24] sm:$0x1] }
 0x1d0   : > { %3093 = vrot.lane.b32.xlu1 %v3086_v46, %s4750_s15  ;;  %v4030_v46 = vcombine.low %v407_v9, %v6406_v52  ;;  %v1065_v61 = vrot.slane %v1063_v44, 1  ;;  %v4059_v42 = vcombine.low %v6418_v51, %v4630_v55 }
 0x1d1   : > { %v6383_v26 = vpop.permute.xlu0 %2540  ;;  %v6388_v22 = vpop.permute.xlu1 %1847 }
 0x1d2   : > { %v1070_v13 = vshll.u32 %v4030_v46, 16  ;;  %v2120_v55 = vsel %vm1259_vm0, %v4059_v42, %v6000_v29 }
 0x1d3   : > { %3158 = vrot.lane.b32.xlu0 %v3137_v60, %s4751_s26  ;;  %v1006_v60 = vor.u32 %v1005_v57, %v1001_v53  ;;  %v426_v57 = vld [vmem:[%s4990_s17 + $0x18] sm:$0xe]  ;;  %v2131_v43 = vsel %vm1275_vm1, %v2120_v55, %v6013_v63 }
 0x1d4   : > { %910 = vrot.lane.b32.xlu1 %v895_v8, %s6927_s11 }
 0x1d5   : > { %v6397_v3 = vpop.permute.xlu0 %1935  ;;  %v6399_v54 = vpop.permute.xlu1 %2482 }
 0x1d7   : > { %847 = vrot.lane.b32.xlu0 %v838_v37, %s6922_s3  ;;  %v4020_v37 = vcombine.low %v407_v9, %v407_v9  ;;  %v1068_v9 = vshrl.u32 %v4030_v46, 16 }
 0x1d8   : > { %935 = vrot.lane.b32.xlu1 %v4014_v19, %s6910_s13  ;;  %v1012_v19 = vrot.slane %v1010_v6, 1  ;;  %v422_v6 = vld [vmem:[%s4977_s9 + $0x20] sm:$0xe] }
 0x1d9   : > { %v6408_v40 = vpop.permute.xlu0 %2565  ;;  %v6410_v38 = vpop.permute.xlu1 %1907 }
 0x1da   : > { %v1013_v48 = vor.u32 %v1012_v19, %v1008_v20 }
 0x1db   : > { %912 = vrot.lane.b32.xlu0 %v903_v34, %s6927_s11  ;;  %v1066_v34 = vor.u32 %v1065_v61, %v1061_v11  ;;  %v432_v61 = vld [vmem:[%s4977_s9 + $0x24] sm:$0x3]  ;;  %s4240_s9 = sshll.u32 %s4718_s28, 2 }
 0x1dc   : > { %960 = vrot.lane.b32.xlu1 %v4019_v56, %s6933_s30  ;;  %v4044_v56 = vcombine.low %v421_v49, %v431_v14  ;;  %v4752_v14 = vmov 0.0   ;;  %v4045_v20 = vcombine.low %v422_v6, %v432_v61 }
 0x1dd   : > { %v6420_v8 = vpop.permute.xlu0 %1995  ;;  %v6423_v27 = vpop.permute.xlu1 %2542  ;;  %3235 = vst [vmem:[#allocation2] sm:$0xff] %v4752_v14  ;;  %3236 = vst [vmem:[#allocation2 + $0x8] sm:$0x1] %v4752_v14 }
 0x1de   : > { %v1184_v49 = vshrl.u32 %v4044_v56, 16  ;;  %v1187_v11 = vshll.u32 %v4044_v56, 16  ;;  %3237 = vst [vmem:[#allocation2 + $0x10] sm:$0xff] %v4752_v14  ;;  %3238 = vst [vmem:[#allocation2 + $0x18] sm:$0x1] %v4752_v14 }
 0x1df   : > { %937 = vrot.lane.b32.xlu0 %v4015_v4, %s6910_s13  ;;  %v1072_v4 = vrot.slane %v1070_v13, 1  ;;  %3239 = vst [vmem:[#allocation2 + $0x20] sm:$0xff] %v4752_v14  ;;  %3240 = vst [vmem:[#allocation2 + $0x28] sm:$0x1] %v4752_v14 }
 0x1e0   : > { %1020 = vrot.lane.b32.xlu1 %v1006_v60, %s6937_s29  ;;  %v4039_v60 = vcombine.low %v426_v57, %v6386_v5  ;;  %3241 = vst [vmem:[#allocation2 + $0x30] sm:$0xff] %v4752_v14  ;;  %3242 = vst [vmem:[#allocation2 + $0x38] sm:$0x1] %v4752_v14  ;;  %v4035_v5 = vcombine.low %v422_v6, %v6395_v7  ;;  %v1186_v13 = vrot.slane %v1184_v49, 1  ;;  %v1189_v42 = vrot.slane %v1187_v11, 2 }
 0x1e1   : > { %v6430_v53 = vpop.permute.xlu0 %2590  ;;  %v6433_v44 = vpop.permute.xlu1 %1937  ;;  %3243 = vst [vmem:[#allocation2 + $0x40] sm:$0xff] %v4752_v14  ;;  %3244 = vst [vmem:[#allocation2 + $0x48] sm:$0x1] %v4752_v14  ;;  %v2141_v7 = vsel %vm1286_vm2, %v2131_v43, %v6028_v58  ;;  %v3979_v58 = vld [vmem:[%s4882_s18 + $0x34] sm:$0x3]  ;;  %v7044_v43 = vld [vmem:[#allocation72_spill] sm:$0xff] }
 0x1e2   : > { %v1132_v19 = vrot.slane %v4039_v60, 1  ;;  %v1103_v63 = vrot.slane %v4035_v5, 1  ;;  %v1190_v55 = vor.u32 %v1189_v42, %v1186_v13  ;;  %v3792_v60 = vld [vmem:[%s4882_s18 + $0x28] sm:$0xf] }
 0x1e3   : > { %962 = vrot.lane.b32.xlu0 %v4020_v37, %s6933_s30  ;;  %v1073_v37 = vor.u32 %v1072_v4, %v1068_v9  ;;  %v1192_v9 = vshrl.u32 %v4045_v20, 16  ;;  %v1195_v4 = vshll.u32 %v4045_v20, 16  ;;  %v4631_v20 = vld [vmem:[%s4882_s18 + $0x2c] sm:$0x1] }
 0x1e4   : > { %1080 = vrot.lane.b32.xlu1 %v1066_v34, %s6911_s10  ;;  %v427_v34 = vld [vmem:[%s4990_s17 + $0x20] sm:$0xe] }
 0x1e5   : > { %v2056_v29 = vpop.permute.xlu0 %2055  ;;  %v6442_v46 = vpop.permute.xlu1 %2567  ;;  %v1194_v14 = vrot.slane %v1192_v9, 1  ;;  %v1197_v5 = vrot.slane %v1195_v4, 2  ;;  %v7047_v4 = vld [vmem:[#allocation75_spill] sm:$0xff] }
 0x1e7   : > { %1022 = vrot.lane.b32.xlu0 %v1013_v48, %s6937_s29  ;;  %v2151_v48 = vsel %vm1297_vm3, %v2141_v7, %v6068_v21 }
 0x1e8   : > { %1110 = vrot.lane.b32.xlu1 %v1102_v47, %s6912_s21  ;;  %v4040_v47 = vcombine.low %v427_v34, %v6406_v52  ;;  %v2161_v6 = vsel %vm7043_vm4, %v2151_v48, %v6090_v24  ;;  %vm7048_vm4 = vcmask 343040  }
 0x1e9   : > { %v6450_v56 = vpop.permute.xlu0 %2650  ;;  %v6454_v57 = vpop.permute.xlu1 %1997  ;;  %v2171_v49 = vsel %vm1319_vm5, %v2161_v6, %v6133_v18 }
 0x1ea   : > { %v2181_v21 = vsel %vm6889_vm6, %v2171_v49, %v6190_v41  ;;  %v1133_v24 = vrot.slane %v4040_v47, 1  ;;  %v4049_v41 = vcombine.low %v6418_v51, %v6418_v51 }
 0x1eb   : > { %1082 = vrot.lane.b32.xlu0 %v1073_v37, %s6911_s10  ;;  %v2191_v52 = vsel %vm1341_vm7, %v2181_v21, %v6262_v25  ;;  %v4219_v37 = vcombine.low %v7044_v43, %v3979_v58  ;;  %v7049_v58 = vld [vmem:[#allocation77_spill] sm:$0xff]  ;;  %v3980_v43 = vld [vmem:[%s4882_s18 + $0x3c] sm:$0x3] }
 0x1ec   : > { %1140 = vrot.lane.b32.xlu1 %v1132_v19, %s6943_s19  ;;  %v4060_v19 = vcombine.low %v3792_v60, %v4631_v20  ;;  %v2201_v18 = vsel %vm6890_vm8, %v2191_v52, %v6336_v28  ;;  %v1198_v28 = vor.u32 %v1197_v5, %v1194_v14  ;;  %v4050_v14 = vcombine.low %v3792_v60, %v3792_v60 }
 0x1ed   : > { %v2081_v11 = vpop.permute.xlu0 %2080  ;;  %v6469_v61 = vpop.permute.xlu1 %2592  ;;  %v2211_v25 = vsel %vm1363_vm9, %v2201_v18, %v6371_v62  ;;  %v4632_v62 = vld [vmem:[%s4885_s12 + $0x20] sm:$0xf]  ;;  %v3139_v9 = vshrl.u32 %v4219_v37, 16 }
 0x1ee   : > { %v2221_v42 = vsel %vm1374_vm10, %v2211_v25, %v6397_v3  ;;  %v4054_v47 = vcombine.low %v4632_v62, %v4632_v62 }
 0x1ef   : > { %1112 = vrot.lane.b32.xlu0 %v1103_v63, %s6912_s21  ;;  %v2231_v7 = vsel %vm7045_vm13, %v2221_v42, %v6420_v8  ;;  %v7046_v63 = vld [vmem:[#allocation74_spill] sm:$0xff]  ;;  %vm7050_vm13 = vcmask 121856   ;;  %s4239_s21 = sshll.u32 %s4714_s27, 1 }
 0x1f0   : > { %1205 = vrot.lane.b32.xlu1 %v1190_v55, %s6913_s16  ;;  %v2123_v48 = vsel %vm1259_vm0, %v4060_v19, %v7046_v63  ;;  %v2241_v51 = vsel %vm1396_vm12, %v2231_v7, %v2056_v29  ;;  %v3142_v55 = vshll.u32 %v4219_v37, 16  ;;  %s3607_s13 = sadd.s32 %s4240_s9, %s4239_s21 }
 0x1f1   : > { %v6483_v13 = vpop.permute.xlu0 %2680  ;;  %v2058_v34 = vpop.permute.xlu1 %2057  ;;  %v2133_v3 = vsel %vm1275_vm1, %v2123_v48, %v7047_v4  ;;  %v2251_v6 = vsel %vm7048_vm4, %v2241_v51, %v2081_v11  ;;  %v3141_v11 = vrot.slane %v3139_v9, 1  ;;  %vm7052_vm4 = vcmask 293888   ;;  %s4241_s17 = sshll.u32 %s3607_s13, 6 }
 0x1f2   : > { %v2143_v49 = vsel %vm1286_vm2, %v2133_v3, %v7049_v58 }
 0x1f3   : > { %1142 = vrot.lane.b32.xlu0 %v1133_v24, %s6943_s19  ;;  %v2153_v52 = vsel %vm1297_vm3, %v2143_v49, %v6114_v10 }
 0x1f4   : > { %1230 = vrot.lane.b32.xlu1 %v4049_v41, %s6914_s0  ;;  %v2163_v5 = vsel %vm7050_vm13, %v2153_v52, %v6169_v33  ;;  %v3144_v41 = vrot.slane %v3142_v55, 2  ;;  %v7051_v33 = vld [vmem:[#allocation73_spill] sm:$0xff]  ;;  %vm7053_vm13 = vcmask 343040  }
 0x1f5   : > { %v2106_v8 = vpop.permute.xlu0 %2105  ;;  %v6500_v21 = vpop.permute.xlu1 %2652  ;;  %v2173_v37 = vsel %vm1319_vm5, %v2163_v5, %v6238_v23  ;;  %v4220_v7 = vcombine.low %v7051_v33, %v3980_v43 }
 0x1f6   : > { %v2261_v29 = vsel %vm1418_vm14, %v2251_v6, %v2106_v8  ;;  %v2183_v10 = vsel %vm6889_vm6, %v2173_v37, %v6314_v39  ;;  %v3145_v48 = vor.u32 %v3144_v41, %v3141_v11 }
 0x1f7   : > { %v3059_v24 = vshll.u32 %v2261_v29, 16  ;;  %1207 = vrot.lane.b32.xlu0 %v1198_v28, %s6913_s16  ;;  %v3057_v20 = vshrl.u32 %v2261_v29, 16  ;;  %v2193_v60 = vsel %vm1341_vm7, %v2183_v10, %v6363_v17 }
 0x1f8   : > { %1255 = vrot.lane.b32.xlu1 %v4054_v47, %s6915_s20  ;;  %v2203_v28 = vsel %vm6890_vm8, %v2193_v60, %v6388_v22  ;;  %v3147_v47 = vshrl.u32 %v4220_v7, 16  ;;  %v4633_v60 = vld [vmem:[%s4885_s12 + $0x28] sm:$0xf]  ;;  %s328_s12 = sand.u32 1, %s4706_s25  }
 0x1f9   : > { %v3061_v19 = vrot.slane %v3059_v24, 1  ;;  %v2711_v18 = vpop.permute.xlu0 %2710  ;;  %v2083_v25 = vpop.permute.xlu1 %2082  ;;  %v2213_v23 = vsel %vm1363_vm9, %v2203_v28, %v6410_v38  ;;  %v3150_v38 = vshll.u32 %v4220_v7, 16  ;;  %s3775_s19 = sshll.u32 %s328_s12, 3  ;;  %s6775_s27 = scalar_lea.sflag [#allocation4], %s328_s12 }
 0x1fa   : > { %v2223_v39 = vsel %vm1374_vm10, %v2213_v23, %v6433_v44  ;;  %v2936_v44 = vsel %vm7054_vm11, %v6317_v16, %v6354_v31  ;;  %v3149_v8 = vrot.slane %v3147_v47, 1  ;;  %v2928_v16 = vsel %vm1297_vm3, %v6347_v30, %v6376_v59 }
 0x1fb   : > { %v3062_v42 = vor.u32 %v3061_v19, %v3057_v20  ;;  %1232 = vrot.lane.b32.xlu0 %v4050_v14, %s6914_s0  ;;  %v2233_v17 = vsel %vm7052_vm4, %v2223_v39, %v6454_v57  ;;  %v2946_v57 = vsel %vm1319_vm5, %v2936_v44, %v6383_v26  ;;  %v3152_v49 = vrot.slane %v3150_v38, 2  ;;  %v7057_v44 = vld [vmem:[#allocation15_spill] sm:$0xff]  ;;  %s3356_s0 = scalar_select %p3355_p13, 1, 0 }
 0x1fc   : > { %v2243_v62 = vsel %vm1396_vm12, %v2233_v17, %v2058_v34  ;;  %v2956_v29 = vsel %vm6889_vm6, %v2946_v57, %v6408_v40  ;;  %v2938_v40 = vsel %vm7054_vm11, %v2928_v16, %v6399_v54  ;;  %vm7055_vm11 = vmmov %vm7052_vm4 }
 0x1fd   : > { %3075 = vrot.lane.b32.xlu1 %v3062_v42, %s7040_s1  ;;  %v2683_v63 = vpop.permute.xlu0 %2682  ;;  %v2771_v51 = vpop.permute.xlu1 %2770  ;;  %v2253_v9 = vsel %vm7053_vm13, %v2243_v62, %v2083_v25  ;;  %v2966_v24 = vsel %vm1341_vm7, %v2956_v29, %v6430_v53  ;;  %v3153_v11 = vor.u32 %v3152_v49, %v3149_v8  ;;  %v4055_v42 = vcombine.low %v4633_v60, %v4633_v60  ;;  %v7059_v49 = vld [vmem:[#allocation23_spill] sm:$0xff] }
 0x1fe   : > { %v2976_v5 = vsel %vm6890_vm8, %v2966_v24, %v6450_v56  ;;  %v2948_v56 = vsel %vm1319_vm5, %v2938_v40, %v6423_v27 }
 0x1ff   : > { %v2986_v31 = vsel %vm1363_vm9, %v2976_v5, %v6483_v13  ;;  %v2958_v30 = vsel %vm6889_vm6, %v2948_v56, %v6442_v46 }
 0x200   : > { %v2996_v53 = vsel %vm1374_vm10, %v2986_v31, %v2711_v18  ;;  %v2968_v13 = vsel %vm1341_vm7, %v2958_v30, %v6469_v61 }
 0x201   : > { %v2108_v22 = vpop.permute.xlu0 %2107  ;;  %3160 = vrot.lane.b32.xlu1 %v3145_v48, %s4751_s26  ;;  %v2713_v4 = vpop.permute.xlu1 %2712  ;;  %v3006_v37 = vsel %vm7052_vm4, %v2996_v53, %v2771_v51  ;;  %v2978_v19 = vsel %vm6890_vm8, %v2968_v13, %v6500_v21  ;;  %vm7056_vm4 = vmmov %vm7053_vm13  ;;  %v4635_v53 = vld [vmem:[%s4882_s18 + $0x10] sm:$0xf] }
 0x202   : > { %v2263_v3 = vsel %vm1418_vm14, %v2253_v9, %v2108_v22  ;;  %v2988_v41 = vsel %vm1363_vm9, %v2978_v19, %v2683_v63  ;;  %v7065_v19 = vld [vmem:[#allocation24_spill] sm:$0xff] }
 0x203   : > { %v3065_v6 = vshll.u32 %v2263_v3, 16  ;;  %v3063_v34 = vshrl.u32 %v2263_v3, 16  ;;  %v2998_v46 = vsel %vm1374_vm10, %v2988_v41, %v2713_v4  ;;  %v7066_v41 = vld [vmem:[#allocation28_spill] sm:$0xff] }
 0x205   : > { %v3067_v55 = vrot.slane %v3065_v6, 1  ;;  %v2831_v58 = vpop.permute.xlu0 %2830  ;;  %v2773_v52 = vpop.permute.xlu1 %2772  ;;  %v4634_v6 = vld [vmem:[%s4882_s18 + $0x8] sm:$0xf] }
 0x206   : > { %v3016_v59 = vsel %vm1396_vm12, %v3006_v37, %v2831_v58  ;;  %v3008_v25 = vsel %vm7055_vm11, %v2998_v46, %v2773_v52  ;;  %v1265_v8 = vsel %vm1259_vm0, %v4634_v6, %v7057_v44  ;;  %v7060_v52 = vld [vmem:[#allocation27_spill] sm:$0xff] }
 0x207   : > { %v3068_v14 = vor.u32 %v3067_v55, %v3063_v34  ;;  %v7058_v34 = vld [vmem:[#allocation19_spill] sm:$0xff] }
 0x208   : > { %v1279_v55 = vsel %vm1275_vm1, %v1265_v8, %v7058_v34 }
 0x209   : > { %3077 = vrot.lane.b32.xlu1 %v3068_v14, %s7040_s1  ;;  %v2856_v26 = vpop.permute.xlu0 %2855  ;;  %v2833_v43 = vpop.permute.xlu1 %2832  ;;  %v1290_v29 = vsel %vm1286_vm2, %v1279_v55, %v7059_v49  ;;  %v7061_v14 = vld [vmem:[#allocation31_spill] sm:$0xff] }
 0x20a   : > { %v3026_v20 = vsel %vm7053_vm13, %v3016_v59, %v2856_v26  ;;  %v3018_v33 = vsel %vm1396_vm12, %v3008_v25, %v2833_v43  ;;  %v1301_v24 = vsel %vm1297_vm3, %v1290_v29, %v7060_v52  ;;  %vm7062_vm13 = vcmask 121856   ;;  %v7063_v43 = vld [vmem:[#allocation13_spill] sm:$0xff]  ;;  %v7064_v59 = vld [vmem:[#allocation20_spill] sm:$0xff] }
 0x20b   : > { %v1312_v5 = vsel %vm7062_vm13, %v1301_v24, %v7061_v14  ;;  %v1268_v56 = vsel %vm1259_vm0, %v4635_v53, %v7063_v43  ;;  %v7067_v25 = vld [vmem:[#allocation32_spill] sm:$0xff]  ;;  %v3357_v43 = vstv %s3356_s0 }
 0x20c   : > { %v1281_v13 = vsel %vm1275_vm1, %v1268_v56, %v7064_v59 }
 0x20d   : > { %v2881_v54 = vpop.permute.xlu0 %2880  ;;  %3162 = vrot.lane.b32.xlu1 %v3153_v11, %s4751_s26  ;;  %v2858_v27 = vpop.permute.xlu1 %2857  ;;  %s6768_s26 = scalar_lea.hbm %s6833_s7, %s4241_s17 }
 0x20e   : > { %v3036_v18 = vsel %vm1418_vm14, %v3026_v20, %v2881_v54  ;;  %v3028_v21 = vsel %vm7056_vm4, %v3018_v33, %v2858_v27  ;;  %v1292_v27 = vsel %vm1286_vm2, %v1281_v13, %v7065_v19  ;;  %vm7068_vm4 = vmmov %vm7062_vm13  ;;  %vm7069_vm13 = vcmask 343040  }
 0x20f   : > { %v3087_v10 = vrot.slane %v3036_v18, 1 }
 0x211   : > { %3095 = vrot.lane.b32.xlu0 %v3087_v10, %s4750_s15  ;;  %v2883_v61 = vpop.permute.xlu0 %2882  ;;  %v907_v7 = vpop.permute.xlu1 %906  ;;  %v1303_v10 = vsel %vm1297_vm3, %v1292_v27, %v7066_v41  ;;  %v7079_v41 = vld [vmem:[#allocation14_spill] sm:$0xff] }
 0x212   : > { %v3038_v28 = vsel %vm1418_vm14, %v3028_v21, %v2883_v61  ;;  %v1323_v31 = vsel %vm1319_vm5, %v1312_v5, %v907_v7  ;;  %v1314_v61 = vsel %vm7068_vm4, %v1303_v10, %v7067_v25  ;;  %vm7071_vm4 = vcmask 154624  }
 0x213   : > { %v3088_v48 = vrot.slane %v3038_v28, 1 }
 0x215   : > { %1257 = vrot.lane.b32.xlu0 %v4055_v42, %s6915_s20  ;;  %v932_v23 = vpop.permute.xlu0 %931 }
 0x216   : > { %v909_v63 = vpop.permute.xlu1 %908  ;;  %v1334_v11 = vsel %vm6889_vm6, %v1323_v31, %v932_v23 }
 0x217   : > { %v1325_v33 = vsel %vm1319_vm5, %v1314_v61, %v909_v63 }
 0x219   : > { %3097 = vrot.lane.b32.xlu0 %v3088_v48, %s4750_s15  ;;  %v957_v39 = vpop.permute.xlu0 %956  ;;  %s4753_s15 = smov [#allocation3]  }
 0x21a   : > { %v934_v51 = vpop.permute.xlu1 %933  ;;  %v1345_v40 = vsel %vm1341_vm7, %v1334_v11, %v957_v39  ;;  %s4642_s23 = sshll.u32 %s4753_s15, 4  ;;  %s4643_s23 = int_to_ptr.vmem [resolvable:$false] %s4642_s23 }
 0x21b   : > { %v1336_v28 = vsel %vm6889_vm6, %v1325_v33, %v934_v51  ;;  %vm7073_vm6 = vcmask 293888   ;;  %v7083_v33 = vld [vmem:[#allocation33_spill] sm:$0xff]  ;;  %s4644_s1 = scalar_lea.vmem %s4643_s23, 256 }
 0x21d   : > { %v1017_v17 = vpop.permute.xlu0 %1016 }
 0x21e   : > { %v959_v62 = vpop.permute.xlu1 %958  ;;  %v1356_v37 = vsel %vm6890_vm8, %v1345_v40, %v1017_v17 }
 0x21f   : > { %v1347_v48 = vsel %vm1341_vm7, %v1336_v28, %v959_v62  ;;  %v4637_v28 = vld [vmem:[%s4882_s18 + $0x20] sm:$0xf] }
 0x221   : > { %v1077_v47 = vpop.permute.xlu0 %1076 }
 0x222   : > { %v1019_v9 = vpop.permute.xlu1 %1018  ;;  %v1367_v20 = vsel %vm1363_vm9, %v1356_v37, %v1077_v47 }
 0x223   : > { %v1358_v17 = vsel %vm6890_vm8, %v1347_v48, %v1019_v9  ;;  %vm7075_vm8 = vcmask 343040  }
 0x225   : > { %v1107_v22 = vpop.permute.xlu0 %1106 }
 0x226   : > { %v1079_v38 = vpop.permute.xlu1 %1078  ;;  %v1378_v18 = vsel %vm1374_vm10, %v1367_v20, %v1107_v22 }
 0x227   : > { %v1369_v22 = vsel %vm1363_vm9, %v1358_v17, %v1079_v38  ;;  %v7087_v17 = vld [vmem:[#allocation22_spill] sm:$0xff] }
 0x229   : > { %v1137_v4 = vpop.permute.xlu0 %1136 }
 0x22a   : > { %v1109_v3 = vpop.permute.xlu1 %1108  ;;  %v1389_v46 = vsel %vm7055_vm11, %v1378_v18, %v1137_v4  ;;  %vm7070_vm11 = vcmask 130048   ;;  %v4636_v18 = vld [vmem:[%s4882_s18 + $0x18] sm:$0xf]  ;;  %s6755_s18 = scalar_lea.vmem [#allocation3], %s3775_s19 }
 0x22b   : > { %v1380_v63 = vsel %vm1374_vm10, %v1369_v22, %v1109_v3  ;;  %v1271_v10 = vsel %vm1259_vm0, %v4636_v18, %v7079_v41  ;;  %s3610_s10 = sshll.u32 %s6755_s18, 4  ;;  %s6770_s10 = int_to_ptr.vmem [resolvable:$true] %s3610_s10 }
 0x22c   : > { %s4638_s28 = scalar_lea.vmem %s6770_s10, 128  ;;  %p4645_p4 = scmp.lt.s32.totalorder %s6770_s10, %s4643_s23 }
 0x22d   : > { %v1202_v57 = vpop.permute.xlu0 %1201  ;;  %p4639_p0 = scmp.ne.s32.totalorder %s6770_s10, %s4638_s28  ;;  %p4646_p5 = scmp.lt.s32.totalorder %s4644_s1, %s4638_s28 }
 0x22e   : > { %v1139_v58 = vpop.permute.xlu1 %1138  ;;  %v1400_v60 = vsel %vm1396_vm12, %v1389_v46, %v1202_v57  ;;  %v7074_v57 = vld [vmem:[#allocation76_spill] sm:$0xff]  ;;  %v7080_v46 = vld [vmem:[#allocation21_spill] sm:$0xff] }
 0x22f   : > { %v1391_v44 = vsel %vm7073_vm6, %v1380_v63, %v1139_v58  ;;  %vm7076_vm6 = vmmov %vm7070_vm11  ;;  %v1283_v25 = vsel %vm1275_vm1, %v1271_v10, %v7080_v46  ;;  %p4640_p1 = pnand %p4639_p0, %p4847_p3  ;;  %p4647_p6 = por %p4646_p5, %p4645_p4 }
 0x231   : > { %v1227_v16 = vpop.permute.xlu0 %1226  ;;  %p4641_p2 = pneg %p4640_p1 }
 0x232   : > { %v1204_v26 = vpop.permute.xlu1 %1203  ;;  %v1411_v7 = vsel %vm7069_vm13, %v1400_v60, %v1227_v16  ;;  %vm7072_vm13 = vcmask 785408  }
 0x233   : > { %v1402_v62 = vsel %vm1396_vm12, %v1391_v44, %v1204_v26  ;;  %v7090_v44 = vld [vmem:[#allocation30_spill] sm:$0xff]  ;;  %p4648_p7 = pnand %p4647_p6, %p4641_p2 }
 0x235   : > { %v1252_v30 = vpop.permute.xlu0 %1251 }
 0x236   : > { %v1229_v54 = vpop.permute.xlu1 %1228  ;;  %v1422_v23 = vsel %vm1418_vm14, %v1411_v7, %v1252_v30 }
 0x237   : > { %v1413_v9 = vsel %vm7075_vm8, %v1402_v62, %v1229_v54  ;;  %vm3358_vm8 = vcmp.eq.s32.totalorder %v3357_v43, 1 }
 0x239   : > { %v3072_v42 = vpop.permute.xlu0 %3071 }
 0x23a   : > { %v3092_v21 = vpop.permute.xlu1 %3091  ;;  %v3168_v39 = vsel %vm3164_vm15, %v1422_v23, %v3072_v42  ;;  %v7085_v23 = vld [vmem:[#allocation18_spill] sm:$0xff] }
 0x23b   : > { %v3180_v51 = vsel %vm7072_vm13, %v3168_v39, %v3092_v21  ;;  %v1274_v48 = vsel %vm1259_vm0, %v4637_v28, %v7085_v23 }
 0x23d   : > { %v3157_v47 = vpop.permute.xlu0 %3156 }
 0x23e   : > { %v1254_v4 = vpop.permute.xlu1 %1253  ;;  %v3195_v6 = vsel %vm7070_vm11, %v3092_v21, %v3157_v47  ;;  %vm7077_vm11 = vmmov %vm7071_vm4  ;;  %v1285_v47 = vsel %vm1275_vm1, %v1274_v48, %v7087_v17  ;;  %vm7092_vm1 = vcmask 293888  }
 0x23f   : > { %4234 = vmatprep.mubr.msk.bf16.mxu1 %vm7071_vm4, %v3195_v6  ;;  %v1424_v34 = vsel %vm1418_vm14, %v1413_v9, %v1254_v4  ;;  %vm7078_vm4 = vmmov %vm7072_vm13  ;;  %vm7084_vm13 = vcmask 121856   ;;  %v7088_v6 = vld [vmem:[#allocation26_spill] sm:$0xff] }
 0x240   : > { %3396 = vmatmul.mubr.bf16.vlgmr.msra.gmra.mxu1 %v3180_v51  ;;  %v1296_v63 = vsel %vm1286_vm2, %v1285_v47, %v7088_v6  ;;  %vm7091_vm0 = vmmov %vm7084_vm13 }
 0x241   : > { %v3074_v8 = vpop.permute.xlu0 %3073  ;;  %3458 = vmatpush1.bf16.msra.mxu1 %v7074_v57  ;;  %v1307_v62 = vsel %vm1297_vm3, %v1296_v63, %v7090_v44 }
 0x242   : > { %v3094_v38 = vpop.permute.xlu1 %3093  ;;  %3459 = vmatprep.subr.bf16.mxu1 %v6944_v0  ;;  %v3170_v3 = vsel %vm3164_vm15, %v1424_v34, %v3074_v8 }
 0x243   : > { %v3183_v29 = vsel %vm7078_vm4, %v3170_v3, %v3094_v38 }
 0x245   : > { %v3159_v55 = vpop.permute.xlu0 %3158  ;;  %3460 = vmatpush1.bf16.msra.mxu1 %v6095_v45 }
 0x246   : > { %v6624_v49 = vpop.permute.xlu1 %910  ;;  %v3197_v58 = vsel %vm7076_vm6, %v3094_v38, %v3159_v55  ;;  %3461 = vmatprep.subr.bf16.mxu1 %v6944_v0  ;;  %vm7086_vm6 = vcmask 171008  }
 0x247   : > { %4235 = vmatprep.mubr.msk.bf16.mxu0 %vm7077_vm11, %v3197_v58  ;;  %vm7089_vm11 = vcmask 220160  }
 0x248   : > { %3443 = vmatmul.mubr.bf16.vlgmr.msra.gmra.mxu0 %v3183_v29  ;;  %vm7095_vm4 = vmmov %vm7089_vm11 }
 0x249   : > { %v6630_v52 = vpop.permute.xlu0 %847  ;;  %3462 = vmatpush1.bf16.msra.mxu1 %v6120_v1  ;;  %3505 = vmatpush1.bf16.msra.mxu0 %v7074_v57 }
 0x24a   : > { %v6634_v24 = vpop.permute.xlu1 %935  ;;  %3463 = vmatprep.subr.bf16.mxu1 %v6944_v0  ;;  %3506 = vmatprep.subr.bf16.mxu0 %v6944_v0  ;;  %v1318_v57 = vsel %vm7091_vm0, %v1307_v62, %v6630_v52 }
 0x24d   : > { %3464 = vmatpush1.bf16.msra.mxu1 %v6160_v50  ;;  %3507 = vmatpush1.bf16.msra.mxu0 %v6095_v45  ;;  %v6644_v5 = vpop.permute.xlu0 %912 }
 0x24e   : > { %v6640_v14 = vpop.permute.xlu1 %960  ;;  %3465 = vmatprep.subr.bf16.mxu1 %v6944_v0  ;;  %3508 = vmatprep.subr.bf16.mxu0 %v6944_v0  ;;  %v1329_v38 = vsel %vm1319_vm5, %v1318_v57, %v6644_v5 }
 0x251   : > { %3466 = vmatpush1.bf16.msra.mxu1 %v6195_v12  ;;  %3509 = vmatpush1.bf16.msra.mxu0 %v6120_v1  ;;  %v6652_v45 = vpop.permute.xlu0 %937 }
 0x252   : > { %3467 = vmatprep.subr.bf16.mxu1 %v6944_v0  ;;  %3510 = vmatprep.subr.bf16.mxu0 %v6944_v0  ;;  %v6650_v16 = vpop.permute.xlu1 %1020 }
 0x255   : > { %3468 = vmatpush1.bf16.msra.mxu1 %v6227_v2  ;;  %3511 = vmatpush1.bf16.msra.mxu0 %v6160_v50  ;;  %v6662_v1 = vpop.permute.xlu0 %962 }
 0x256   : > { %3469 = vmatprep.subr.bf16.mxu1 %v6944_v0  ;;  %3512 = vmatprep.subr.bf16.mxu0 %v6944_v0  ;;  %v1081_v31 = vpop.permute.xlu1 %1080 }
 0x259   : > { %3470 = vmatpush1.bf16.msra.mxu1 %v6267_v32  ;;  %3513 = vmatpush1.bf16.msra.mxu0 %v6195_v12  ;;  %v1023_v26 = vpop.permute.xlu0 %1022  ;;  %v6674_v12 = vld [vmem:[%s6831_s5] ss:$0 sm:$0xff] }
 0x25a   : > { %3471 = vmatprep.subr.bf16.mxu1 %v6944_v0  ;;  %3514 = vmatprep.subr.bf16.mxu0 %v6944_v0  ;;  %v1111_v50 = vpop.permute.xlu1 %1110 }
 0x25d   : > { %3472 = vmatpush1.bf16.msra.mxu1 %v6305_v36  ;;  %3515 = vmatpush1.bf16.msra.mxu0 %v6227_v2  ;;  %v6681_v2 = vld [vmem:[%s6832_s6] ss:$0 sm:$0xff]  ;;  %v1083_v56 = vpop.permute.xlu0 %1082 }
 0x25e   : > { %3485 = vmatprep.subr.bf16.mxu1 %v6944_v0  ;;  %3516 = vmatprep.subr.bf16.mxu0 %v6944_v0  ;;  %v1141_v40 = vpop.permute.xlu1 %1140 }
 0x261   : > { %3486 = vmatpush2.bf16.msra.mxu1 %v7036_v35  ;;  %3517 = vmatpush1.bf16.msra.mxu0 %v6267_v32 }
 0x262   : > { %3487 = vmatprep.subr.bf16.mxu1 %v6944_v0  ;;  %3518 = vmatprep.subr.bf16.mxu0 %v6944_v0  ;;  %v1206_v20 = vpop.permute.xlu1 %1205 }
 0x264   : > { %v3346_v11 = vpop.f32.mrf.mxu0 }
 0x265   : > { %v3352_v53 = vmul.f32 %v6674_v12, %v3346_v11  ;;  %3488 = vmatpush2.bf16.msra.mxu1 %v6359_v15  ;;  %3519 = vmatpush1.bf16.msra.mxu0 %v6305_v36  ;;  %v1113_v36 = vpop.permute.xlu0 %1112 }
 0x266   : > { %v3348_v32 = vpop.f32.mrf.mxu0  ;;  %3532 = vmatprep.subr.bf16.mxu0 %v6944_v0  ;;  %v1231_v19 = vpop.permute.xlu1 %1230 }
 0x267   : > { %v3353_v37 = vadd.f32 %v6681_v2, %v3352_v53 }
 0x268   : > { %v3349_v30 = vpop.f32.mrf.mxu0 }
 0x269   : > { %v3354_v59 = vmax.f32 %v3353_v37, 0.0  ;;  %3533 = vmatpush2.bf16.msra.mxu0 %v7036_v35  ;;  %v1143_v27 = vpop.permute.xlu0 %1142  ;;  %v7081_v35 = vld [vmem:[#allocation25_spill] sm:$0xff] }
 0x26a   : > { %v3350_v13 = vpop.f32.mrf.mxu0  ;;  %3534 = vmatprep.subr.bf16.mxu0 %v6944_v0  ;;  %v1294_v61 = vsel %vm1286_vm2, %v1283_v25, %v7081_v35  ;;  %v7082_v0 = vld [vmem:[#allocation29_spill] sm:$0xff]  ;;  %v1256_v42 = vpop.permute.xlu1 %1255  ;;  %vm7093_vm2 = vmmov %vm7086_vm6 }
 0x26b   : > { %v3359_v54 = vsel %vm3358_vm8, %v3354_v59, 0.0  ;;  %v1305_v60 = vsel %vm1297_vm3, %v1294_v61, %v7082_v0  ;;  %vm7094_vm3 = vcmask 343040   ;;  %vm7097_vm8 = vcmask 130048  }
 0x26c   : > { %3360 = vst [vmem:[#allocation2 + $0x1] sm:$0xff] %v3359_v54  ;;  %v1316_v7 = vsel %vm7084_vm13, %v1305_v60, %v7083_v33  ;;  %vm7098_vm13 = vmmov %vm7092_vm1 }
 0x26d   : > { %3535 = vmatpush2.bf16.msra.mxu0 %v6359_v15  ;;  %v1327_v15 = vsel %vm1319_vm5, %v1316_v7, %v6624_v49  ;;  %v1208_v21 = vpop.permute.xlu0 %1207  ;;  %v1340_v49 = vsel %vm7093_vm2, %v1329_v38, %v6652_v45  ;;  %vm7096_vm5 = vcmask 785408  }
 0x26e   : > { %v1338_v39 = vsel %vm7086_vm6, %v1327_v15, %v6634_v24  ;;  %v1351_v29 = vsel %vm1341_vm7, %v1340_v49, %v6662_v1  ;;  %vm7100_vm6 = vmmov %vm7094_vm3 }
 0x26f   : > { %v1349_v22 = vsel %vm1341_vm7, %v1338_v39, %v6640_v14  ;;  %v3076_v4 = vpop.permute.xlu1 %3075  ;;  %v1362_v52 = vsel %vm7095_vm4, %v1351_v29, %v1023_v26  ;;  %vm7099_vm7 = vcmask 154624  }
 0x270   : > { %v1360_v51 = vsel %vm7089_vm11, %v1349_v22, %v6650_v16  ;;  %v1373_v5 = vsel %vm1363_vm9, %v1362_v52, %v1083_v56  ;;  %vm7103_vm11 = vmmov %vm7099_vm7 }
 0x271   : > { %v1371_v8 = vsel %vm1363_vm9, %v1360_v51, %v1081_v31  ;;  %v1233_v3 = vpop.permute.xlu0 %1232  ;;  %vm7101_vm9 = vmmov %vm7096_vm5 }
 0x272   : > { %v1382_v9 = vsel %vm1374_vm10, %v1371_v8, %v1111_v50  ;;  %v1384_v50 = vsel %vm1374_vm10, %v1373_v5, %v1113_v36  ;;  %vm7102_vm10 = vmmov %vm7097_vm8 }
 0x273   : > { %v1393_v34 = vsel %vm7092_vm1, %v1382_v9, %v1141_v40  ;;  %v3161_v55 = vpop.permute.xlu1 %3160  ;;  %v1395_v40 = vsel %vm7098_vm13, %v1384_v50, %v1143_v27  ;;  %v3549_v7 = vld [vmem:[#allocation2] ss:$2 sm:$0xf]  ;;  %v3559_v15 = vld [vmem:[#allocation2 + $0x1] ss:$2 sm:$0xf] }
 0x274   : > { %v1404_v58 = vsel %vm1396_vm12, %v1393_v34, %v1206_v20  ;;  %v1406_v26 = vsel %vm1396_vm12, %v1395_v40, %v1208_v21  ;;  %v3578_v28 = vmax.f32 %v3549_v7, %v3559_v15  ;;  %v3569_v48 = vld [vmem:[#allocation2 + $0x2] ss:$2 sm:$0xf] }
 0x275   : > { %v1415_v24 = vsel %vm7094_vm3, %v1404_v58, %v1231_v19  ;;  %v1417_v53 = vsel %vm7100_vm6, %v1406_v26, %v1233_v3 }
 0x276   : > { %v1426_v14 = vsel %vm1418_vm14, %v1415_v24, %v1256_v42 }
 0x277   : > { %v3172_v16 = vsel %vm3164_vm15, %v1426_v14, %v3076_v4  ;;  %v3583_v4 = vmax.f32 %v3578_v28, %v3569_v48 }
 0x27b   : > { %v3078_v1 = vpop.permute.xlu1 %3077 }
 0x27f   : > { %v3163_v56 = vpop.permute.xlu1 %3162 }
 0x283   : > { %v3096_v31 = vpop.permute.xlu0 %3095 }
 0x284   : > { %v3186_v45 = vsel %vm7096_vm5, %v3172_v16, %v3096_v31  ;;  %v3199_v11 = vsel %vm7097_vm8, %v3096_v31, %v3161_v55 }
 0x285   : > { %4236 = vmatprep.mubr.msk.bf16.mxu1 %vm7099_vm7, %v3199_v11 }
 0x286   : > { %3490 = vmatmul.mubr.bf16.vlgmr.msra.gmra.mxu1 %v3186_v45 }
 0x287   : > { %v1258_v43 = vpop.permute.xlu0 %1257 }
 0x288   : > { %v1428_v32 = vsel %vm1418_vm14, %v1417_v53, %v1258_v43 }
 0x289   : > { %v3174_v37 = vsel %vm3164_vm15, %v1428_v32, %v3078_v1 }
 0x28b   : > { %v3098_v30 = vpop.permute.xlu0 %3097 }
 0x28c   : > { %v3189_v59 = vsel %vm7101_vm9, %v3174_v37, %v3098_v30  ;;  %v3201_v13 = vsel %vm7102_vm10, %v3098_v30, %v3163_v56 }
 0x28d   : > { %4237 = vmatprep.mubr.msk.bf16.mxu0 %vm7103_vm11, %v3201_v13 }
 0x28e   : > { %3537 = vmatmul.mubr.bf16.vlgmr.msra.gmra.mxu0 %v3189_v59 }
 0x300   : > { %v3397_v20 = vpop.f32.mrf.mxu1 }
 0x301   : > { %v3403_v54 = vmul.f32 %v6674_v12, %v3397_v20 }
 0x302   : > { %v3399_v36 = vpop.f32.mrf.mxu1 }
 0x303   : > { %v3404_v19 = vadd.f32 %v6681_v2, %v3403_v54 }
 0x304   : > { %v3400_v27 = vpop.f32.mrf.mxu1 }
 0x305   : > { %v3405_v18 = vmax.f32 %v3404_v19, 0.0 }
 0x306   : > { %v3401_v41 = vpop.f32.mrf.mxu1 }
 0x307   : > { %3407 = vst [vmem:[#allocation2 + $0x11] sm:$0xff] %v3405_v18 }
 0x308   : > { %v3444_v10 = vpop.f32.mrf.mxu0 }
 0x309   : > { %v3450_v46 = vmul.f32 %v6674_v12, %v3444_v10 }
 0x30a   : > { %v3446_v25 = vpop.f32.mrf.mxu0 }
 0x30b   : > { %v3451_v35 = vadd.f32 %v6681_v2, %v3450_v46 }
 0x30c   : > { %v3447_v61 = vpop.f32.mrf.mxu0 }
 0x30d   : > { %v3452_v0 = vmax.f32 %v3451_v35, 0.0 }
 0x30e   : > { %v3448_v60 = vpop.f32.mrf.mxu0  ;;  %v3551_v42 = vld [vmem:[#allocation2 + $0x10] ss:$2 sm:$0xf]  ;;  %v3561_v33 = vld [vmem:[#allocation2 + $0x11] ss:$2 sm:$0xf] }
 0x30f   : > { %3454 = vst [vmem:[#allocation2 + $0x21] sm:$0xff] %v3452_v0  ;;  %v3579_v21 = vmax.f32 %v3551_v42, %v3561_v33  ;;  %v3571_v23 = vld [vmem:[#allocation2 + $0x12] ss:$2 sm:$0xf] }
 0x311   : > { %v3584_v39 = vmax.f32 %v3579_v21, %v3571_v23 }
 0x313   : > { %v3588_v51 = vmax.f32 %v3583_v4, %v3584_v39 }
 0x316   : > { %v3553_v17 = vld [vmem:[#allocation2 + $0x20] ss:$2 sm:$0xf]  ;;  %v3563_v47 = vld [vmem:[#allocation2 + $0x21] ss:$2 sm:$0xf] }
 0x317   : > { %v3580_v22 = vmax.f32 %v3553_v17, %v3563_v47  ;;  %v3573_v6 = vld [vmem:[#allocation2 + $0x22] ss:$2 sm:$0xf] }
 0x319   : > { %v3585_v63 = vmax.f32 %v3580_v22, %v3573_v6 }
 0x31b   : > { %v3589_v44 = vmax.f32 %v3588_v51, %v3585_v63 }
 0x31d   : > { %3592 = vst [vmem:[%s6755_s18] sm:$0xf] %v3589_v44 }
 0x346   : > { %v3491_v62 = vpop.f32.mrf.mxu1 }
 0x347   : > { %v3497_v8 = vmul.f32 %v6674_v12, %v3491_v62 }
 0x348   : > { %v3493_v57 = vpop.f32.mrf.mxu1 }
 0x349   : > { %v3498_v9 = vadd.f32 %v6681_v2, %v3497_v8 }
 0x34a   : > { %v3494_v38 = vpop.f32.mrf.mxu1 }
 0x34b   : > { %v3499_v34 = vmax.f32 %v3498_v9, 0.0 }
 0x34c   : > { %v3495_v3 = vpop.f32.mrf.mxu1 }
 0x34d   : > { %3501 = vst [vmem:[#allocation2 + $0x31] sm:$0xff] %v3499_v34 }
 0x34e   : > { %v3538_v55 = vpop.f32.mrf.mxu0 }
 0x34f   : > { %v3544_v49 = vmul.f32 %v6674_v12, %v3538_v55 }
 0x350   : > { %v3540_v58 = vpop.f32.mrf.mxu0 }
 0x351   : > { %v3545_v29 = vadd.f32 %v6681_v2, %v3544_v49 }
 0x352   : > { %v3541_v24 = vpop.f32.mrf.mxu0 }
 0x353   : > { %v3546_v52 = vmax.f32 %v3545_v29, 0.0 }
 0x354   : > { %v3542_v14 = vpop.f32.mrf.mxu0  ;;  %v3555_v5 = vld [vmem:[#allocation2 + $0x30] ss:$2 sm:$0xf]  ;;  %v3565_v16 = vld [vmem:[#allocation2 + $0x31] ss:$2 sm:$0xf] }
 0x355   : > { %3548 = vst [vmem:[#allocation2 + $0x41] sm:$0xff] %v3546_v52  ;;  %v3581_v31 = vmax.f32 %v3555_v5, %v3565_v16  ;;  %v3575_v50 = vld [vmem:[#allocation2 + $0x32] ss:$2 sm:$0xf] }
 0x357   : > { %v3586_v45 = vmax.f32 %v3581_v31, %v3575_v50 }
 0x359   : > { %v3590_v26 = vmax.f32 %v3585_v63, %v3586_v45 }
 0x35c   : > { %v3557_v12 = vld [vmem:[#allocation2 + $0x40] ss:$2 sm:$0xf]  ;;  %v3567_v11 = vld [vmem:[#allocation2 + $0x41] ss:$2 sm:$0xf] }
 0x35d   : > { %v3582_v40 = vmax.f32 %v3557_v12, %v3567_v11  ;;  %v3577_v2 = vld [vmem:[#allocation2 + $0x42] ss:$2 sm:$0xf] }
 0x35f   : > { %v3587_v1 = vmax.f32 %v3582_v40, %v3577_v2 }
 0x361   : > { %v3591_v53 = vmax.f32 %v3590_v26, %v3587_v1 }
 0x363   : > { %3593 = vst [vmem:[%s6755_s18 + $0x4] sm:$0xf] %v3591_v53 }
 0x364   : > { %4651 = shalt.err (!%p4648_p7)
}
 0x365   : > { %s4652_s2 = scalar_lea.hbm %s6768_s26, 128  ;;  %s4656_s3 = scalar_lea.hbm %s6833_s7, 512 }
 0x366   : > { %p4653_p9 = scmp.ne.s32.totalorder %s6768_s26, %s4652_s2  ;;  %p4657_p12 = scmp.lt.s32.totalorder %s6768_s26, %s6833_s7 }
 0x367   : > { %p4658_p13 = scmp.lt.s32.totalorder %s4656_s3, %s4652_s2 }
 0x368   : > { %p4654_p10 = pnand %p4653_p9, %p4847_p3 }
 0x369   : > { %p4659_p0 = por %p4658_p13, %p4657_p12 }
 0x36a   : > { %p4655_p11 = pneg %p4654_p10 }
 0x36c   : > { %p4660_p1 = pnand %p4659_p0, %p4655_p11 }
 0x36e   : > { %4663 = shalt.err (!%p4660_p1)
}
 0x36f   : > { %s4754_s11 = smov 64   ;;  %s4755_s12 = smov 4  }
 0x370   : > { %4261 = dma.vmem_to_hbm [thread:$0]  (%p4847_p3), %s6770_s10, 128, %s6768_s26, %s6775_s27, %s4754_s11, %s4754_s11, %s4755_s12  }
 0x371 PF: > { %p4267_p2 = scmp.ge.s32.totalorder %s4730_s8, 2  ;;  %s3625_s18 = sand.u32 1, %s4702_s24  }
 0x372   : > { %s3626_s21 = scalar_lea.sflag [#allocation4], %s3625_s18 }
 0x373   : > { %p4264_p4 = pnand %p4267_p2, %p4856_p8 }
 0x375   : > { %p4265_p5 = pneg %p4264_p4 }
 0x377   : > { %4697 = dma.done.wait (%p4265_p5), %s3626_s21, 128  }
 0x378   : > { %4699 = vsyncadd (%p4265_p5), %s3626_s21, 4294967168  ;;  %s20_s8 = sadd.s32 1, %s4730_s8   ;;  %s7105_s9 = sld [smem:[#allocation6_spill]] }
 0x379   : > { %p17_p6 = scmp.ge.s32.totalorder %s20_s8, 6   ;;  %s7106_s26 = sld [smem:[#allocation12_spill]] }
 0x37a   : > { %s7107_s27 = sld [smem:[#allocation7_spill]]  ;;  %s7111_s24 = smov %s4706_s25 }
 0x37b   : > { %s7108_s28 = sld [smem:[#allocation8_spill]]  ;;  %19 = sbr.rel (!%p17_p6) target bundleno = 10 (0xa), region = 124 }
 0x37c   : > { %s7109_s29 = sld [smem:[#allocation9_spill]] }
 0x37d   : > { %s7110_s30 = sld [smem:[#allocation10_spill]] }
 0x37e   : > { %s7112_s25 = smov %s7105_s9 }
 0x380   :  { %3631 = vsyncpa [#allocation4], 1 }
 0x381   :  { %3633 = vsyncpa [#allocation4 + $0x1], 1 }

</bundles_post_ra>
